<compile_context>
chip_gen: v7x
topology: tpu7x:2x2x1
jax: 0.10.0
libtpu: 0.0.40
codegen_flags: <defaults>
</compile_context>

<pallas_src>
import functools

import jax
import jax.numpy as jnp
from jax.experimental import pallas as pl
from jax.experimental.pallas import tpu as pltpu


def _dynfilter_kernel(x0_ref, x1_ref, f_ref, col_ref, o_ref, xw_ref,
                      *, C, kh, kw, W, TQ, padding):
    """One (batch, spatial-block) grid step.

    x0_ref:  (1, C, TQ)          flat x, spatial block s
    x1_ref:  (1, C, TQ)          flat x, spatial block s+1 (halo)
    f_ref:   (1, C*kh*kw, TQ)    per-pixel filter block, lane-dense
    col_ref: (1, TQ) int32       column index (q mod W) of each flat position
    o_ref:   (1, 1, TQ)          output block, lane-dense
    xw_ref:  (C, 2*TQ)           VMEM scratch: stitched x window
    """
    KK = kh * kw

    # Stitch current block + next block so every tap offset is a static lane slice.
    xw_ref[:, :TQ] = x0_ref[0]
    xw_ref[:, TQ:] = x1_ref[0]

    col = col_ref[...]                                    # (1, TQ) int32
    acc = jnp.zeros((1, TQ), jnp.float32)

    for k in range(KK):                                   # 25 taps, static unroll
        dy, dx = divmod(k, kw)
        off = dy * W + dx                                 # constant lane offset
        xs = xw_ref[:, off:off + TQ].astype(jnp.float32)  # (C, TQ): one shift per tap
        if dx != padding:
            # Undo the row wrap of the flattened horizontal shift: positions whose
            # source column falls outside [0, W) must read the (zero) padding.
            valid = ((col >= padding - dx) &
                     (col < W + padding - dx)).astype(jnp.float32)   # (1, TQ)
            xs = xs * valid
        for c in range(C):
            row = c * KK + k
            fr = f_ref[0, row:row + 1, :].astype(jnp.float32)        # (1, TQ) contiguous
            acc = acc + xs[c:c + 1, :] * fr
    o_ref[0, :, :] = acc.astype(o_ref.dtype)


def _choose_block_rows(H, W, C, KK, kh, kw, target_bytes):
    """Pick TH rows per spatial block: TH | H, TH*W % 128 == 0, halo fits a block."""
    off_max = (kh - 1) * W + (kw - 1)
    min_th = -(-off_max // W)                             # ceil
    cands = [d for d in range(min_th, H + 1)
             if H % d == 0 and (d * W) % 128 == 0]
    if not cands:
        raise NotImplementedError(
            "dyn_filter: need a row-block TH dividing H with TH*W %% 128 == 0 and "
            "TH*W >= (kh-1)*W + kw - 1 (got H=%d, W=%d)" % (H, W))
    fitting = [d for d in cands if C * KK * d * W * 4 <= target_bytes]
    return max(fitting) if fitting else min(cands)


def dyn_filter(x, filt, kernel_size=(5, 5), padding=2, *, block_rows=None,
               target_block_bytes=4 << 20, vmem_limit_bytes=None):
    """Pallas implementation of DynFilter.forward.

    x:    (B, C, H, W) float32
    filt: (B, C*kh*kw, H, W) float32
    returns (B, 1, H, W) float32
    """
    if isinstance(kernel_size, int):
        kernel_size = (kernel_size, kernel_size)
    kh, kw = kernel_size
    B, C, H, W = x.shape
    KK = kh * kw
    assert filt.shape == (B, C * KK, H, W), filt.shape
    # PyTorch module uses a (2p+1)x(2p+1) kernel with padding=p -> "same" output.
    assert kh == 2 * padding + 1 and kw == 2 * padding + 1

    off_max = (kh - 1) * W + (kw - 1)                     # largest flat tap offset
    TH = (_choose_block_rows(H, W, C, KK, kh, kw, target_block_bytes)
          if block_rows is None else block_rows)
    TQ = TH * W
    assert H % TH == 0 and TQ % 128 == 0 and TQ >= off_max, (TH, W)
    n_sp = H // TH

    # x: zero-pad vertically, flatten spatial, pad the flat axis so every tap is a
    # constant offset, and round up to exactly n_sp+1 blocks (the extra block is the
    # halo source for the last spatial block).
    x_v = jnp.pad(x, ((0, 0), (0, 0), (padding, padding), (0, 0)))
    x_flat = x_v.reshape(B, C, (H + 2 * padding) * W)
    total = (n_sp + 1) * TQ
    right = total - x_flat.shape[-1] - padding
    x_flat = jnp.pad(x_flat, ((0, 0), (0, 0), (padding, right)))

    filt_flat = filt.reshape(B, C * KK, H * W)            # free reshape -> lane-dense
    out_len = H * W
    col = jnp.tile(jnp.arange(W, dtype=jnp.int32), TH).reshape(1, TQ)

    kernel = functools.partial(_dynfilter_kernel, C=C, kh=kh, kw=kw, W=W,
                               TQ=TQ, padding=padding)

    cost = pl.CostEstimate(
        flops=2 * B * C * KK * H * W,
        transcendentals=0,
        bytes_accessed=4 * (B * C * KK * H * W            # filter, read once
                            + B * H * W                   # output
                            + 2 * B * n_sp * C * TQ       # x, fetched twice per block
                            + B * n_sp * TQ))             # column indices

    out_flat = pl.pallas_call(
        kernel,
        out_shape=jax.ShapeDtypeStruct((B, 1, out_len), x.dtype),
        grid=(B, n_sp),
        in_specs=[
            pl.BlockSpec((1, C, TQ), lambda b, s: (b, 0, s)),        # x, block s
            pl.BlockSpec((1, C, TQ), lambda b, s: (b, 0, s + 1)),    # x, halo block
            pl.BlockSpec((1, C * KK, TQ), lambda b, s: (b, 0, s)),   # filter (dominant)
            pl.BlockSpec((1, TQ), lambda b, s: (0, 0)),              # column indices
        ],
        out_specs=pl.BlockSpec((1, 1, TQ), lambda b, s: (b, 0, s)),
        scratch_shapes=[pltpu.VMEM((C, 2 * TQ), x.dtype)],
        compiler_params=pltpu.CompilerParams(
            dimension_semantics=("parallel", "parallel"),
            vmem_limit_bytes=vmem_limit_bytes),
        cost_estimate=cost,
    )(x_flat, x_flat, filt_flat, col)

    return out_flat.reshape(B, 1, H, W)


def dyn_filter_ref(x, filt, kernel_size=(5, 5), padding=2):
    """Pure-JAX reference matching the PyTorch module exactly."""
    kh, kw = kernel_size
    B, C, H, W = x.shape
    xp = jnp.pad(x, ((0, 0), (0, 0), (padding, padding), (padding, padding)))
    patches = []
    for c in range(C):
        for i in range(kh):
            for j in range(kw):
                patches.append(xp[:, c, i:i + H, j:j + W])
    patches = jnp.stack(patches, axis=1)  # (B, C*kh*kw, H, W) == x_localexpand
    return jnp.sum(patches * filt, axis=1, keepdims=True)


if __name__ == "__main__":
    B, C, H, W = 2, 4, 16, 16
    kh, kw = 5, 5

    key = jax.random.PRNGKey(0)
    kx, kf = jax.random.split(key)
    x = jax.random.normal(kx, (B, C, H, W), dtype=jnp.float32)
    # Dynamic per-pixel filter, same role as `filter` argument in forward().
    filt = jax.random.normal(kf, (B, C * kh * kw, H, W), dtype=jnp.float32)

    ref = dyn_filter_ref(x, filt, kernel_size=(kh, kw), padding=2)

    # Default tiling (single spatial block at this toy size).
    out = jax.block_until_ready(dyn_filter(x, filt, kernel_size=(kh, kw), padding=2))
    assert out.shape == (B, 1, H, W), out.shape
    assert jnp.allclose(out, ref, atol=1e-4, rtol=1e-4), float(
        jnp.max(jnp.abs(out - ref)))

    # Force multiple spatial blocks to exercise the halo / tiled path as well.
    out2 = jax.block_until_ready(
        dyn_filter(x, filt, kernel_size=(kh, kw), padding=2, block_rows=8))
    assert jnp.allclose(out2, ref, atol=1e-4, rtol=1e-4), float(
        jnp.max(jnp.abs(out2 - ref)))

    print("KERNEL_OK")
</pallas_src>

<mosaic_0001>
module attributes {stable_mosaic.version = 11 : i64} {
  func.func @_dynfilter_kernel(%arg0: i32, %arg1: i32, %arg2: memref<1x4x256xf32, #tpu.memory_space<vmem>>, %arg3: memref<1x4x256xf32, #tpu.memory_space<vmem>>, %arg4: memref<1x100x256xf32, #tpu.memory_space<vmem>>, %arg5: memref<1x256xi32, #tpu.memory_space<vmem>>, %arg6: memref<1x1x256xf32, #tpu.memory_space<vmem>>, %arg7: memref<4x512xf32, #tpu.memory_space<vmem>>) attributes {dimension_semantics = [#tpu.dimension_semantics<parallel>, #tpu.dimension_semantics<parallel>], iteration_bounds = array<i64: 2, 1>, scalar_prefetch = 0 : i64, scratch_operands = 1 : i64, tpu.core_type = #tpu.core_type<tc>, window_params = [{transform_indices = @transform_0, window_bounds = array<i64: 1, 4, 256>}, {transform_indices = @transform_1, window_bounds = array<i64: 1, 4, 256>}, {transform_indices = @transform_2, window_bounds = array<i64: 1, 100, 256>}, {pipeline_mode = #tpu.pipeline_mode<synchronous>, transform_indices = @transform_3, window_bounds = array<i64: 1, 256>}, {transform_indices = @transform_4, window_bounds = array<i64: 1, 1, 256>}]} {
    %c0 = arith.constant 0 : index
    %c0_0 = arith.constant 0 : index
    %c0_1 = arith.constant 0 : index
    %0 = vector.load %arg2[%c0, %c0_0, %c0_1] : memref<1x4x256xf32, #tpu.memory_space<vmem>>, vector<1x4x256xf32>
    %1 = vector.shape_cast %0 : vector<1x4x256xf32> to vector<4x256xf32>
    %c0_2 = arith.constant 0 : index
    %c0_3 = arith.constant 0 : index
    %2 = vector.load %arg7[%c0_2, %c0_3] : memref<4x512xf32, #tpu.memory_space<vmem>>, vector<4x256xf32>
    tpu.vector_store %arg7[%c0_2, %c0_3], %1 {strides = array<i32>} : memref<4x512xf32, #tpu.memory_space<vmem>>, vector<4x256xf32>,
    %c0_4 = arith.constant 0 : index
    %c0_5 = arith.constant 0 : index
    %c0_6 = arith.constant 0 : index
    %3 = vector.load %arg3[%c0_4, %c0_5, %c0_6] : memref<1x4x256xf32, #tpu.memory_space<vmem>>, vector<1x4x256xf32>
    %4 = vector.shape_cast %3 : vector<1x4x256xf32> to vector<4x256xf32>
    %c0_7 = arith.constant 0 : index
    %c256 = arith.constant 256 : index
    %5 = vector.load %arg7[%c0_7, %c256] : memref<4x512xf32, #tpu.memory_space<vmem>>, vector<4x256xf32>
    tpu.vector_store %arg7[%c0_7, %c256], %4 {strides = array<i32>} : memref<4x512xf32, #tpu.memory_space<vmem>>, vector<4x256xf32>,
    %c0_8 = arith.constant 0 : index
    %c0_9 = arith.constant 0 : index
    %6 = vector.load %arg5[%c0_8, %c0_9] : memref<1x256xi32, #tpu.memory_space<vmem>>, vector<1x256xi32>
    %cst = arith.constant 0.000000e+00 : f32
    %7 = vector.broadcast %cst : f32 to vector<1x256xf32>
    %c0_10 = arith.constant 0 : index
    %c0_11 = arith.constant 0 : index
    %8 = vector.load %arg7[%c0_10, %c0_11] : memref<4x512xf32, #tpu.memory_space<vmem>>, vector<4x256xf32>
    %c2_i32 = arith.constant 2 : i32
    %9 = vector.broadcast %c2_i32 : i32 to vector<1x256xi32>
    %10 = arith.cmpi sge, %6, %9 : vector<1x256xi32>
    %c18_i32 = arith.constant 18 : i32
    %11 = vector.broadcast %c18_i32 : i32 to vector<1x256xi32>
    %12 = arith.cmpi slt, %6, %11 : vector<1x256xi32>
    %13 = arith.andi %10, %12 : vector<1x256xi1>
    %14 = arith.extui %13 : vector<1x256xi1> to vector<1x256xi32>
    %15 = arith.sitofp %14 : vector<1x256xi32> to vector<1x256xf32>
    %16 = vector.broadcast %15 : vector<1x256xf32> to vector<4x256xf32>
    %17 = arith.mulf %8, %16 : vector<4x256xf32>
    %c0_12 = arith.constant 0 : index
    %c0_13 = arith.constant 0 : index
    %c0_14 = arith.constant 0 : index
    %18 = vector.load %arg4[%c0_12, %c0_13, %c0_14] : memref<1x100x256xf32, #tpu.memory_space<vmem>>, vector<1x1x256xf32>
    %19 = vector.shape_cast %18 : vector<1x1x256xf32> to vector<1x256xf32>
    %20 = vector.extract_strided_slice %17 {offsets = [0, 0], sizes = [1, 256], strides = [1, 1]} : vector<4x256xf32> to vector<1x256xf32>
    %21 = arith.mulf %20, %19 : vector<1x256xf32>
    %22 = arith.addf %7, %21 : vector<1x256xf32>
    %c0_15 = arith.constant 0 : index
    %c25 = arith.constant 25 : index
    %c0_16 = arith.constant 0 : index
    %23 = vector.load %arg4[%c0_15, %c25, %c0_16] : memref<1x100x256xf32, #tpu.memory_space<vmem>>, vector<1x1x256xf32>
    %24 = vector.shape_cast %23 : vector<1x1x256xf32> to vector<1x256xf32>
    %25 = vector.extract_strided_slice %17 {offsets = [1, 0], sizes = [1, 256], strides = [1, 1]} : vector<4x256xf32> to vector<1x256xf32>
    %26 = arith.mulf %25, %24 : vector<1x256xf32>
    %27 = arith.addf %22, %26 : vector<1x256xf32>
    %c0_17 = arith.constant 0 : index
    %c50 = arith.constant 50 : index
    %c0_18 = arith.constant 0 : index
    %28 = vector.load %arg4[%c0_17, %c50, %c0_18] : memref<1x100x256xf32, #tpu.memory_space<vmem>>, vector<1x1x256xf32>
    %29 = vector.shape_cast %28 : vector<1x1x256xf32> to vector<1x256xf32>
    %30 = vector.extract_strided_slice %17 {offsets = [2, 0], sizes = [1, 256], strides = [1, 1]} : vector<4x256xf32> to vector<1x256xf32>
    %31 = arith.mulf %30, %29 : vector<1x256xf32>
    %32 = arith.addf %27, %31 : vector<1x256xf32>
    %c0_19 = arith.constant 0 : index
    %c75 = arith.constant 75 : index
    %c0_20 = arith.constant 0 : index
    %33 = vector.load %arg4[%c0_19, %c75, %c0_20] : memref<1x100x256xf32, #tpu.memory_space<vmem>>, vector<1x1x256xf32>
    %34 = vector.shape_cast %33 : vector<1x1x256xf32> to vector<1x256xf32>
    %35 = vector.extract_strided_slice %17 {offsets = [3, 0], sizes = [1, 256], strides = [1, 1]} : vector<4x256xf32> to vector<1x256xf32>
    %36 = arith.mulf %35, %34 : vector<1x256xf32>
    %37 = arith.addf %32, %36 : vector<1x256xf32>
    %c0_21 = arith.constant 0 : index
    %c1 = arith.constant 1 : index
    %38 = vector.load %arg7[%c0_21, %c1] : memref<4x512xf32, #tpu.memory_space<vmem>>, vector<4x256xf32>
    %c1_i32 = arith.constant 1 : i32
    %39 = vector.broadcast %c1_i32 : i32 to vector<1x256xi32>
    %40 = arith.cmpi sge, %6, %39 : vector<1x256xi32>
    %c17_i32 = arith.constant 17 : i32
    %41 = vector.broadcast %c17_i32 : i32 to vector<1x256xi32>
    %42 = arith.cmpi slt, %6, %41 : vector<1x256xi32>
    %43 = arith.andi %40, %42 : vector<1x256xi1>
    %44 = arith.extui %43 : vector<1x256xi1> to vector<1x256xi32>
    %45 = arith.sitofp %44 : vector<1x256xi32> to vector<1x256xf32>
    %46 = vector.broadcast %45 : vector<1x256xf32> to vector<4x256xf32>
    %47 = arith.mulf %38, %46 : vector<4x256xf32>
    %c0_22 = arith.constant 0 : index
    %c1_23 = arith.constant 1 : index
    %c0_24 = arith.constant 0 : index
    %48 = vector.load %arg4[%c0_22, %c1_23, %c0_24] : memref<1x100x256xf32, #tpu.memory_space<vmem>>, vector<1x1x256xf32>
    %49 = vector.shape_cast %48 : vector<1x1x256xf32> to vector<1x256xf32>
    %50 = vector.extract_strided_slice %47 {offsets = [0, 0], sizes = [1, 256], strides = [1, 1]} : vector<4x256xf32> to vector<1x256xf32>
    %51 = arith.mulf %50, %49 : vector<1x256xf32>
    %52 = arith.addf %37, %51 : vector<1x256xf32>
    %c0_25 = arith.constant 0 : index
    %c26 = arith.constant 26 : index
    %c0_26 = arith.constant 0 : index
    %53 = vector.load %arg4[%c0_25, %c26, %c0_26] : memref<1x100x256xf32, #tpu.memory_space<vmem>>, vector<1x1x256xf32>
    %54 = vector.shape_cast %53 : vector<1x1x256xf32> to vector<1x256xf32>
    %55 = vector.extract_strided_slice %47 {offsets = [1, 0], sizes = [1, 256], strides = [1, 1]} : vector<4x256xf32> to vector<1x256xf32>
    %56 = arith.mulf %55, %54 : vector<1x256xf32>
    %57 = arith.addf %52, %56 : vector<1x256xf32>
    %c0_27 = arith.constant 0 : index
    %c51 = arith.constant 51 : index
    %c0_28 = arith.constant 0 : index
    %58 = vector.load %arg4[%c0_27, %c51, %c0_28] : memref<1x100x256xf32, #tpu.memory_space<vmem>>, vector<1x1x256xf32>
    %59 = vector.shape_cast %58 : vector<1x1x256xf32> to vector<1x256xf32>
    %60 = vector.extract_strided_slice %47 {offsets = [2, 0], sizes = [1, 256], strides = [1, 1]} : vector<4x256xf32> to vector<1x256xf32>
    %61 = arith.mulf %60, %59 : vector<1x256xf32>
    %62 = arith.addf %57, %61 : vector<1x256xf32>
    %c0_29 = arith.constant 0 : index
    %c76 = arith.constant 76 : index
    %c0_30 = arith.constant 0 : index
    %63 = vector.load %arg4[%c0_29, %c76, %c0_30] : memref<1x100x256xf32, #tpu.memory_space<vmem>>, vector<1x1x256xf32>
    %64 = vector.shape_cast %63 : vector<1x1x256xf32> to vector<1x256xf32>
    %65 = vector.extract_strided_slice %47 {offsets = [3, 0], sizes = [1, 256], strides = [1, 1]} : vector<4x256xf32> to vector<1x256xf32>
    %66 = arith.mulf %65, %64 : vector<1x256xf32>
    %67 = arith.addf %62, %66 : vector<1x256xf32>
    %c0_31 = arith.constant 0 : index
    %c2 = arith.constant 2 : index
    %68 = vector.load %arg7[%c0_31, %c2] : memref<4x512xf32, #tpu.memory_space<vmem>>, vector<4x256xf32>
    %c0_32 = arith.constant 0 : index
    %c2_33 = arith.constant 2 : index
    %c0_34 = arith.constant 0 : index
    %69 = vector.load %arg4[%c0_32, %c2_33, %c0_34] : memref<1x100x256xf32, #tpu.memory_space<vmem>>, vector<1x1x256xf32>
    %70 = vector.shape_cast %69 : vector<1x1x256xf32> to vector<1x256xf32>
    %71 = vector.extract_strided_slice %68 {offsets = [0, 0], sizes = [1, 256], strides = [1, 1]} : vector<4x256xf32> to vector<1x256xf32>
    %72 = arith.mulf %71, %70 : vector<1x256xf32>
    %73 = arith.addf %67, %72 : vector<1x256xf32>
    %c0_35 = arith.constant 0 : index
    %c27 = arith.constant 27 : index
    %c0_36 = arith.constant 0 : index
    %74 = vector.load %arg4[%c0_35, %c27, %c0_36] : memref<1x100x256xf32, #tpu.memory_space<vmem>>, vector<1x1x256xf32>
    %75 = vector.shape_cast %74 : vector<1x1x256xf32> to vector<1x256xf32>
    %76 = vector.extract_strided_slice %68 {offsets = [1, 0], sizes = [1, 256], strides = [1, 1]} : vector<4x256xf32> to vector<1x256xf32>
    %77 = arith.mulf %76, %75 : vector<1x256xf32>
    %78 = arith.addf %73, %77 : vector<1x256xf32>
    %c0_37 = arith.constant 0 : index
    %c52 = arith.constant 52 : index
    %c0_38 = arith.constant 0 : index
    %79 = vector.load %arg4[%c0_37, %c52, %c0_38] : memref<1x100x256xf32, #tpu.memory_space<vmem>>, vector<1x1x256xf32>
    %80 = vector.shape_cast %79 : vector<1x1x256xf32> to vector<1x256xf32>
    %81 = vector.extract_strided_slice %68 {offsets = [2, 0], sizes = [1, 256], strides = [1, 1]} : vector<4x256xf32> to vector<1x256xf32>
    %82 = arith.mulf %81, %80 : vector<1x256xf32>
    %83 = arith.addf %78, %82 : vector<1x256xf32>
    %c0_39 = arith.constant 0 : index
    %c77 = arith.constant 77 : index
    %c0_40 = arith.constant 0 : index
    %84 = vector.load %arg4[%c0_39, %c77, %c0_40] : memref<1x100x256xf32, #tpu.memory_space<vmem>>, vector<1x1x256xf32>
    %85 = vector.shape_cast %84 : vector<1x1x256xf32> to vector<1x256xf32>
    %86 = vector.extract_strided_slice %68 {offsets = [3, 0], sizes = [1, 256], strides = [1, 1]} : vector<4x256xf32> to vector<1x256xf32>
    %87 = arith.mulf %86, %85 : vector<1x256xf32>
    %88 = arith.addf %83, %87 : vector<1x256xf32>
    %c0_41 = arith.constant 0 : index
    %c3 = arith.constant 3 : index
    %89 = vector.load %arg7[%c0_41, %c3] : memref<4x512xf32, #tpu.memory_space<vmem>>, vector<4x256xf32>
    %c-1_i32 = arith.constant -1 : i32
    %90 = vector.broadcast %c-1_i32 : i32 to vector<1x256xi32>
    %91 = arith.cmpi sge, %6, %90 : vector<1x256xi32>
    %c15_i32 = arith.constant 15 : i32
    %92 = vector.broadcast %c15_i32 : i32 to vector<1x256xi32>
    %93 = arith.cmpi slt, %6, %92 : vector<1x256xi32>
    %94 = arith.andi %91, %93 : vector<1x256xi1>
    %95 = arith.extui %94 : vector<1x256xi1> to vector<1x256xi32>
    %96 = arith.sitofp %95 : vector<1x256xi32> to vector<1x256xf32>
    %97 = vector.broadcast %96 : vector<1x256xf32> to vector<4x256xf32>
    %98 = arith.mulf %89, %97 : vector<4x256xf32>
    %c0_42 = arith.constant 0 : index
    %c3_43 = arith.constant 3 : index
    %c0_44 = arith.constant 0 : index
    %99 = vector.load %arg4[%c0_42, %c3_43, %c0_44] : memref<1x100x256xf32, #tpu.memory_space<vmem>>, vector<1x1x256xf32>
    %100 = vector.shape_cast %99 : vector<1x1x256xf32> to vector<1x256xf32>
    %101 = vector.extract_strided_slice %98 {offsets = [0, 0], sizes = [1, 256], strides = [1, 1]} : vector<4x256xf32> to vector<1x256xf32>
    %102 = arith.mulf %101, %100 : vector<1x256xf32>
    %103 = arith.addf %88, %102 : vector<1x256xf32>
    %c0_45 = arith.constant 0 : index
    %c28 = arith.constant 28 : index
    %c0_46 = arith.constant 0 : index
    %104 = vector.load %arg4[%c0_45, %c28, %c0_46] : memref<1x100x256xf32, #tpu.memory_space<vmem>>, vector<1x1x256xf32>
    %105 = vector.shape_cast %104 : vector<1x1x256xf32> to vector<1x256xf32>
    %106 = vector.extract_strided_slice %98 {offsets = [1, 0], sizes = [1, 256], strides = [1, 1]} : vector<4x256xf32> to vector<1x256xf32>
    %107 = arith.mulf %106, %105 : vector<1x256xf32>
    %108 = arith.addf %103, %107 : vector<1x256xf32>
    %c0_47 = arith.constant 0 : index
    %c53 = arith.constant 53 : index
    %c0_48 = arith.constant 0 : index
    %109 = vector.load %arg4[%c0_47, %c53, %c0_48] : memref<1x100x256xf32, #tpu.memory_space<vmem>>, vector<1x1x256xf32>
    %110 = vector.shape_cast %109 : vector<1x1x256xf32> to vector<1x256xf32>
    %111 = vector.extract_strided_slice %98 {offsets = [2, 0], sizes = [1, 256], strides = [1, 1]} : vector<4x256xf32> to vector<1x256xf32>
    %112 = arith.mulf %111, %110 : vector<1x256xf32>
    %113 = arith.addf %108, %112 : vector<1x256xf32>
    %c0_49 = arith.constant 0 : index
    %c78 = arith.constant 78 : index
    %c0_50 = arith.constant 0 : index
    %114 = vector.load %arg4[%c0_49, %c78, %c0_50] : memref<1x100x256xf32, #tpu.memory_space<vmem>>, vector<1x1x256xf32>
    %115 = vector.shape_cast %114 : vector<1x1x256xf32> to vector<1x256xf32>
    %116 = vector.extract_strided_slice %98 {offsets = [3, 0], sizes = [1, 256], strides = [1, 1]} : vector<4x256xf32> to vector<1x256xf32>
    %117 = arith.mulf %116, %115 : vector<1x256xf32>
    %118 = arith.addf %113, %117 : vector<1x256xf32>
    %c0_51 = arith.constant 0 : index
    %c4 = arith.constant 4 : index
    %119 = vector.load %arg7[%c0_51, %c4] : memref<4x512xf32, #tpu.memory_space<vmem>>, vector<4x256xf32>
    %c-2_i32 = arith.constant -2 : i32
    %120 = vector.broadcast %c-2_i32 : i32 to vector<1x256xi32>
    %121 = arith.cmpi sge, %6, %120 : vector<1x256xi32>
    %c14_i32 = arith.constant 14 : i32
    %122 = vector.broadcast %c14_i32 : i32 to vector<1x256xi32>
    %123 = arith.cmpi slt, %6, %122 : vector<1x256xi32>
    %124 = arith.andi %121, %123 : vector<1x256xi1>
    %125 = arith.extui %124 : vector<1x256xi1> to vector<1x256xi32>
    %126 = arith.sitofp %125 : vector<1x256xi32> to vector<1x256xf32>
    %127 = vector.broadcast %126 : vector<1x256xf32> to vector<4x256xf32>
    %128 = arith.mulf %119, %127 : vector<4x256xf32>
    %c0_52 = arith.constant 0 : index
    %c4_53 = arith.constant 4 : index
    %c0_54 = arith.constant 0 : index
    %129 = vector.load %arg4[%c0_52, %c4_53, %c0_54] : memref<1x100x256xf32, #tpu.memory_space<vmem>>, vector<1x1x256xf32>
    %130 = vector.shape_cast %129 : vector<1x1x256xf32> to vector<1x256xf32>
    %131 = vector.extract_strided_slice %128 {offsets = [0, 0], sizes = [1, 256], strides = [1, 1]} : vector<4x256xf32> to vector<1x256xf32>
    %132 = arith.mulf %131, %130 : vector<1x256xf32>
    %133 = arith.addf %118, %132 : vector<1x256xf32>
    %c0_55 = arith.constant 0 : index
    %c29 = arith.constant 29 : index
    %c0_56 = arith.constant 0 : index
    %134 = vector.load %arg4[%c0_55, %c29, %c0_56] : memref<1x100x256xf32, #tpu.memory_space<vmem>>, vector<1x1x256xf32>
    %135 = vector.shape_cast %134 : vector<1x1x256xf32> to vector<1x256xf32>
    %136 = vector.extract_strided_slice %128 {offsets = [1, 0], sizes = [1, 256], strides = [1, 1]} : vector<4x256xf32> to vector<1x256xf32>
    %137 = arith.mulf %136, %135 : vector<1x256xf32>
    %138 = arith.addf %133, %137 : vector<1x256xf32>
    %c0_57 = arith.constant 0 : index
    %c54 = arith.constant 54 : index
    %c0_58 = arith.constant 0 : index
    %139 = vector.load %arg4[%c0_57, %c54, %c0_58] : memref<1x100x256xf32, #tpu.memory_space<vmem>>, vector<1x1x256xf32>
    %140 = vector.shape_cast %139 : vector<1x1x256xf32> to vector<1x256xf32>
    %141 = vector.extract_strided_slice %128 {offsets = [2, 0], sizes = [1, 256], strides = [1, 1]} : vector<4x256xf32> to vector<1x256xf32>
    %142 = arith.mulf %141, %140 : vector<1x256xf32>
    %143 = arith.addf %138, %142 : vector<1x256xf32>
    %c0_59 = arith.constant 0 : index
    %c79 = arith.constant 79 : index
    %c0_60 = arith.constant 0 : index
    %144 = vector.load %arg4[%c0_59, %c79, %c0_60] : memref<1x100x256xf32, #tpu.memory_space<vmem>>, vector<1x1x256xf32>
    %145 = vector.shape_cast %144 : vector<1x1x256xf32> to vector<1x256xf32>
    %146 = vector.extract_strided_slice %128 {offsets = [3, 0], sizes = [1, 256], strides = [1, 1]} : vector<4x256xf32> to vector<1x256xf32>
    %147 = arith.mulf %146, %145 : vector<1x256xf32>
    %148 = arith.addf %143, %147 : vector<1x256xf32>
    %c0_61 = arith.constant 0 : index
    %c16 = arith.constant 16 : index
    %149 = vector.load %arg7[%c0_61, %c16] : memref<4x512xf32, #tpu.memory_space<vmem>>, vector<4x256xf32>
    %c2_i32_62 = arith.constant 2 : i32
    %150 = vector.broadcast %c2_i32_62 : i32 to vector<1x256xi32>
    %151 = arith.cmpi sge, %6, %150 : vector<1x256xi32>
    %c18_i32_63 = arith.constant 18 : i32
    %152 = vector.broadcast %c18_i32_63 : i32 to vector<1x256xi32>
    %153 = arith.cmpi slt, %6, %152 : vector<1x256xi32>
    %154 = arith.andi %151, %153 : vector<1x256xi1>
    %155 = arith.extui %154 : vector<1x256xi1> to vector<1x256xi32>
    %156 = arith.sitofp %155 : vector<1x256xi32> to vector<1x256xf32>
    %157 = vector.broadcast %156 : vector<1x256xf32> to vector<4x256xf32>
    %158 = arith.mulf %149, %157 : vector<4x256xf32>
    %c0_64 = arith.constant 0 : index
    %c5 = arith.constant 5 : index
    %c0_65 = arith.constant 0 : index
    %159 = vector.load %arg4[%c0_64, %c5, %c0_65] : memref<1x100x256xf32, #tpu.memory_space<vmem>>, vector<1x1x256xf32>
    %160 = vector.shape_cast %159 : vector<1x1x256xf32> to vector<1x256xf32>
    %161 = vector.extract_strided_slice %158 {offsets = [0, 0], sizes = [1, 256], strides = [1, 1]} : vector<4x256xf32> to vector<1x256xf32>
    %162 = arith.mulf %161, %160 : vector<1x256xf32>
    %163 = arith.addf %148, %162 : vector<1x256xf32>
    %c0_66 = arith.constant 0 : index
    %c30 = arith.constant 30 : index
    %c0_67 = arith.constant 0 : index
    %164 = vector.load %arg4[%c0_66, %c30, %c0_67] : memref<1x100x256xf32, #tpu.memory_space<vmem>>, vector<1x1x256xf32>
    %165 = vector.shape_cast %164 : vector<1x1x256xf32> to vector<1x256xf32>
    %166 = vector.extract_strided_slice %158 {offsets = [1, 0], sizes = [1, 256], strides = [1, 1]} : vector<4x256xf32> to vector<1x256xf32>
    %167 = arith.mulf %166, %165 : vector<1x256xf32>
    %168 = arith.addf %163, %167 : vector<1x256xf32>
    %c0_68 = arith.constant 0 : index
    %c55 = arith.constant 55 : index
    %c0_69 = arith.constant 0 : index
    %169 = vector.load %arg4[%c0_68, %c55, %c0_69] : memref<1x100x256xf32, #tpu.memory_space<vmem>>, vector<1x1x256xf32>
    %170 = vector.shape_cast %169 : vector<1x1x256xf32> to vector<1x256xf32>
    %171 = vector.extract_strided_slice %158 {offsets = [2, 0], sizes = [1, 256], strides = [1, 1]} : vector<4x256xf32> to vector<1x256xf32>
    %172 = arith.mulf %171, %170 : vector<1x256xf32>
    %173 = arith.addf %168, %172 : vector<1x256xf32>
    %c0_70 = arith.constant 0 : index
    %c80 = arith.constant 80 : index
    %c0_71 = arith.constant 0 : index
    %174 = vector.load %arg4[%c0_70, %c80, %c0_71] : memref<1x100x256xf32, #tpu.memory_space<vmem>>, vector<1x1x256xf32>
    %175 = vector.shape_cast %174 : vector<1x1x256xf32> to vector<1x256xf32>
    %176 = vector.extract_strided_slice %158 {offsets = [3, 0], sizes = [1, 256], strides = [1, 1]} : vector<4x256xf32> to vector<1x256xf32>
    %177 = arith.mulf %176, %175 : vector<1x256xf32>
    %178 = arith.addf %173, %177 : vector<1x256xf32>
    %c0_72 = arith.constant 0 : index
    %c17 = arith.constant 17 : index
    %179 = vector.load %arg7[%c0_72, %c17] : memref<4x512xf32, #tpu.memory_space<vmem>>, vector<4x256xf32>
    %c1_i32_73 = arith.constant 1 : i32
    %180 = vector.broadcast %c1_i32_73 : i32 to vector<1x256xi32>
    %181 = arith.cmpi sge, %6, %180 : vector<1x256xi32>
    %c17_i32_74 = arith.constant 17 : i32
    %182 = vector.broadcast %c17_i32_74 : i32 to vector<1x256xi32>
    %183 = arith.cmpi slt, %6, %182 : vector<1x256xi32>
    %184 = arith.andi %181, %183 : vector<1x256xi1>
    %185 = arith.extui %184 : vector<1x256xi1> to vector<1x256xi32>
    %186 = arith.sitofp %185 : vector<1x256xi32> to vector<1x256xf32>
    %187 = vector.broadcast %186 : vector<1x256xf32> to vector<4x256xf32>
    %188 = arith.mulf %179, %187 : vector<4x256xf32>
    %c0_75 = arith.constant 0 : index
    %c6 = arith.constant 6 : index
    %c0_76 = arith.constant 0 : index
    %189 = vector.load %arg4[%c0_75, %c6, %c0_76] : memref<1x100x256xf32, #tpu.memory_space<vmem>>, vector<1x1x256xf32>
    %190 = vector.shape_cast %189 : vector<1x1x256xf32> to vector<1x256xf32>
    %191 = vector.extract_strided_slice %188 {offsets = [0, 0], sizes = [1, 256], strides = [1, 1]} : vector<4x256xf32> to vector<1x256xf32>
    %192 = arith.mulf %191, %190 : vector<1x256xf32>
    %193 = arith.addf %178, %192 : vector<1x256xf32>
    %c0_77 = arith.constant 0 : index
    %c31 = arith.constant 31 : index
    %c0_78 = arith.constant 0 : index
    %194 = vector.load %arg4[%c0_77, %c31, %c0_78] : memref<1x100x256xf32, #tpu.memory_space<vmem>>, vector<1x1x256xf32>
    %195 = vector.shape_cast %194 : vector<1x1x256xf32> to vector<1x256xf32>
    %196 = vector.extract_strided_slice %188 {offsets = [1, 0], sizes = [1, 256], strides = [1, 1]} : vector<4x256xf32> to vector<1x256xf32>
    %197 = arith.mulf %196, %195 : vector<1x256xf32>
    %198 = arith.addf %193, %197 : vector<1x256xf32>
    %c0_79 = arith.constant 0 : index
    %c56 = arith.constant 56 : index
    %c0_80 = arith.constant 0 : index
    %199 = vector.load %arg4[%c0_79, %c56, %c0_80] : memref<1x100x256xf32, #tpu.memory_space<vmem>>, vector<1x1x256xf32>
    %200 = vector.shape_cast %199 : vector<1x1x256xf32> to vector<1x256xf32>
    %201 = vector.extract_strided_slice %188 {offsets = [2, 0], sizes = [1, 256], strides = [1, 1]} : vector<4x256xf32> to vector<1x256xf32>
    %202 = arith.mulf %201, %200 : vector<1x256xf32>
    %203 = arith.addf %198, %202 : vector<1x256xf32>
    %c0_81 = arith.constant 0 : index
    %c81 = arith.constant 81 : index
    %c0_82 = arith.constant 0 : index
    %204 = vector.load %arg4[%c0_81, %c81, %c0_82] : memref<1x100x256xf32, #tpu.memory_space<vmem>>, vector<1x1x256xf32>
    %205 = vector.shape_cast %204 : vector<1x1x256xf32> to vector<1x256xf32>
    %206 = vector.extract_strided_slice %188 {offsets = [3, 0], sizes = [1, 256], strides = [1, 1]} : vector<4x256xf32> to vector<1x256xf32>
    %207 = arith.mulf %206, %205 : vector<1x256xf32>
    %208 = arith.addf %203, %207 : vector<1x256xf32>
    %c0_83 = arith.constant 0 : index
    %c18 = arith.constant 18 : index
    %209 = vector.load %arg7[%c0_83, %c18] : memref<4x512xf32, #tpu.memory_space<vmem>>, vector<4x256xf32>
    %c0_84 = arith.constant 0 : index
    %c7 = arith.constant 7 : index
    %c0_85 = arith.constant 0 : index
    %210 = vector.load %arg4[%c0_84, %c7, %c0_85] : memref<1x100x256xf32, #tpu.memory_space<vmem>>, vector<1x1x256xf32>
    %211 = vector.shape_cast %210 : vector<1x1x256xf32> to vector<1x256xf32>
    %212 = vector.extract_strided_slice %209 {offsets = [0, 0], sizes = [1, 256], strides = [1, 1]} : vector<4x256xf32> to vector<1x256xf32>
    %213 = arith.mulf %212, %211 : vector<1x256xf32>
    %214 = arith.addf %208, %213 : vector<1x256xf32>
    %c0_86 = arith.constant 0 : index
    %c32 = arith.constant 32 : index
    %c0_87 = arith.constant 0 : index
    %215 = vector.load %arg4[%c0_86, %c32, %c0_87] : memref<1x100x256xf32, #tpu.memory_space<vmem>>, vector<1x1x256xf32>
    %216 = vector.shape_cast %215 : vector<1x1x256xf32> to vector<1x256xf32>
    %217 = vector.extract_strided_slice %209 {offsets = [1, 0], sizes = [1, 256], strides = [1, 1]} : vector<4x256xf32> to vector<1x256xf32>
    %218 = arith.mulf %217, %216 : vector<1x256xf32>
    %219 = arith.addf %214, %218 : vector<1x256xf32>
    %c0_88 = arith.constant 0 : index
    %c57 = arith.constant 57 : index
    %c0_89 = arith.constant 0 : index
    %220 = vector.load %arg4[%c0_88, %c57, %c0_89] : memref<1x100x256xf32, #tpu.memory_space<vmem>>, vector<1x1x256xf32>
    %221 = vector.shape_cast %220 : vector<1x1x256xf32> to vector<1x256xf32>
    %222 = vector.extract_strided_slice %209 {offsets = [2, 0], sizes = [1, 256], strides = [1, 1]} : vector<4x256xf32> to vector<1x256xf32>
    %223 = arith.mulf %222, %221 : vector<1x256xf32>
    %224 = arith.addf %219, %223 : vector<1x256xf32>
    %c0_90 = arith.constant 0 : index
    %c82 = arith.constant 82 : index
    %c0_91 = arith.constant 0 : index
    %225 = vector.load %arg4[%c0_90, %c82, %c0_91] : memref<1x100x256xf32, #tpu.memory_space<vmem>>, vector<1x1x256xf32>
    %226 = vector.shape_cast %225 : vector<1x1x256xf32> to vector<1x256xf32>
    %227 = vector.extract_strided_slice %209 {offsets = [3, 0], sizes = [1, 256], strides = [1, 1]} : vector<4x256xf32> to vector<1x256xf32>
    %228 = arith.mulf %227, %226 : vector<1x256xf32>
    %229 = arith.addf %224, %228 : vector<1x256xf32>
    %c0_92 = arith.constant 0 : index
    %c19 = arith.constant 19 : index
    %230 = vector.load %arg7[%c0_92, %c19] : memref<4x512xf32, #tpu.memory_space<vmem>>, vector<4x256xf32>
    %c-1_i32_93 = arith.constant -1 : i32
    %231 = vector.broadcast %c-1_i32_93 : i32 to vector<1x256xi32>
    %232 = arith.cmpi sge, %6, %231 : vector<1x256xi32>
    %c15_i32_94 = arith.constant 15 : i32
    %233 = vector.broadcast %c15_i32_94 : i32 to vector<1x256xi32>
    %234 = arith.cmpi slt, %6, %233 : vector<1x256xi32>
    %235 = arith.andi %232, %234 : vector<1x256xi1>
    %236 = arith.extui %235 : vector<1x256xi1> to vector<1x256xi32>
    %237 = arith.sitofp %236 : vector<1x256xi32> to vector<1x256xf32>
    %238 = vector.broadcast %237 : vector<1x256xf32> to vector<4x256xf32>
    %239 = arith.mulf %230, %238 : vector<4x256xf32>
    %c0_95 = arith.constant 0 : index
    %c8 = arith.constant 8 : index
    %c0_96 = arith.constant 0 : index
    %240 = vector.load %arg4[%c0_95, %c8, %c0_96] : memref<1x100x256xf32, #tpu.memory_space<vmem>>, vector<1x1x256xf32>
    %241 = vector.shape_cast %240 : vector<1x1x256xf32> to vector<1x256xf32>
    %242 = vector.extract_strided_slice %239 {offsets = [0, 0], sizes = [1, 256], strides = [1, 1]} : vector<4x256xf32> to vector<1x256xf32>
    %243 = arith.mulf %242, %241 : vector<1x256xf32>
    %244 = arith.addf %229, %243 : vector<1x256xf32>
    %c0_97 = arith.constant 0 : index
    %c33 = arith.constant 33 : index
    %c0_98 = arith.constant 0 : index
    %245 = vector.load %arg4[%c0_97, %c33, %c0_98] : memref<1x100x256xf32, #tpu.memory_space<vmem>>, vector<1x1x256xf32>
    %246 = vector.shape_cast %245 : vector<1x1x256xf32> to vector<1x256xf32>
    %247 = vector.extract_strided_slice %239 {offsets = [1, 0], sizes = [1, 256], strides = [1, 1]} : vector<4x256xf32> to vector<1x256xf32>
    %248 = arith.mulf %247, %246 : vector<1x256xf32>
    %249 = arith.addf %244, %248 : vector<1x256xf32>
    %c0_99 = arith.constant 0 : index
    %c58 = arith.constant 58 : index
    %c0_100 = arith.constant 0 : index
    %250 = vector.load %arg4[%c0_99, %c58, %c0_100] : memref<1x100x256xf32, #tpu.memory_space<vmem>>, vector<1x1x256xf32>
    %251 = vector.shape_cast %250 : vector<1x1x256xf32> to vector<1x256xf32>
    %252 = vector.extract_strided_slice %239 {offsets = [2, 0], sizes = [1, 256], strides = [1, 1]} : vector<4x256xf32> to vector<1x256xf32>
    %253 = arith.mulf %252, %251 : vector<1x256xf32>
    %254 = arith.addf %249, %253 : vector<1x256xf32>
    %c0_101 = arith.constant 0 : index
    %c83 = arith.constant 83 : index
    %c0_102 = arith.constant 0 : index
    %255 = vector.load %arg4[%c0_101, %c83, %c0_102] : memref<1x100x256xf32, #tpu.memory_space<vmem>>, vector<1x1x256xf32>
    %256 = vector.shape_cast %255 : vector<1x1x256xf32> to vector<1x256xf32>
    %257 = vector.extract_strided_slice %239 {offsets = [3, 0], sizes = [1, 256], strides = [1, 1]} : vector<4x256xf32> to vector<1x256xf32>
    %258 = arith.mulf %257, %256 : vector<1x256xf32>
    %259 = arith.addf %254, %258 : vector<1x256xf32>
    %c0_103 = arith.constant 0 : index
    %c20 = arith.constant 20 : index
    %260 = vector.load %arg7[%c0_103, %c20] : memref<4x512xf32, #tpu.memory_space<vmem>>, vector<4x256xf32>
    %c-2_i32_104 = arith.constant -2 : i32
    %261 = vector.broadcast %c-2_i32_104 : i32 to vector<1x256xi32>
    %262 = arith.cmpi sge, %6, %261 : vector<1x256xi32>
    %c14_i32_105 = arith.constant 14 : i32
    %263 = vector.broadcast %c14_i32_105 : i32 to vector<1x256xi32>
    %264 = arith.cmpi slt, %6, %263 : vector<1x256xi32>
    %265 = arith.andi %262, %264 : vector<1x256xi1>
    %266 = arith.extui %265 : vector<1x256xi1> to vector<1x256xi32>
    %267 = arith.sitofp %266 : vector<1x256xi32> to vector<1x256xf32>
    %268 = vector.broadcast %267 : vector<1x256xf32> to vector<4x256xf32>
    %269 = arith.mulf %260, %268 : vector<4x256xf32>
    %c0_106 = arith.constant 0 : index
    %c9 = arith.constant 9 : index
    %c0_107 = arith.constant 0 : index
    %270 = vector.load %arg4[%c0_106, %c9, %c0_107] : memref<1x100x256xf32, #tpu.memory_space<vmem>>, vector<1x1x256xf32>
    %271 = vector.shape_cast %270 : vector<1x1x256xf32> to vector<1x256xf32>
    %272 = vector.extract_strided_slice %269 {offsets = [0, 0], sizes = [1, 256], strides = [1, 1]} : vector<4x256xf32> to vector<1x256xf32>
    %273 = arith.mulf %272, %271 : vector<1x256xf32>
    %274 = arith.addf %259, %273 : vector<1x256xf32>
    %c0_108 = arith.constant 0 : index
    %c34 = arith.constant 34 : index
    %c0_109 = arith.constant 0 : index
    %275 = vector.load %arg4[%c0_108, %c34, %c0_109] : memref<1x100x256xf32, #tpu.memory_space<vmem>>, vector<1x1x256xf32>
    %276 = vector.shape_cast %275 : vector<1x1x256xf32> to vector<1x256xf32>
    %277 = vector.extract_strided_slice %269 {offsets = [1, 0], sizes = [1, 256], strides = [1, 1]} : vector<4x256xf32> to vector<1x256xf32>
    %278 = arith.mulf %277, %276 : vector<1x256xf32>
    %279 = arith.addf %274, %278 : vector<1x256xf32>
    %c0_110 = arith.constant 0 : index
    %c59 = arith.constant 59 : index
    %c0_111 = arith.constant 0 : index
    %280 = vector.load %arg4[%c0_110, %c59, %c0_111] : memref<1x100x256xf32, #tpu.memory_space<vmem>>, vector<1x1x256xf32>
    %281 = vector.shape_cast %280 : vector<1x1x256xf32> to vector<1x256xf32>
    %282 = vector.extract_strided_slice %269 {offsets = [2, 0], sizes = [1, 256], strides = [1, 1]} : vector<4x256xf32> to vector<1x256xf32>
    %283 = arith.mulf %282, %281 : vector<1x256xf32>
    %284 = arith.addf %279, %283 : vector<1x256xf32>
    %c0_112 = arith.constant 0 : index
    %c84 = arith.constant 84 : index
    %c0_113 = arith.constant 0 : index
    %285 = vector.load %arg4[%c0_112, %c84, %c0_113] : memref<1x100x256xf32, #tpu.memory_space<vmem>>, vector<1x1x256xf32>
    %286 = vector.shape_cast %285 : vector<1x1x256xf32> to vector<1x256xf32>
    %287 = vector.extract_strided_slice %269 {offsets = [3, 0], sizes = [1, 256], strides = [1, 1]} : vector<4x256xf32> to vector<1x256xf32>
    %288 = arith.mulf %287, %286 : vector<1x256xf32>
    %289 = arith.addf %284, %288 : vector<1x256xf32>
    %c0_114 = arith.constant 0 : index
    %c32_115 = arith.constant 32 : index
    %290 = vector.load %arg7[%c0_114, %c32_115] : memref<4x512xf32, #tpu.memory_space<vmem>>, vector<4x256xf32>
    %c2_i32_116 = arith.constant 2 : i32
    %291 = vector.broadcast %c2_i32_116 : i32 to vector<1x256xi32>
    %292 = arith.cmpi sge, %6, %291 : vector<1x256xi32>
    %c18_i32_117 = arith.constant 18 : i32
    %293 = vector.broadcast %c18_i32_117 : i32 to vector<1x256xi32>
    %294 = arith.cmpi slt, %6, %293 : vector<1x256xi32>
    %295 = arith.andi %292, %294 : vector<1x256xi1>
    %296 = arith.extui %295 : vector<1x256xi1> to vector<1x256xi32>
    %297 = arith.sitofp %296 : vector<1x256xi32> to vector<1x256xf32>
    %298 = vector.broadcast %297 : vector<1x256xf32> to vector<4x256xf32>
    %299 = arith.mulf %290, %298 : vector<4x256xf32>
    %c0_118 = arith.constant 0 : index
    %c10 = arith.constant 10 : index
    %c0_119 = arith.constant 0 : index
    %300 = vector.load %arg4[%c0_118, %c10, %c0_119] : memref<1x100x256xf32, #tpu.memory_space<vmem>>, vector<1x1x256xf32>
    %301 = vector.shape_cast %300 : vector<1x1x256xf32> to vector<1x256xf32>
    %302 = vector.extract_strided_slice %299 {offsets = [0, 0], sizes = [1, 256], strides = [1, 1]} : vector<4x256xf32> to vector<1x256xf32>
    %303 = arith.mulf %302, %301 : vector<1x256xf32>
    %304 = arith.addf %289, %303 : vector<1x256xf32>
    %c0_120 = arith.constant 0 : index
    %c35 = arith.constant 35 : index
    %c0_121 = arith.constant 0 : index
    %305 = vector.load %arg4[%c0_120, %c35, %c0_121] : memref<1x100x256xf32, #tpu.memory_space<vmem>>, vector<1x1x256xf32>
    %306 = vector.shape_cast %305 : vector<1x1x256xf32> to vector<1x256xf32>
    %307 = vector.extract_strided_slice %299 {offsets = [1, 0], sizes = [1, 256], strides = [1, 1]} : vector<4x256xf32> to vector<1x256xf32>
    %308 = arith.mulf %307, %306 : vector<1x256xf32>
    %309 = arith.addf %304, %308 : vector<1x256xf32>
    %c0_122 = arith.constant 0 : index
    %c60 = arith.constant 60 : index
    %c0_123 = arith.constant 0 : index
    %310 = vector.load %arg4[%c0_122, %c60, %c0_123] : memref<1x100x256xf32, #tpu.memory_space<vmem>>, vector<1x1x256xf32>
    %311 = vector.shape_cast %310 : vector<1x1x256xf32> to vector<1x256xf32>
    %312 = vector.extract_strided_slice %299 {offsets = [2, 0], sizes = [1, 256], strides = [1, 1]} : vector<4x256xf32> to vector<1x256xf32>
    %313 = arith.mulf %312, %311 : vector<1x256xf32>
    %314 = arith.addf %309, %313 : vector<1x256xf32>
    %c0_124 = arith.constant 0 : index
    %c85 = arith.constant 85 : index
    %c0_125 = arith.constant 0 : index
    %315 = vector.load %arg4[%c0_124, %c85, %c0_125] : memref<1x100x256xf32, #tpu.memory_space<vmem>>, vector<1x1x256xf32>
    %316 = vector.shape_cast %315 : vector<1x1x256xf32> to vector<1x256xf32>
    %317 = vector.extract_strided_slice %299 {offsets = [3, 0], sizes = [1, 256], strides = [1, 1]} : vector<4x256xf32> to vector<1x256xf32>
    %318 = arith.mulf %317, %316 : vector<1x256xf32>
    %319 = arith.addf %314, %318 : vector<1x256xf32>
    %c0_126 = arith.constant 0 : index
    %c33_127 = arith.constant 33 : index
    %320 = vector.load %arg7[%c0_126, %c33_127] : memref<4x512xf32, #tpu.memory_space<vmem>>, vector<4x256xf32>
    %c1_i32_128 = arith.constant 1 : i32
    %321 = vector.broadcast %c1_i32_128 : i32 to vector<1x256xi32>
    %322 = arith.cmpi sge, %6, %321 : vector<1x256xi32>
    %c17_i32_129 = arith.constant 17 : i32
    %323 = vector.broadcast %c17_i32_129 : i32 to vector<1x256xi32>
    %324 = arith.cmpi slt, %6, %323 : vector<1x256xi32>
    %325 = arith.andi %322, %324 : vector<1x256xi1>
    %326 = arith.extui %325 : vector<1x256xi1> to vector<1x256xi32>
    %327 = arith.sitofp %326 : vector<1x256xi32> to vector<1x256xf32>
    %328 = vector.broadcast %327 : vector<1x256xf32> to vector<4x256xf32>
    %329 = arith.mulf %320, %328 : vector<4x256xf32>
    %c0_130 = arith.constant 0 : index
    %c11 = arith.constant 11 : index
    %c0_131 = arith.constant 0 : index
    %330 = vector.load %arg4[%c0_130, %c11, %c0_131] : memref<1x100x256xf32, #tpu.memory_space<vmem>>, vector<1x1x256xf32>
    %331 = vector.shape_cast %330 : vector<1x1x256xf32> to vector<1x256xf32>
    %332 = vector.extract_strided_slice %329 {offsets = [0, 0], sizes = [1, 256], strides = [1, 1]} : vector<4x256xf32> to vector<1x256xf32>
    %333 = arith.mulf %332, %331 : vector<1x256xf32>
    %334 = arith.addf %319, %333 : vector<1x256xf32>
    %c0_132 = arith.constant 0 : index
    %c36 = arith.constant 36 : index
    %c0_133 = arith.constant 0 : index
    %335 = vector.load %arg4[%c0_132, %c36, %c0_133] : memref<1x100x256xf32, #tpu.memory_space<vmem>>, vector<1x1x256xf32>
    %336 = vector.shape_cast %335 : vector<1x1x256xf32> to vector<1x256xf32>
    %337 = vector.extract_strided_slice %329 {offsets = [1, 0], sizes = [1, 256], strides = [1, 1]} : vector<4x256xf32> to vector<1x256xf32>
    %338 = arith.mulf %337, %336 : vector<1x256xf32>
    %339 = arith.addf %334, %338 : vector<1x256xf32>
    %c0_134 = arith.constant 0 : index
    %c61 = arith.constant 61 : index
    %c0_135 = arith.constant 0 : index
    %340 = vector.load %arg4[%c0_134, %c61, %c0_135] : memref<1x100x256xf32, #tpu.memory_space<vmem>>, vector<1x1x256xf32>
    %341 = vector.shape_cast %340 : vector<1x1x256xf32> to vector<1x256xf32>
    %342 = vector.extract_strided_slice %329 {offsets = [2, 0], sizes = [1, 256], strides = [1, 1]} : vector<4x256xf32> to vector<1x256xf32>
    %343 = arith.mulf %342, %341 : vector<1x256xf32>
    %344 = arith.addf %339, %343 : vector<1x256xf32>
    %c0_136 = arith.constant 0 : index
    %c86 = arith.constant 86 : index
    %c0_137 = arith.constant 0 : index
    %345 = vector.load %arg4[%c0_136, %c86, %c0_137] : memref<1x100x256xf32, #tpu.memory_space<vmem>>, vector<1x1x256xf32>
    %346 = vector.shape_cast %345 : vector<1x1x256xf32> to vector<1x256xf32>
    %347 = vector.extract_strided_slice %329 {offsets = [3, 0], sizes = [1, 256], strides = [1, 1]} : vector<4x256xf32> to vector<1x256xf32>
    %348 = arith.mulf %347, %346 : vector<1x256xf32>
    %349 = arith.addf %344, %348 : vector<1x256xf32>
    %c0_138 = arith.constant 0 : index
    %c34_139 = arith.constant 34 : index
    %350 = vector.load %arg7[%c0_138, %c34_139] : memref<4x512xf32, #tpu.memory_space<vmem>>, vector<4x256xf32>
    %c0_140 = arith.constant 0 : index
    %c12 = arith.constant 12 : index
    %c0_141 = arith.constant 0 : index
    %351 = vector.load %arg4[%c0_140, %c12, %c0_141] : memref<1x100x256xf32, #tpu.memory_space<vmem>>, vector<1x1x256xf32>
    %352 = vector.shape_cast %351 : vector<1x1x256xf32> to vector<1x256xf32>
    %353 = vector.extract_strided_slice %350 {offsets = [0, 0], sizes = [1, 256], strides = [1, 1]} : vector<4x256xf32> to vector<1x256xf32>
    %354 = arith.mulf %353, %352 : vector<1x256xf32>
    %355 = arith.addf %349, %354 : vector<1x256xf32>
    %c0_142 = arith.constant 0 : index
    %c37 = arith.constant 37 : index
    %c0_143 = arith.constant 0 : index
    %356 = vector.load %arg4[%c0_142, %c37, %c0_143] : memref<1x100x256xf32, #tpu.memory_space<vmem>>, vector<1x1x256xf32>
    %357 = vector.shape_cast %356 : vector<1x1x256xf32> to vector<1x256xf32>
    %358 = vector.extract_strided_slice %350 {offsets = [1, 0], sizes = [1, 256], strides = [1, 1]} : vector<4x256xf32> to vector<1x256xf32>
    %359 = arith.mulf %358, %357 : vector<1x256xf32>
    %360 = arith.addf %355, %359 : vector<1x256xf32>
    %c0_144 = arith.constant 0 : index
    %c62 = arith.constant 62 : index
    %c0_145 = arith.constant 0 : index
    %361 = vector.load %arg4[%c0_144, %c62, %c0_145] : memref<1x100x256xf32, #tpu.memory_space<vmem>>, vector<1x1x256xf32>
    %362 = vector.shape_cast %361 : vector<1x1x256xf32> to vector<1x256xf32>
    %363 = vector.extract_strided_slice %350 {offsets = [2, 0], sizes = [1, 256], strides = [1, 1]} : vector<4x256xf32> to vector<1x256xf32>
    %364 = arith.mulf %363, %362 : vector<1x256xf32>
    %365 = arith.addf %360, %364 : vector<1x256xf32>
    %c0_146 = arith.constant 0 : index
    %c87 = arith.constant 87 : index
    %c0_147 = arith.constant 0 : index
    %366 = vector.load %arg4[%c0_146, %c87, %c0_147] : memref<1x100x256xf32, #tpu.memory_space<vmem>>, vector<1x1x256xf32>
    %367 = vector.shape_cast %366 : vector<1x1x256xf32> to vector<1x256xf32>
    %368 = vector.extract_strided_slice %350 {offsets = [3, 0], sizes = [1, 256], strides = [1, 1]} : vector<4x256xf32> to vector<1x256xf32>
    %369 = arith.mulf %368, %367 : vector<1x256xf32>
    %370 = arith.addf %365, %369 : vector<1x256xf32>
    %c0_148 = arith.constant 0 : index
    %c35_149 = arith.constant 35 : index
    %371 = vector.load %arg7[%c0_148, %c35_149] : memref<4x512xf32, #tpu.memory_space<vmem>>, vector<4x256xf32>
    %c-1_i32_150 = arith.constant -1 : i32
    %372 = vector.broadcast %c-1_i32_150 : i32 to vector<1x256xi32>
    %373 = arith.cmpi sge, %6, %372 : vector<1x256xi32>
    %c15_i32_151 = arith.constant 15 : i32
    %374 = vector.broadcast %c15_i32_151 : i32 to vector<1x256xi32>
    %375 = arith.cmpi slt, %6, %374 : vector<1x256xi32>
    %376 = arith.andi %373, %375 : vector<1x256xi1>
    %377 = arith.extui %376 : vector<1x256xi1> to vector<1x256xi32>
    %378 = arith.sitofp %377 : vector<1x256xi32> to vector<1x256xf32>
    %379 = vector.broadcast %378 : vector<1x256xf32> to vector<4x256xf32>
    %380 = arith.mulf %371, %379 : vector<4x256xf32>
    %c0_152 = arith.constant 0 : index
    %c13 = arith.constant 13 : index
    %c0_153 = arith.constant 0 : index
    %381 = vector.load %arg4[%c0_152, %c13, %c0_153] : memref<1x100x256xf32, #tpu.memory_space<vmem>>, vector<1x1x256xf32>
    %382 = vector.shape_cast %381 : vector<1x1x256xf32> to vector<1x256xf32>
    %383 = vector.extract_strided_slice %380 {offsets = [0, 0], sizes = [1, 256], strides = [1, 1]} : vector<4x256xf32> to vector<1x256xf32>
    %384 = arith.mulf %383, %382 : vector<1x256xf32>
    %385 = arith.addf %370, %384 : vector<1x256xf32>
    %c0_154 = arith.constant 0 : index
    %c38 = arith.constant 38 : index
    %c0_155 = arith.constant 0 : index
    %386 = vector.load %arg4[%c0_154, %c38, %c0_155] : memref<1x100x256xf32, #tpu.memory_space<vmem>>, vector<1x1x256xf32>
    %387 = vector.shape_cast %386 : vector<1x1x256xf32> to vector<1x256xf32>
    %388 = vector.extract_strided_slice %380 {offsets = [1, 0], sizes = [1, 256], strides = [1, 1]} : vector<4x256xf32> to vector<1x256xf32>
    %389 = arith.mulf %388, %387 : vector<1x256xf32>
    %390 = arith.addf %385, %389 : vector<1x256xf32>
    %c0_156 = arith.constant 0 : index
    %c63 = arith.constant 63 : index
    %c0_157 = arith.constant 0 : index
    %391 = vector.load %arg4[%c0_156, %c63, %c0_157] : memref<1x100x256xf32, #tpu.memory_space<vmem>>, vector<1x1x256xf32>
    %392 = vector.shape_cast %391 : vector<1x1x256xf32> to vector<1x256xf32>
    %393 = vector.extract_strided_slice %380 {offsets = [2, 0], sizes = [1, 256], strides = [1, 1]} : vector<4x256xf32> to vector<1x256xf32>
    %394 = arith.mulf %393, %392 : vector<1x256xf32>
    %395 = arith.addf %390, %394 : vector<1x256xf32>
    %c0_158 = arith.constant 0 : index
    %c88 = arith.constant 88 : index
    %c0_159 = arith.constant 0 : index
    %396 = vector.load %arg4[%c0_158, %c88, %c0_159] : memref<1x100x256xf32, #tpu.memory_space<vmem>>, vector<1x1x256xf32>
    %397 = vector.shape_cast %396 : vector<1x1x256xf32> to vector<1x256xf32>
    %398 = vector.extract_strided_slice %380 {offsets = [3, 0], sizes = [1, 256], strides = [1, 1]} : vector<4x256xf32> to vector<1x256xf32>
    %399 = arith.mulf %398, %397 : vector<1x256xf32>
    %400 = arith.addf %395, %399 : vector<1x256xf32>
    %c0_160 = arith.constant 0 : index
    %c36_161 = arith.constant 36 : index
    %401 = vector.load %arg7[%c0_160, %c36_161] : memref<4x512xf32, #tpu.memory_space<vmem>>, vector<4x256xf32>
    %c-2_i32_162 = arith.constant -2 : i32
    %402 = vector.broadcast %c-2_i32_162 : i32 to vector<1x256xi32>
    %403 = arith.cmpi sge, %6, %402 : vector<1x256xi32>
    %c14_i32_163 = arith.constant 14 : i32
    %404 = vector.broadcast %c14_i32_163 : i32 to vector<1x256xi32>
    %405 = arith.cmpi slt, %6, %404 : vector<1x256xi32>
    %406 = arith.andi %403, %405 : vector<1x256xi1>
    %407 = arith.extui %406 : vector<1x256xi1> to vector<1x256xi32>
    %408 = arith.sitofp %407 : vector<1x256xi32> to vector<1x256xf32>
    %409 = vector.broadcast %408 : vector<1x256xf32> to vector<4x256xf32>
    %410 = arith.mulf %401, %409 : vector<4x256xf32>
    %c0_164 = arith.constant 0 : index
    %c14 = arith.constant 14 : index
    %c0_165 = arith.constant 0 : index
    %411 = vector.load %arg4[%c0_164, %c14, %c0_165] : memref<1x100x256xf32, #tpu.memory_space<vmem>>, vector<1x1x256xf32>
    %412 = vector.shape_cast %411 : vector<1x1x256xf32> to vector<1x256xf32>
    %413 = vector.extract_strided_slice %410 {offsets = [0, 0], sizes = [1, 256], strides = [1, 1]} : vector<4x256xf32> to vector<1x256xf32>
    %414 = arith.mulf %413, %412 : vector<1x256xf32>
    %415 = arith.addf %400, %414 : vector<1x256xf32>
    %c0_166 = arith.constant 0 : index
    %c39 = arith.constant 39 : index
    %c0_167 = arith.constant 0 : index
    %416 = vector.load %arg4[%c0_166, %c39, %c0_167] : memref<1x100x256xf32, #tpu.memory_space<vmem>>, vector<1x1x256xf32>
    %417 = vector.shape_cast %416 : vector<1x1x256xf32> to vector<1x256xf32>
    %418 = vector.extract_strided_slice %410 {offsets = [1, 0], sizes = [1, 256], strides = [1, 1]} : vector<4x256xf32> to vector<1x256xf32>
    %419 = arith.mulf %418, %417 : vector<1x256xf32>
    %420 = arith.addf %415, %419 : vector<1x256xf32>
    %c0_168 = arith.constant 0 : index
    %c64 = arith.constant 64 : index
    %c0_169 = arith.constant 0 : index
    %421 = vector.load %arg4[%c0_168, %c64, %c0_169] : memref<1x100x256xf32, #tpu.memory_space<vmem>>, vector<1x1x256xf32>
    %422 = vector.shape_cast %421 : vector<1x1x256xf32> to vector<1x256xf32>
    %423 = vector.extract_strided_slice %410 {offsets = [2, 0], sizes = [1, 256], strides = [1, 1]} : vector<4x256xf32> to vector<1x256xf32>
    %424 = arith.mulf %423, %422 : vector<1x256xf32>
    %425 = arith.addf %420, %424 : vector<1x256xf32>
    %c0_170 = arith.constant 0 : index
    %c89 = arith.constant 89 : index
    %c0_171 = arith.constant 0 : index
    %426 = vector.load %arg4[%c0_170, %c89, %c0_171] : memref<1x100x256xf32, #tpu.memory_space<vmem>>, vector<1x1x256xf32>
    %427 = vector.shape_cast %426 : vector<1x1x256xf32> to vector<1x256xf32>
    %428 = vector.extract_strided_slice %410 {offsets = [3, 0], sizes = [1, 256], strides = [1, 1]} : vector<4x256xf32> to vector<1x256xf32>
    %429 = arith.mulf %428, %427 : vector<1x256xf32>
    %430 = arith.addf %425, %429 : vector<1x256xf32>
    %c0_172 = arith.constant 0 : index
    %c48 = arith.constant 48 : index
    %431 = vector.load %arg7[%c0_172, %c48] : memref<4x512xf32, #tpu.memory_space<vmem>>, vector<4x256xf32>
    %c2_i32_173 = arith.constant 2 : i32
    %432 = vector.broadcast %c2_i32_173 : i32 to vector<1x256xi32>
    %433 = arith.cmpi sge, %6, %432 : vector<1x256xi32>
    %c18_i32_174 = arith.constant 18 : i32
    %434 = vector.broadcast %c18_i32_174 : i32 to vector<1x256xi32>
    %435 = arith.cmpi slt, %6, %434 : vector<1x256xi32>
    %436 = arith.andi %433, %435 : vector<1x256xi1>
    %437 = arith.extui %436 : vector<1x256xi1> to vector<1x256xi32>
    %438 = arith.sitofp %437 : vector<1x256xi32> to vector<1x256xf32>
    %439 = vector.broadcast %438 : vector<1x256xf32> to vector<4x256xf32>
    %440 = arith.mulf %431, %439 : vector<4x256xf32>
    %c0_175 = arith.constant 0 : index
    %c15 = arith.constant 15 : index
    %c0_176 = arith.constant 0 : index
    %441 = vector.load %arg4[%c0_175, %c15, %c0_176] : memref<1x100x256xf32, #tpu.memory_space<vmem>>, vector<1x1x256xf32>
    %442 = vector.shape_cast %441 : vector<1x1x256xf32> to vector<1x256xf32>
    %443 = vector.extract_strided_slice %440 {offsets = [0, 0], sizes = [1, 256], strides = [1, 1]} : vector<4x256xf32> to vector<1x256xf32>
    %444 = arith.mulf %443, %442 : vector<1x256xf32>
    %445 = arith.addf %430, %444 : vector<1x256xf32>
    %c0_177 = arith.constant 0 : index
    %c40 = arith.constant 40 : index
    %c0_178 = arith.constant 0 : index
    %446 = vector.load %arg4[%c0_177, %c40, %c0_178] : memref<1x100x256xf32, #tpu.memory_space<vmem>>, vector<1x1x256xf32>
    %447 = vector.shape_cast %446 : vector<1x1x256xf32> to vector<1x256xf32>
    %448 = vector.extract_strided_slice %440 {offsets = [1, 0], sizes = [1, 256], strides = [1, 1]} : vector<4x256xf32> to vector<1x256xf32>
    %449 = arith.mulf %448, %447 : vector<1x256xf32>
    %450 = arith.addf %445, %449 : vector<1x256xf32>
    %c0_179 = arith.constant 0 : index
    %c65 = arith.constant 65 : index
    %c0_180 = arith.constant 0 : index
    %451 = vector.load %arg4[%c0_179, %c65, %c0_180] : memref<1x100x256xf32, #tpu.memory_space<vmem>>, vector<1x1x256xf32>
    %452 = vector.shape_cast %451 : vector<1x1x256xf32> to vector<1x256xf32>
    %453 = vector.extract_strided_slice %440 {offsets = [2, 0], sizes = [1, 256], strides = [1, 1]} : vector<4x256xf32> to vector<1x256xf32>
    %454 = arith.mulf %453, %452 : vector<1x256xf32>
    %455 = arith.addf %450, %454 : vector<1x256xf32>
    %c0_181 = arith.constant 0 : index
    %c90 = arith.constant 90 : index
    %c0_182 = arith.constant 0 : index
    %456 = vector.load %arg4[%c0_181, %c90, %c0_182] : memref<1x100x256xf32, #tpu.memory_space<vmem>>, vector<1x1x256xf32>
    %457 = vector.shape_cast %456 : vector<1x1x256xf32> to vector<1x256xf32>
    %458 = vector.extract_strided_slice %440 {offsets = [3, 0], sizes = [1, 256], strides = [1, 1]} : vector<4x256xf32> to vector<1x256xf32>
    %459 = arith.mulf %458, %457 : vector<1x256xf32>
    %460 = arith.addf %455, %459 : vector<1x256xf32>
    %c0_183 = arith.constant 0 : index
    %c49 = arith.constant 49 : index
    %461 = vector.load %arg7[%c0_183, %c49] : memref<4x512xf32, #tpu.memory_space<vmem>>, vector<4x256xf32>
    %c1_i32_184 = arith.constant 1 : i32
    %462 = vector.broadcast %c1_i32_184 : i32 to vector<1x256xi32>
    %463 = arith.cmpi sge, %6, %462 : vector<1x256xi32>
    %c17_i32_185 = arith.constant 17 : i32
    %464 = vector.broadcast %c17_i32_185 : i32 to vector<1x256xi32>
    %465 = arith.cmpi slt, %6, %464 : vector<1x256xi32>
    %466 = arith.andi %463, %465 : vector<1x256xi1>
    %467 = arith.extui %466 : vector<1x256xi1> to vector<1x256xi32>
    %468 = arith.sitofp %467 : vector<1x256xi32> to vector<1x256xf32>
    %469 = vector.broadcast %468 : vector<1x256xf32> to vector<4x256xf32>
    %470 = arith.mulf %461, %469 : vector<4x256xf32>
    %c0_186 = arith.constant 0 : index
    %c16_187 = arith.constant 16 : index
    %c0_188 = arith.constant 0 : index
    %471 = vector.load %arg4[%c0_186, %c16_187, %c0_188] : memref<1x100x256xf32, #tpu.memory_space<vmem>>, vector<1x1x256xf32>
    %472 = vector.shape_cast %471 : vector<1x1x256xf32> to vector<1x256xf32>
    %473 = vector.extract_strided_slice %470 {offsets = [0, 0], sizes = [1, 256], strides = [1, 1]} : vector<4x256xf32> to vector<1x256xf32>
    %474 = arith.mulf %473, %472 : vector<1x256xf32>
    %475 = arith.addf %460, %474 : vector<1x256xf32>
    %c0_189 = arith.constant 0 : index
    %c41 = arith.constant 41 : index
    %c0_190 = arith.constant 0 : index
    %476 = vector.load %arg4[%c0_189, %c41, %c0_190] : memref<1x100x256xf32, #tpu.memory_space<vmem>>, vector<1x1x256xf32>
    %477 = vector.shape_cast %476 : vector<1x1x256xf32> to vector<1x256xf32>
    %478 = vector.extract_strided_slice %470 {offsets = [1, 0], sizes = [1, 256], strides = [1, 1]} : vector<4x256xf32> to vector<1x256xf32>
    %479 = arith.mulf %478, %477 : vector<1x256xf32>
    %480 = arith.addf %475, %479 : vector<1x256xf32>
    %c0_191 = arith.constant 0 : index
    %c66 = arith.constant 66 : index
    %c0_192 = arith.constant 0 : index
    %481 = vector.load %arg4[%c0_191, %c66, %c0_192] : memref<1x100x256xf32, #tpu.memory_space<vmem>>, vector<1x1x256xf32>
    %482 = vector.shape_cast %481 : vector<1x1x256xf32> to vector<1x256xf32>
    %483 = vector.extract_strided_slice %470 {offsets = [2, 0], sizes = [1, 256], strides = [1, 1]} : vector<4x256xf32> to vector<1x256xf32>
    %484 = arith.mulf %483, %482 : vector<1x256xf32>
    %485 = arith.addf %480, %484 : vector<1x256xf32>
    %c0_193 = arith.constant 0 : index
    %c91 = arith.constant 91 : index
    %c0_194 = arith.constant 0 : index
    %486 = vector.load %arg4[%c0_193, %c91, %c0_194] : memref<1x100x256xf32, #tpu.memory_space<vmem>>, vector<1x1x256xf32>
    %487 = vector.shape_cast %486 : vector<1x1x256xf32> to vector<1x256xf32>
    %488 = vector.extract_strided_slice %470 {offsets = [3, 0], sizes = [1, 256], strides = [1, 1]} : vector<4x256xf32> to vector<1x256xf32>
    %489 = arith.mulf %488, %487 : vector<1x256xf32>
    %490 = arith.addf %485, %489 : vector<1x256xf32>
    %c0_195 = arith.constant 0 : index
    %c50_196 = arith.constant 50 : index
    %491 = vector.load %arg7[%c0_195, %c50_196] : memref<4x512xf32, #tpu.memory_space<vmem>>, vector<4x256xf32>
    %c0_197 = arith.constant 0 : index
    %c17_198 = arith.constant 17 : index
    %c0_199 = arith.constant 0 : index
    %492 = vector.load %arg4[%c0_197, %c17_198, %c0_199] : memref<1x100x256xf32, #tpu.memory_space<vmem>>, vector<1x1x256xf32>
    %493 = vector.shape_cast %492 : vector<1x1x256xf32> to vector<1x256xf32>
    %494 = vector.extract_strided_slice %491 {offsets = [0, 0], sizes = [1, 256], strides = [1, 1]} : vector<4x256xf32> to vector<1x256xf32>
    %495 = arith.mulf %494, %493 : vector<1x256xf32>
    %496 = arith.addf %490, %495 : vector<1x256xf32>
    %c0_200 = arith.constant 0 : index
    %c42 = arith.constant 42 : index
    %c0_201 = arith.constant 0 : index
    %497 = vector.load %arg4[%c0_200, %c42, %c0_201] : memref<1x100x256xf32, #tpu.memory_space<vmem>>, vector<1x1x256xf32>
    %498 = vector.shape_cast %497 : vector<1x1x256xf32> to vector<1x256xf32>
    %499 = vector.extract_strided_slice %491 {offsets = [1, 0], sizes = [1, 256], strides = [1, 1]} : vector<4x256xf32> to vector<1x256xf32>
    %500 = arith.mulf %499, %498 : vector<1x256xf32>
    %501 = arith.addf %496, %500 : vector<1x256xf32>
    %c0_202 = arith.constant 0 : index
    %c67 = arith.constant 67 : index
    %c0_203 = arith.constant 0 : index
    %502 = vector.load %arg4[%c0_202, %c67, %c0_203] : memref<1x100x256xf32, #tpu.memory_space<vmem>>, vector<1x1x256xf32>
    %503 = vector.shape_cast %502 : vector<1x1x256xf32> to vector<1x256xf32>
    %504 = vector.extract_strided_slice %491 {offsets = [2, 0], sizes = [1, 256], strides = [1, 1]} : vector<4x256xf32> to vector<1x256xf32>
    %505 = arith.mulf %504, %503 : vector<1x256xf32>
    %506 = arith.addf %501, %505 : vector<1x256xf32>
    %c0_204 = arith.constant 0 : index
    %c92 = arith.constant 92 : index
    %c0_205 = arith.constant 0 : index
    %507 = vector.load %arg4[%c0_204, %c92, %c0_205] : memref<1x100x256xf32, #tpu.memory_space<vmem>>, vector<1x1x256xf32>
    %508 = vector.shape_cast %507 : vector<1x1x256xf32> to vector<1x256xf32>
    %509 = vector.extract_strided_slice %491 {offsets = [3, 0], sizes = [1, 256], strides = [1, 1]} : vector<4x256xf32> to vector<1x256xf32>
    %510 = arith.mulf %509, %508 : vector<1x256xf32>
    %511 = arith.addf %506, %510 : vector<1x256xf32>
    %c0_206 = arith.constant 0 : index
    %c51_207 = arith.constant 51 : index
    %512 = vector.load %arg7[%c0_206, %c51_207] : memref<4x512xf32, #tpu.memory_space<vmem>>, vector<4x256xf32>
    %c-1_i32_208 = arith.constant -1 : i32
    %513 = vector.broadcast %c-1_i32_208 : i32 to vector<1x256xi32>
    %514 = arith.cmpi sge, %6, %513 : vector<1x256xi32>
    %c15_i32_209 = arith.constant 15 : i32
    %515 = vector.broadcast %c15_i32_209 : i32 to vector<1x256xi32>
    %516 = arith.cmpi slt, %6, %515 : vector<1x256xi32>
    %517 = arith.andi %514, %516 : vector<1x256xi1>
    %518 = arith.extui %517 : vector<1x256xi1> to vector<1x256xi32>
    %519 = arith.sitofp %518 : vector<1x256xi32> to vector<1x256xf32>
    %520 = vector.broadcast %519 : vector<1x256xf32> to vector<4x256xf32>
    %521 = arith.mulf %512, %520 : vector<4x256xf32>
    %c0_210 = arith.constant 0 : index
    %c18_211 = arith.constant 18 : index
    %c0_212 = arith.constant 0 : index
    %522 = vector.load %arg4[%c0_210, %c18_211, %c0_212] : memref<1x100x256xf32, #tpu.memory_space<vmem>>, vector<1x1x256xf32>
    %523 = vector.shape_cast %522 : vector<1x1x256xf32> to vector<1x256xf32>
    %524 = vector.extract_strided_slice %521 {offsets = [0, 0], sizes = [1, 256], strides = [1, 1]} : vector<4x256xf32> to vector<1x256xf32>
    %525 = arith.mulf %524, %523 : vector<1x256xf32>
    %526 = arith.addf %511, %525 : vector<1x256xf32>
    %c0_213 = arith.constant 0 : index
    %c43 = arith.constant 43 : index
    %c0_214 = arith.constant 0 : index
    %527 = vector.load %arg4[%c0_213, %c43, %c0_214] : memref<1x100x256xf32, #tpu.memory_space<vmem>>, vector<1x1x256xf32>
    %528 = vector.shape_cast %527 : vector<1x1x256xf32> to vector<1x256xf32>
    %529 = vector.extract_strided_slice %521 {offsets = [1, 0], sizes = [1, 256], strides = [1, 1]} : vector<4x256xf32> to vector<1x256xf32>
    %530 = arith.mulf %529, %528 : vector<1x256xf32>
    %531 = arith.addf %526, %530 : vector<1x256xf32>
    %c0_215 = arith.constant 0 : index
    %c68 = arith.constant 68 : index
    %c0_216 = arith.constant 0 : index
    %532 = vector.load %arg4[%c0_215, %c68, %c0_216] : memref<1x100x256xf32, #tpu.memory_space<vmem>>, vector<1x1x256xf32>
    %533 = vector.shape_cast %532 : vector<1x1x256xf32> to vector<1x256xf32>
    %534 = vector.extract_strided_slice %521 {offsets = [2, 0], sizes = [1, 256], strides = [1, 1]} : vector<4x256xf32> to vector<1x256xf32>
    %535 = arith.mulf %534, %533 : vector<1x256xf32>
    %536 = arith.addf %531, %535 : vector<1x256xf32>
    %c0_217 = arith.constant 0 : index
    %c93 = arith.constant 93 : index
    %c0_218 = arith.constant 0 : index
    %537 = vector.load %arg4[%c0_217, %c93, %c0_218] : memref<1x100x256xf32, #tpu.memory_space<vmem>>, vector<1x1x256xf32>
    %538 = vector.shape_cast %537 : vector<1x1x256xf32> to vector<1x256xf32>
    %539 = vector.extract_strided_slice %521 {offsets = [3, 0], sizes = [1, 256], strides = [1, 1]} : vector<4x256xf32> to vector<1x256xf32>
    %540 = arith.mulf %539, %538 : vector<1x256xf32>
    %541 = arith.addf %536, %540 : vector<1x256xf32>
    %c0_219 = arith.constant 0 : index
    %c52_220 = arith.constant 52 : index
    %542 = vector.load %arg7[%c0_219, %c52_220] : memref<4x512xf32, #tpu.memory_space<vmem>>, vector<4x256xf32>
    %c-2_i32_221 = arith.constant -2 : i32
    %543 = vector.broadcast %c-2_i32_221 : i32 to vector<1x256xi32>
    %544 = arith.cmpi sge, %6, %543 : vector<1x256xi32>
    %c14_i32_222 = arith.constant 14 : i32
    %545 = vector.broadcast %c14_i32_222 : i32 to vector<1x256xi32>
    %546 = arith.cmpi slt, %6, %545 : vector<1x256xi32>
    %547 = arith.andi %544, %546 : vector<1x256xi1>
    %548 = arith.extui %547 : vector<1x256xi1> to vector<1x256xi32>
    %549 = arith.sitofp %548 : vector<1x256xi32> to vector<1x256xf32>
    %550 = vector.broadcast %549 : vector<1x256xf32> to vector<4x256xf32>
    %551 = arith.mulf %542, %550 : vector<4x256xf32>
    %c0_223 = arith.constant 0 : index
    %c19_224 = arith.constant 19 : index
    %c0_225 = arith.constant 0 : index
    %552 = vector.load %arg4[%c0_223, %c19_224, %c0_225] : memref<1x100x256xf32, #tpu.memory_space<vmem>>, vector<1x1x256xf32>
    %553 = vector.shape_cast %552 : vector<1x1x256xf32> to vector<1x256xf32>
    %554 = vector.extract_strided_slice %551 {offsets = [0, 0], sizes = [1, 256], strides = [1, 1]} : vector<4x256xf32> to vector<1x256xf32>
    %555 = arith.mulf %554, %553 : vector<1x256xf32>
    %556 = arith.addf %541, %555 : vector<1x256xf32>
    %c0_226 = arith.constant 0 : index
    %c44 = arith.constant 44 : index
    %c0_227 = arith.constant 0 : index
    %557 = vector.load %arg4[%c0_226, %c44, %c0_227] : memref<1x100x256xf32, #tpu.memory_space<vmem>>, vector<1x1x256xf32>
    %558 = vector.shape_cast %557 : vector<1x1x256xf32> to vector<1x256xf32>
    %559 = vector.extract_strided_slice %551 {offsets = [1, 0], sizes = [1, 256], strides = [1, 1]} : vector<4x256xf32> to vector<1x256xf32>
    %560 = arith.mulf %559, %558 : vector<1x256xf32>
    %561 = arith.addf %556, %560 : vector<1x256xf32>
    %c0_228 = arith.constant 0 : index
    %c69 = arith.constant 69 : index
    %c0_229 = arith.constant 0 : index
    %562 = vector.load %arg4[%c0_228, %c69, %c0_229] : memref<1x100x256xf32, #tpu.memory_space<vmem>>, vector<1x1x256xf32>
    %563 = vector.shape_cast %562 : vector<1x1x256xf32> to vector<1x256xf32>
    %564 = vector.extract_strided_slice %551 {offsets = [2, 0], sizes = [1, 256], strides = [1, 1]} : vector<4x256xf32> to vector<1x256xf32>
    %565 = arith.mulf %564, %563 : vector<1x256xf32>
    %566 = arith.addf %561, %565 : vector<1x256xf32>
    %c0_230 = arith.constant 0 : index
    %c94 = arith.constant 94 : index
    %c0_231 = arith.constant 0 : index
    %567 = vector.load %arg4[%c0_230, %c94, %c0_231] : memref<1x100x256xf32, #tpu.memory_space<vmem>>, vector<1x1x256xf32>
    %568 = vector.shape_cast %567 : vector<1x1x256xf32> to vector<1x256xf32>
    %569 = vector.extract_strided_slice %551 {offsets = [3, 0], sizes = [1, 256], strides = [1, 1]} : vector<4x256xf32> to vector<1x256xf32>
    %570 = arith.mulf %569, %568 : vector<1x256xf32>
    %571 = arith.addf %566, %570 : vector<1x256xf32>
    %c0_232 = arith.constant 0 : index
    %c64_233 = arith.constant 64 : index
    %572 = vector.load %arg7[%c0_232, %c64_233] : memref<4x512xf32, #tpu.memory_space<vmem>>, vector<4x256xf32>
    %c2_i32_234 = arith.constant 2 : i32
    %573 = vector.broadcast %c2_i32_234 : i32 to vector<1x256xi32>
    %574 = arith.cmpi sge, %6, %573 : vector<1x256xi32>
    %c18_i32_235 = arith.constant 18 : i32
    %575 = vector.broadcast %c18_i32_235 : i32 to vector<1x256xi32>
    %576 = arith.cmpi slt, %6, %575 : vector<1x256xi32>
    %577 = arith.andi %574, %576 : vector<1x256xi1>
    %578 = arith.extui %577 : vector<1x256xi1> to vector<1x256xi32>
    %579 = arith.sitofp %578 : vector<1x256xi32> to vector<1x256xf32>
    %580 = vector.broadcast %579 : vector<1x256xf32> to vector<4x256xf32>
    %581 = arith.mulf %572, %580 : vector<4x256xf32>
    %c0_236 = arith.constant 0 : index
    %c20_237 = arith.constant 20 : index
    %c0_238 = arith.constant 0 : index
    %582 = vector.load %arg4[%c0_236, %c20_237, %c0_238] : memref<1x100x256xf32, #tpu.memory_space<vmem>>, vector<1x1x256xf32>
    %583 = vector.shape_cast %582 : vector<1x1x256xf32> to vector<1x256xf32>
    %584 = vector.extract_strided_slice %581 {offsets = [0, 0], sizes = [1, 256], strides = [1, 1]} : vector<4x256xf32> to vector<1x256xf32>
    %585 = arith.mulf %584, %583 : vector<1x256xf32>
    %586 = arith.addf %571, %585 : vector<1x256xf32>
    %c0_239 = arith.constant 0 : index
    %c45 = arith.constant 45 : index
    %c0_240 = arith.constant 0 : index
    %587 = vector.load %arg4[%c0_239, %c45, %c0_240] : memref<1x100x256xf32, #tpu.memory_space<vmem>>, vector<1x1x256xf32>
    %588 = vector.shape_cast %587 : vector<1x1x256xf32> to vector<1x256xf32>
    %589 = vector.extract_strided_slice %581 {offsets = [1, 0], sizes = [1, 256], strides = [1, 1]} : vector<4x256xf32> to vector<1x256xf32>
    %590 = arith.mulf %589, %588 : vector<1x256xf32>
    %591 = arith.addf %586, %590 : vector<1x256xf32>
    %c0_241 = arith.constant 0 : index
    %c70 = arith.constant 70 : index
    %c0_242 = arith.constant 0 : index
    %592 = vector.load %arg4[%c0_241, %c70, %c0_242] : memref<1x100x256xf32, #tpu.memory_space<vmem>>, vector<1x1x256xf32>
    %593 = vector.shape_cast %592 : vector<1x1x256xf32> to vector<1x256xf32>
    %594 = vector.extract_strided_slice %581 {offsets = [2, 0], sizes = [1, 256], strides = [1, 1]} : vector<4x256xf32> to vector<1x256xf32>
    %595 = arith.mulf %594, %593 : vector<1x256xf32>
    %596 = arith.addf %591, %595 : vector<1x256xf32>
    %c0_243 = arith.constant 0 : index
    %c95 = arith.constant 95 : index
    %c0_244 = arith.constant 0 : index
    %597 = vector.load %arg4[%c0_243, %c95, %c0_244] : memref<1x100x256xf32, #tpu.memory_space<vmem>>, vector<1x1x256xf32>
    %598 = vector.shape_cast %597 : vector<1x1x256xf32> to vector<1x256xf32>
    %599 = vector.extract_strided_slice %581 {offsets = [3, 0], sizes = [1, 256], strides = [1, 1]} : vector<4x256xf32> to vector<1x256xf32>
    %600 = arith.mulf %599, %598 : vector<1x256xf32>
    %601 = arith.addf %596, %600 : vector<1x256xf32>
    %c0_245 = arith.constant 0 : index
    %c65_246 = arith.constant 65 : index
    %602 = vector.load %arg7[%c0_245, %c65_246] : memref<4x512xf32, #tpu.memory_space<vmem>>, vector<4x256xf32>
    %c1_i32_247 = arith.constant 1 : i32
    %603 = vector.broadcast %c1_i32_247 : i32 to vector<1x256xi32>
    %604 = arith.cmpi sge, %6, %603 : vector<1x256xi32>
    %c17_i32_248 = arith.constant 17 : i32
    %605 = vector.broadcast %c17_i32_248 : i32 to vector<1x256xi32>
    %606 = arith.cmpi slt, %6, %605 : vector<1x256xi32>
    %607 = arith.andi %604, %606 : vector<1x256xi1>
    %608 = arith.extui %607 : vector<1x256xi1> to vector<1x256xi32>
    %609 = arith.sitofp %608 : vector<1x256xi32> to vector<1x256xf32>
    %610 = vector.broadcast %609 : vector<1x256xf32> to vector<4x256xf32>
    %611 = arith.mulf %602, %610 : vector<4x256xf32>
    %c0_249 = arith.constant 0 : index
    %c21 = arith.constant 21 : index
    %c0_250 = arith.constant 0 : index
    %612 = vector.load %arg4[%c0_249, %c21, %c0_250] : memref<1x100x256xf32, #tpu.memory_space<vmem>>, vector<1x1x256xf32>
    %613 = vector.shape_cast %612 : vector<1x1x256xf32> to vector<1x256xf32>
    %614 = vector.extract_strided_slice %611 {offsets = [0, 0], sizes = [1, 256], strides = [1, 1]} : vector<4x256xf32> to vector<1x256xf32>
    %615 = arith.mulf %614, %613 : vector<1x256xf32>
    %616 = arith.addf %601, %615 : vector<1x256xf32>
    %c0_251 = arith.constant 0 : index
    %c46 = arith.constant 46 : index
    %c0_252 = arith.constant 0 : index
    %617 = vector.load %arg4[%c0_251, %c46, %c0_252] : memref<1x100x256xf32, #tpu.memory_space<vmem>>, vector<1x1x256xf32>
    %618 = vector.shape_cast %617 : vector<1x1x256xf32> to vector<1x256xf32>
    %619 = vector.extract_strided_slice %611 {offsets = [1, 0], sizes = [1, 256], strides = [1, 1]} : vector<4x256xf32> to vector<1x256xf32>
    %620 = arith.mulf %619, %618 : vector<1x256xf32>
    %621 = arith.addf %616, %620 : vector<1x256xf32>
    %c0_253 = arith.constant 0 : index
    %c71 = arith.constant 71 : index
    %c0_254 = arith.constant 0 : index
    %622 = vector.load %arg4[%c0_253, %c71, %c0_254] : memref<1x100x256xf32, #tpu.memory_space<vmem>>, vector<1x1x256xf32>
    %623 = vector.shape_cast %622 : vector<1x1x256xf32> to vector<1x256xf32>
    %624 = vector.extract_strided_slice %611 {offsets = [2, 0], sizes = [1, 256], strides = [1, 1]} : vector<4x256xf32> to vector<1x256xf32>
    %625 = arith.mulf %624, %623 : vector<1x256xf32>
    %626 = arith.addf %621, %625 : vector<1x256xf32>
    %c0_255 = arith.constant 0 : index
    %c96 = arith.constant 96 : index
    %c0_256 = arith.constant 0 : index
    %627 = vector.load %arg4[%c0_255, %c96, %c0_256] : memref<1x100x256xf32, #tpu.memory_space<vmem>>, vector<1x1x256xf32>
    %628 = vector.shape_cast %627 : vector<1x1x256xf32> to vector<1x256xf32>
    %629 = vector.extract_strided_slice %611 {offsets = [3, 0], sizes = [1, 256], strides = [1, 1]} : vector<4x256xf32> to vector<1x256xf32>
    %630 = arith.mulf %629, %628 : vector<1x256xf32>
    %631 = arith.addf %626, %630 : vector<1x256xf32>
    %c0_257 = arith.constant 0 : index
    %c66_258 = arith.constant 66 : index
    %632 = vector.load %arg7[%c0_257, %c66_258] : memref<4x512xf32, #tpu.memory_space<vmem>>, vector<4x256xf32>
    %c0_259 = arith.constant 0 : index
    %c22 = arith.constant 22 : index
    %c0_260 = arith.constant 0 : index
    %633 = vector.load %arg4[%c0_259, %c22, %c0_260] : memref<1x100x256xf32, #tpu.memory_space<vmem>>, vector<1x1x256xf32>
    %634 = vector.shape_cast %633 : vector<1x1x256xf32> to vector<1x256xf32>
    %635 = vector.extract_strided_slice %632 {offsets = [0, 0], sizes = [1, 256], strides = [1, 1]} : vector<4x256xf32> to vector<1x256xf32>
    %636 = arith.mulf %635, %634 : vector<1x256xf32>
    %637 = arith.addf %631, %636 : vector<1x256xf32>
    %c0_261 = arith.constant 0 : index
    %c47 = arith.constant 47 : index
    %c0_262 = arith.constant 0 : index
    %638 = vector.load %arg4[%c0_261, %c47, %c0_262] : memref<1x100x256xf32, #tpu.memory_space<vmem>>, vector<1x1x256xf32>
    %639 = vector.shape_cast %638 : vector<1x1x256xf32> to vector<1x256xf32>
    %640 = vector.extract_strided_slice %632 {offsets = [1, 0], sizes = [1, 256], strides = [1, 1]} : vector<4x256xf32> to vector<1x256xf32>
    %641 = arith.mulf %640, %639 : vector<1x256xf32>
    %642 = arith.addf %637, %641 : vector<1x256xf32>
    %c0_263 = arith.constant 0 : index
    %c72 = arith.constant 72 : index
    %c0_264 = arith.constant 0 : index
    %643 = vector.load %arg4[%c0_263, %c72, %c0_264] : memref<1x100x256xf32, #tpu.memory_space<vmem>>, vector<1x1x256xf32>
    %644 = vector.shape_cast %643 : vector<1x1x256xf32> to vector<1x256xf32>
    %645 = vector.extract_strided_slice %632 {offsets = [2, 0], sizes = [1, 256], strides = [1, 1]} : vector<4x256xf32> to vector<1x256xf32>
    %646 = arith.mulf %645, %644 : vector<1x256xf32>
    %647 = arith.addf %642, %646 : vector<1x256xf32>
    %c0_265 = arith.constant 0 : index
    %c97 = arith.constant 97 : index
    %c0_266 = arith.constant 0 : index
    %648 = vector.load %arg4[%c0_265, %c97, %c0_266] : memref<1x100x256xf32, #tpu.memory_space<vmem>>, vector<1x1x256xf32>
    %649 = vector.shape_cast %648 : vector<1x1x256xf32> to vector<1x256xf32>
    %650 = vector.extract_strided_slice %632 {offsets = [3, 0], sizes = [1, 256], strides = [1, 1]} : vector<4x256xf32> to vector<1x256xf32>
    %651 = arith.mulf %650, %649 : vector<1x256xf32>
    %652 = arith.addf %647, %651 : vector<1x256xf32>
    %c0_267 = arith.constant 0 : index
    %c67_268 = arith.constant 67 : index
    %653 = vector.load %arg7[%c0_267, %c67_268] : memref<4x512xf32, #tpu.memory_space<vmem>>, vector<4x256xf32>
    %c-1_i32_269 = arith.constant -1 : i32
    %654 = vector.broadcast %c-1_i32_269 : i32 to vector<1x256xi32>
    %655 = arith.cmpi sge, %6, %654 : vector<1x256xi32>
    %c15_i32_270 = arith.constant 15 : i32
    %656 = vector.broadcast %c15_i32_270 : i32 to vector<1x256xi32>
    %657 = arith.cmpi slt, %6, %656 : vector<1x256xi32>
    %658 = arith.andi %655, %657 : vector<1x256xi1>
    %659 = arith.extui %658 : vector<1x256xi1> to vector<1x256xi32>
    %660 = arith.sitofp %659 : vector<1x256xi32> to vector<1x256xf32>
    %661 = vector.broadcast %660 : vector<1x256xf32> to vector<4x256xf32>
    %662 = arith.mulf %653, %661 : vector<4x256xf32>
    %c0_271 = arith.constant 0 : index
    %c23 = arith.constant 23 : index
    %c0_272 = arith.constant 0 : index
    %663 = vector.load %arg4[%c0_271, %c23, %c0_272] : memref<1x100x256xf32, #tpu.memory_space<vmem>>, vector<1x1x256xf32>
    %664 = vector.shape_cast %663 : vector<1x1x256xf32> to vector<1x256xf32>
    %665 = vector.extract_strided_slice %662 {offsets = [0, 0], sizes = [1, 256], strides = [1, 1]} : vector<4x256xf32> to vector<1x256xf32>
    %666 = arith.mulf %665, %664 : vector<1x256xf32>
    %667 = arith.addf %652, %666 : vector<1x256xf32>
    %c0_273 = arith.constant 0 : index
    %c48_274 = arith.constant 48 : index
    %c0_275 = arith.constant 0 : index
    %668 = vector.load %arg4[%c0_273, %c48_274, %c0_275] : memref<1x100x256xf32, #tpu.memory_space<vmem>>, vector<1x1x256xf32>
    %669 = vector.shape_cast %668 : vector<1x1x256xf32> to vector<1x256xf32>
    %670 = vector.extract_strided_slice %662 {offsets = [1, 0], sizes = [1, 256], strides = [1, 1]} : vector<4x256xf32> to vector<1x256xf32>
    %671 = arith.mulf %670, %669 : vector<1x256xf32>
    %672 = arith.addf %667, %671 : vector<1x256xf32>
    %c0_276 = arith.constant 0 : index
    %c73 = arith.constant 73 : index
    %c0_277 = arith.constant 0 : index
    %673 = vector.load %arg4[%c0_276, %c73, %c0_277] : memref<1x100x256xf32, #tpu.memory_space<vmem>>, vector<1x1x256xf32>
    %674 = vector.shape_cast %673 : vector<1x1x256xf32> to vector<1x256xf32>
    %675 = vector.extract_strided_slice %662 {offsets = [2, 0], sizes = [1, 256], strides = [1, 1]} : vector<4x256xf32> to vector<1x256xf32>
    %676 = arith.mulf %675, %674 : vector<1x256xf32>
    %677 = arith.addf %672, %676 : vector<1x256xf32>
    %c0_278 = arith.constant 0 : index
    %c98 = arith.constant 98 : index
    %c0_279 = arith.constant 0 : index
    %678 = vector.load %arg4[%c0_278, %c98, %c0_279] : memref<1x100x256xf32, #tpu.memory_space<vmem>>, vector<1x1x256xf32>
    %679 = vector.shape_cast %678 : vector<1x1x256xf32> to vector<1x256xf32>
    %680 = vector.extract_strided_slice %662 {offsets = [3, 0], sizes = [1, 256], strides = [1, 1]} : vector<4x256xf32> to vector<1x256xf32>
    %681 = arith.mulf %680, %679 : vector<1x256xf32>
    %682 = arith.addf %677, %681 : vector<1x256xf32>
    %c0_280 = arith.constant 0 : index
    %c68_281 = arith.constant 68 : index
    %683 = vector.load %arg7[%c0_280, %c68_281] : memref<4x512xf32, #tpu.memory_space<vmem>>, vector<4x256xf32>
    %c-2_i32_282 = arith.constant -2 : i32
    %684 = vector.broadcast %c-2_i32_282 : i32 to vector<1x256xi32>
    %685 = arith.cmpi sge, %6, %684 : vector<1x256xi32>
    %c14_i32_283 = arith.constant 14 : i32
    %686 = vector.broadcast %c14_i32_283 : i32 to vector<1x256xi32>
    %687 = arith.cmpi slt, %6, %686 : vector<1x256xi32>
    %688 = arith.andi %685, %687 : vector<1x256xi1>
    %689 = arith.extui %688 : vector<1x256xi1> to vector<1x256xi32>
    %690 = arith.sitofp %689 : vector<1x256xi32> to vector<1x256xf32>
    %691 = vector.broadcast %690 : vector<1x256xf32> to vector<4x256xf32>
    %692 = arith.mulf %683, %691 : vector<4x256xf32>
    %c0_284 = arith.constant 0 : index
    %c24 = arith.constant 24 : index
    %c0_285 = arith.constant 0 : index
    %693 = vector.load %arg4[%c0_284, %c24, %c0_285] : memref<1x100x256xf32, #tpu.memory_space<vmem>>, vector<1x1x256xf32>
    %694 = vector.shape_cast %693 : vector<1x1x256xf32> to vector<1x256xf32>
    %695 = vector.extract_strided_slice %692 {offsets = [0, 0], sizes = [1, 256], strides = [1, 1]} : vector<4x256xf32> to vector<1x256xf32>
    %696 = arith.mulf %695, %694 : vector<1x256xf32>
    %697 = arith.addf %682, %696 : vector<1x256xf32>
    %c0_286 = arith.constant 0 : index
    %c49_287 = arith.constant 49 : index
    %c0_288 = arith.constant 0 : index
    %698 = vector.load %arg4[%c0_286, %c49_287, %c0_288] : memref<1x100x256xf32, #tpu.memory_space<vmem>>, vector<1x1x256xf32>
    %699 = vector.shape_cast %698 : vector<1x1x256xf32> to vector<1x256xf32>
    %700 = vector.extract_strided_slice %692 {offsets = [1, 0], sizes = [1, 256], strides = [1, 1]} : vector<4x256xf32> to vector<1x256xf32>
    %701 = arith.mulf %700, %699 : vector<1x256xf32>
    %702 = arith.addf %697, %701 : vector<1x256xf32>
    %c0_289 = arith.constant 0 : index
    %c74 = arith.constant 74 : index
    %c0_290 = arith.constant 0 : index
    %703 = vector.load %arg4[%c0_289, %c74, %c0_290] : memref<1x100x256xf32, #tpu.memory_space<vmem>>, vector<1x1x256xf32>
    %704 = vector.shape_cast %703 : vector<1x1x256xf32> to vector<1x256xf32>
    %705 = vector.extract_strided_slice %692 {offsets = [2, 0], sizes = [1, 256], strides = [1, 1]} : vector<4x256xf32> to vector<1x256xf32>
    %706 = arith.mulf %705, %704 : vector<1x256xf32>
    %707 = arith.addf %702, %706 : vector<1x256xf32>
    %c0_291 = arith.constant 0 : index
    %c99 = arith.constant 99 : index
    %c0_292 = arith.constant 0 : index
    %708 = vector.load %arg4[%c0_291, %c99, %c0_292] : memref<1x100x256xf32, #tpu.memory_space<vmem>>, vector<1x1x256xf32>
    %709 = vector.shape_cast %708 : vector<1x1x256xf32> to vector<1x256xf32>
    %710 = vector.extract_strided_slice %692 {offsets = [3, 0], sizes = [1, 256], strides = [1, 1]} : vector<4x256xf32> to vector<1x256xf32>
    %711 = arith.mulf %710, %709 : vector<1x256xf32>
    %712 = arith.addf %707, %711 : vector<1x256xf32>
    %c0_293 = arith.constant 0 : index
    %c0_294 = arith.constant 0 : index
    %c0_295 = arith.constant 0 : index
    %713 = vector.load %arg6[%c0_293, %c0_294, %c0_295] : memref<1x1x256xf32, #tpu.memory_space<vmem>>, vector<1x1x256xf32>
    %714 = vector.shape_cast %713 : vector<1x1x256xf32> to vector<1x256xf32>
    %715 = vector.shape_cast %712 : vector<1x256xf32> to vector<1x1x256xf32>
    tpu.vector_store %arg6[%c0_293, %c0_294, %c0_295], %715 {strides = array<i32>} : memref<1x1x256xf32, #tpu.memory_space<vmem>>, vector<1x1x256xf32>,
    return
  }
  func.func @transform_0(%arg0: i32, %arg1: i32) -> (i32, i32, i32) {
    %c0_i32 = arith.constant 0 : i32
    %c0_i32_0 = arith.constant 0 : i32
    return %arg0, %c0_i32, %arg1 : i32, i32, i32
  }
  func.func @transform_1(%arg0: i32, %arg1: i32) -> (i32, i32, i32) {
    %c1_i32 = arith.constant 1 : i32
    %0 = arith.addi %arg1, %c1_i32 : i32
    %c0_i32 = arith.constant 0 : i32
    %c0_i32_0 = arith.constant 0 : i32
    return %arg0, %c0_i32, %0 : i32, i32, i32
  }
  func.func @transform_2(%arg0: i32, %arg1: i32) -> (i32, i32, i32) {
    %c0_i32 = arith.constant 0 : i32
    %c0_i32_0 = arith.constant 0 : i32
    return %arg0, %c0_i32, %arg1 : i32, i32, i32
  }
  func.func @transform_3(%arg0: i32, %arg1: i32) -> (i32, i32) {
    %c0_i32 = arith.constant 0 : i32
    %c0_i32_0 = arith.constant 0 : i32
    %c0_i32_1 = arith.constant 0 : i32
    return %c0_i32, %c0_i32_0 : i32, i32
  }
  func.func @transform_4(%arg0: i32, %arg1: i32) -> (i32, i32, i32) {
    %c0_i32 = arith.constant 0 : i32
    %c0_i32_0 = arith.constant 0 : i32
    return %arg0, %c0_i32, %arg1 : i32, i32, i32
  }
}

</mosaic_0001>

<bundles_post_ra>
// kernel: tpu_custom_call.1
= control target key start
LH: loop header
LB: loop body
LE: loop exit
PB: predicated region body
PF: predicated region fallthrough
CT: control target
= control target key end

     0   :  { %9 = vsyncpa [#allocation4], 0  ;;  %s6348_s0 = inlined_call_operand.vmem [shape: f32[2,4,512], index: 0, kind: input, shape index: {}]   ;;  %s6349_s1 = inlined_call_operand.vmem [shape: f32[2,4,512], index: 1, kind: input, shape index: {}]   ;;  %s6350_s2 = inlined_call_operand.vmem [shape: f32[2,100,256], index: 2, kind: input, shape index: {}]   ;;  %s6351_s3 = inlined_call_operand.vmem [shape: s32[1,256], index: 3, kind: input, shape index: {}]   ;;  %s6352_s4 = inlined_call_operand.hbm [shape: f32[2,1,256], index: 4, kind: output, shape index: {}]  }
   0x1   :  { %11 = vsyncpa [#allocation4 + $0x1], 0  ;;  %s4493_s15 = smov 0   ;;  %s4495_s16 = smov 0  }
   0x2   :  { %s4497_s17 = smov 0   ;;  %s4499_s18 = smov 0  }
   0x3   :  { %s4501_s19 = smov 0   ;;  %s4503_s20 = smov 0  }
   0x4 LB: > { %s3956_s21 = sadd.s32 4294967295, %s4415_s20   ;;  %s3957_s22 = sadd.s32 4294967294, %s4415_s20   ;;  %s4415_s20 = sphi %s4503_s20, %s17_s20   ;;  %s4411_s19 = sphi %s4501_s19, %s6580_s19   ;;  %s4407_s18 = sphi %s4499_s18, %s6579_s18   ;;  %s4403_s17 = sphi %s4497_s17, %s6578_s17   ;;  %s4399_s16 = sphi %s4495_s16, %s6577_s16   ;;  %s4395_s15 = sphi %s4493_s15, %s6576_s15  }
   0x5   : > { %s29_s23 = sadd.s32 1, %s4411_s19  ;;  %s145_s24 = sadd.s32 1, %s4403_s17 }
   0x6   : > { %p31_p0 = scmp.ge.s32.totalorder %s29_s23, 2  ;;  %p155_p1 = scmp.ne.s32.totalorder %s4403_s17, %s4399_s16 }
   0x7   : > { %p156_p2 = scmp.eq.s32.totalorder %s3956_s21, 1  ;;  %p161_p3 = scmp.ne.s32.totalorder %s4399_s16, %s4395_s15 }
   0x8   : > { %s6582_s23 = smov (%p31_p0, %s29_s23), 0  ;;  %p162_p5 = scmp.eq.s32.totalorder %s3957_s22, 1 }
   0x9   : > { %p4533_p4 = por %p156_p2, %p155_p1  ;;  %s140_s26 = ssub.s32 %s4411_s19, %s6582_s23 }
   0xa   : > { %p3960_p6 = scmp.ge.s32.totalorder %s4415_s20, 1  ;;  %p143_p7 = scmp.eq.s32.totalorder %s140_s26, 0 }
   0xb   : > { %p4540_p8 = por %p162_p5, %p161_p3  ;;  %p224_p9 = scmp.lt.s32.totalorder %s4415_s20, 3 }
   0xc   : > { %s4546_s28 = scalar_select %p143_p7, %s4403_s17, %s145_s24  }
   0xd   : > { %p225_p10 = pnand %p3960_p6, %p224_p9 }
   0xf   : > { %228 = sbr.rel (%p225_p10) target bundleno = 6300 (0x189c), region = 36 }
  0x16   : > { %v4551_v0 = vld [vmem:[%s6351_s3] sm:$0x3]  ;;  %v6353_v1 = vlaneseq  ;;  %p274_p11 = scmp.lt.s32.totalorder %s4407_s18, 1  ;;  %v4417_v2 = vmov 286326784   ;;  %v4418_v6 = vmov 0.0   ;;  %s4419_s10 = smov 1  }
  0x17   : > { %v332_v3 = vunpack.c.l.s4 %v4417_v2  ;;  %vm393_vm0 = vcmp.ge.s32.totalorder %v4551_v0, 1  ;;  %vm394_vm1 = vcmp.lt.s32.totalorder %v4551_v0, 17  ;;  %vm685_vm3 = vcmp.ge.s32.totalorder %v4551_v0, 4294967295  ;;  %s4420_s21 = smov 2   ;;  %s4421_s30 = smov 3  }
  0x18   : > { %v4557_v4 = vshrl.u32 %v6353_v1, 7  ;;  %vm395_vm2 = vmand %vm393_vm0, %vm394_vm1  ;;  %s4560_s5 = scalar_select %p274_p11, %s4407_s18, 1  ;;  %vm686_vm4 = vcmp.lt.s32.totalorder %v4551_v0, 15  ;;  %vm842_vm6 = vcmp.ge.s32.totalorder %v4551_v0, 4294967294  ;;  %vm843_vm7 = vcmp.lt.s32.totalorder %v4551_v0, 14 }
  0x19   : > { %v333_v5 = vunpack.c.0.s8 %v332_v3  ;;  %v3974_v7 = vsel %vm395_vm2, 1.0, %v4418_v6  ;;  %vm687_vm5 = vmand %vm685_vm3, %vm686_vm4  ;;  %vm312_vm8 = vcmp.ge.s32.totalorder %v4551_v0, 2  ;;  %vm313_vm9 = vcmp.lt.s32.totalorder %v4551_v0, 18  ;;  %s4424_s7 = smov 17   ;;  %s4425_s8 = smov 126  }
  0x1a   : > { %6401 = vst [vmem:[#allocation6_spill] sm:$0xff] %v4557_v4  ;;  %v4564_v8 = vsub.s32 0, %v4557_v4  ;;  %v4567_v9 = vsub.s32 1, %v4557_v4  ;;  %s4227_s6 = smul.u32 208, %s4560_s5  ;;  %v3995_v20 = vsel %vm687_vm5, 1.0, %v4418_v6  ;;  %s4222_s11 = sshll.u32 %s4560_s5, 4  ;;  %vm844_vm10 = vmand %vm842_vm6, %vm843_vm7 }
  0x1b   : > { %v4573_v10 = vsub.s32 %v333_v5, %v4557_v4  ;;  %s281_s14 = scalar_lea.vmem %s6348_s0, %s4222_s11  ;;  %s4224_s22 = sadd.s32 8, %s4222_s11  ;;  %vm314_vm11 = vmand %vm312_vm8, %vm313_vm9  ;;  %v4006_v45 = vsel %vm844_vm10, 1.0, %v4418_v6  ;;  %vm564_vm12 = vcmask 15360   ;;  %vm860_vm13 = vcmask 31744  }
  0x1c   : > { %v402_v11 = vrot.slane %v3974_v7, %v4564_v8  ;;  %v406_v12 = vrot.slane %v3974_v7, %v4567_v9  ;;  %s4580_s9 = scalar_lea.vmem %s6350_s2, %s4227_s6  ;;  %v694_v23 = vrot.slane %v3995_v20, %v4564_v8  ;;  %v698_v26 = vrot.slane %v3995_v20, %v4567_v9  ;;  %v4603_v27 = vld [vmem:[%s281_s14] sm:$0xff]  ;;  %s292_s29 = scalar_lea.vmem %s6349_s1, %s4224_s22 }
  0x1d   : > { %v3979_v13 = vld [vmem:[%s4580_s9 + $0x63] ss:$8 sm:$0x3]  ;;  %v3985_v14 = vld [vmem:[%s4580_s9 + $0x2] ss:$8 sm:$0x3]  ;;  %v851_v49 = vrot.slane %v4006_v45, %v4564_v8  ;;  %v855_v50 = vrot.slane %v4006_v45, %v4567_v9 }
  0x1e   : > { %v4584_v15 = vcombine.low %v402_v11, %v406_v12  ;;  %v492_v16 = vrot.slane %v3979_v13, %v4573_v10  ;;  %v3975_v17 = vld [vmem:[%s4580_s9 + $0x1] ss:$8 sm:$0x3]  ;;  %v560_v18 = vrot.slane %v3985_v14, %v4573_v10  ;;  %v3976_v21 = vld [vmem:[%s4580_s9 + $0x32] ss:$8 sm:$0x3]  ;;  %v4612_v30 = vcombine.low %v694_v23, %v698_v26 }
  0x1f   : > { %v426_v19 = vrot.slane %v3975_v17, %v4573_v10  ;;  %v3989_v22 = vld [vmem:[%s4580_s9 + $0x64] ss:$8 sm:$0x3]  ;;  %v458_v24 = vrot.slane %v3976_v21, %v4573_v10  ;;  %v3982_v28 = vld [vmem:[%s4580_s9 + $0x94] ss:$8 sm:$0x3]  ;;  %v4648_v54 = vcombine.low %v851_v49, %v855_v50 }
  0x20   : > { %408 = vrot.lane.b32.xlu0 %v4584_v15, %s4419_s10  ;;  %493 = vrot.lane.b32.xlu1 %v492_v16, %s4419_s10  ;;  %v626_v25 = vrot.slane %v3989_v22, %v4573_v10  ;;  %307 = vst [vmem:[#allocation2] sm:$0xff] %v4603_v27  ;;  %v526_v29 = vrot.slane %v3982_v28, %v4573_v10  ;;  %v308_v31 = vld [vmem:[%s292_s29] sm:$0xff]  ;;  %v3986_v32 = vld [vmem:[%s4580_s9 + $0x33] ss:$8 sm:$0x3]  ;;  %v3967_v47 = vsel %vm314_vm11, 1.0, %v4418_v6 }
  0x21   : > { %v3997_v33 = vld [vmem:[%s4580_s9 + $0x34] ss:$8 sm:$0x3]  ;;  %309 = vst [vmem:[#allocation2 + $0x8] sm:$0xff] %v308_v31  ;;  %v592_v34 = vrot.slane %v3986_v32, %v4573_v10  ;;  %s4422_s5 = smov 4   ;;  %v321_v52 = vrot.slane %v3967_v47, %v4564_v8  ;;  %v325_v53 = vrot.slane %v3967_v47, %v4567_v9  ;;  %s4423_s6 = smov 16  }
  0x22   : > { %v749_v35 = vrot.slane %v3997_v33, %v4573_v10  ;;  %v3992_v36 = vld [vmem:[%s4580_s9 + $0x95] ss:$8 sm:$0x3]  ;;  %v4003_v37 = vld [vmem:[%s4580_s9 + $0x96] ss:$8 sm:$0x3] }
  0x23   : > { %v660_v38 = vrot.slane %v3992_v36, %v4573_v10  ;;  %v817_v39 = vrot.slane %v4003_v37, %v4573_v10  ;;  %v3996_v40 = vld [vmem:[%s4580_s9 + $0x3] ss:$8 sm:$0x3]  ;;  %v4007_v41 = vld [vmem:[%s4580_s9 + $0x4] ss:$8 sm:$0x3]  ;;  %v4650_v55 = vcombine.low %v321_v52, %v325_v53 }
  0x24   : > { %561 = vrot.lane.b32.xlu1 %v560_v18, %s4420_s21  ;;  %427 = vrot.lane.b32.xlu0 %v426_v19, %s4419_s10  ;;  %v718_v42 = vrot.slane %v3996_v40, %v4573_v10  ;;  %v875_v43 = vrot.slane %v4007_v41, %v4573_v10  ;;  %v4000_v44 = vld [vmem:[%s4580_s9 + $0x65] ss:$8 sm:$0x3]  ;;  %v4011_v46 = vld [vmem:[%s4580_s9 + $0x66] ss:$8 sm:$0x3] }
  0x25   : > { %v783_v48 = vrot.slane %v4000_v44, %v4573_v10  ;;  %v940_v51 = vrot.slane %v4011_v46, %v4573_v10  ;;  %v4008_v56 = vld [vmem:[%s4580_s9 + $0x35] ss:$8 sm:$0x3]  ;;  %v4018_v57 = vld [vmem:[%s4580_s9 + $0x36] ss:$8 sm:$0x3] }
  0x26   : > { %v906_v58 = vrot.slane %v4008_v56, %v4573_v10  ;;  %v1048_v59 = vrot.slane %v4018_v57, %v4573_v10  ;;  %v4014_v60 = vld [vmem:[%s4580_s9 + $0x97] ss:$8 sm:$0x3]  ;;  %v4024_v61 = vld [vmem:[%s4580_s9 + $0xa0] ss:$8 sm:$0x3] }
  0x27   : > { %v974_v62 = vrot.slane %v4014_v60, %v4573_v10  ;;  %v1116_v63 = vrot.slane %v4024_v61, %v4573_v10  ;;  %v4017_v0 = vld [vmem:[%s4580_s9 + $0x5] ss:$8 sm:$0x3]  ;;  %v4027_v2 = vld [vmem:[%s4580_s9 + $0x6] ss:$8 sm:$0x3] }
  0x28   : > { %459 = vrot.lane.b32.xlu0 %v458_v24, %s4419_s10  ;;  %627 = vrot.lane.b32.xlu1 %v626_v25, %s4420_s21  ;;  %v1017_v3 = vrot.slane %v4017_v0, %v4573_v10  ;;  %v1159_v5 = vrot.slane %v4027_v2, %v4573_v10  ;;  %v4021_v6 = vld [vmem:[%s4580_s9 + $0x67] ss:$8 sm:$0x3]  ;;  %v4678_v16 = vld [vmem:[#allocation2 + $0x8] sm:$0xf]  ;;  %s4427_s11 = smov 125  }
  0x29   : > { %v1082_v7 = vrot.slane %v4021_v6, %v4573_v10  ;;  %s4428_s12 = smov 124   ;;  %s4429_s13 = smov 112   ;;  %vm1144_vm14 = vcmask 138240   ;;  %vm411_vm15 = vcmask 7168   ;;  %vm703_vm0 = vcmask 23552  }
  0x2a   : > { %s4430_s14 = smov 111   ;;  %vm1002_vm1 = vcmask 130048   ;;  %v4037_v4 = vld [vmem:[%s4580_s9 + $0x7] ss:$8 sm:$0x3]  ;;  %vm1296_vm2 = vcmask 146432  }
  0x2b   : > { %s4432_s22 = smov 110   ;;  %s4433_s24 = smov 19   ;;  %vm1420_vm3 = vcmask 154624   ;;  %vm1562_vm4 = vcmask 162816   ;;  %vm1704_vm5 = vcmask 261120   ;;  %vm1846_vm6 = vcmask 269312  }
  0x2c   : > { %527 = vrot.lane.b32.xlu0 %v526_v29, %s4419_s10  ;;  %700 = vrot.lane.b32.xlu1 %v4612_v30, %s4421_s30  ;;  %s4426_s10 = smov 127   ;;  %s4434_s26 = smov 109   ;;  %vm1998_vm7 = vcmask 277504   ;;  %vm2122_vm8 = vcmask 285696   ;;  %vm2264_vm9 = vcmask 293888   ;;  %vm2406_vm10 = vcmask 392192  }
  0x2d   : > { %s4435_s29 = smov 20   ;;  %vm2548_vm11 = vcmask 400384  }
  0x30   : > { %593 = vrot.lane.b32.xlu0 %v592_v34, %s4420_s21  ;;  %750 = vrot.lane.b32.xlu1 %v749_v35, %s4421_s30 }
  0x34   : > { %661 = vrot.lane.b32.xlu0 %v660_v38, %s4420_s21  ;;  %818 = vrot.lane.b32.xlu1 %v817_v39, %s4421_s30  ;;  %s4431_s21 = smov 18  }
  0x38   : > { %719 = vrot.lane.b32.xlu0 %v718_v42, %s4421_s30  ;;  %876 = vrot.lane.b32.xlu1 %v875_v43, %s4422_s5 }
  0x3c   : > { %784 = vrot.lane.b32.xlu0 %v783_v48, %s4421_s30  ;;  %941 = vrot.lane.b32.xlu1 %v940_v51, %s4422_s5  ;;  %s4436_s30 = smov 108  }
  0x40   : > { %857 = vrot.lane.b32.xlu0 %v4648_v54, %s4422_s5  ;;  %999 = vrot.lane.b32.xlu1 %v4650_v55, %s4423_s6 }
  0x44   : > { %907 = vrot.lane.b32.xlu0 %v906_v58, %s4422_s5  ;;  %1049 = vrot.lane.b32.xlu1 %v1048_v59, %s4423_s6 }
  0x48   : > { %975 = vrot.lane.b32.xlu0 %v974_v62, %s4422_s5  ;;  %1117 = vrot.lane.b32.xlu1 %v1116_v63, %s4423_s6  ;;  %s4437_s5 = smov 32  }
  0x4c   : > { %1018 = vrot.lane.b32.xlu0 %v1017_v3, %s4423_s6  ;;  %1160 = vrot.lane.b32.xlu1 %v1159_v5, %s4424_s7 }
  0x50   : > { %1083 = vrot.lane.b32.xlu0 %v1082_v7, %s4423_s6  ;;  %s4438_s6 = smov 96  }
  0x54   : > { %1141 = vrot.lane.b32.xlu0 %v4584_v15, %s4424_s7 }
  0x92   : > { %v4671_v8 = vpop.permute.xlu0 %408  ;;  %v4673_v9 = vpop.permute.xlu1 %493 }
  0x93   : > { %v410_v13 = vrot.slane %v4671_v8, 4 }
  0x95   : > { %v4689_v23 = vmul.f32 %v410_v13, %v4678_v16 }
  0x96   : > { %v562_v11 = vpop.permute.xlu1 %561  ;;  %v4675_v12 = vpop.permute.xlu0 %427 }
  0x97   : > { %v563_v14 = vrot.slane %v562_v11, 4  ;;  %v429_v18 = vrot.slane %v4675_v12, 4 }
  0x99   : > { %v565_v17 = vsel %vm564_vm12, %v563_v14, %v562_v11  ;;  %v569_v19 = vmul.f32 %v563_v14, %v4678_v16  ;;  %v434_v25 = vmul.f32 %v429_v18, %v4689_v23 }
  0x9a   : > { %v4683_v20 = vpop.permute.xlu0 %459  ;;  %v628_v21 = vpop.permute.xlu1 %627  ;;  %v568_v22 = vmul.f32 %v565_v17, %v4603_v27 }
  0x9b   : > { %574 = vrot.lane.b32.xlu1 %v569_v19, %s4425_s8  ;;  %v629_v24 = vrot.slane %v628_v21, 4 }
  0x9c   : > { %572 = vrot.lane.b32.xlu0 %v568_v22, %s4425_s8 }
  0x9d   : > { %v634_v26 = vmul.f32 %v629_v24, %v4678_v16  ;;  %v630_v5 = vsel %vm564_vm12, %v629_v24, %v628_v21 }
  0x9e   : > { %v4697_v28 = vpop.permute.xlu0 %527  ;;  %v4699_v29 = vpop.permute.xlu1 %700  ;;  %v633_v19 = vmul.f32 %v630_v5, %v4603_v27 }
  0x9f   : > { %439 = vrot.lane.b32.xlu1 %v434_v25, %s4426_s10  ;;  %v3991_v31 = vrot.slane %v634_v26, 10  ;;  %v702_v40 = vrot.slane %v4699_v29, 4 }
  0xa0   : > { %v3990_v24 = vrot.slane %v633_v19, 10 }
  0xa1   : > { %v4726_v44 = vmul.f32 %v702_v40, %v4678_v16 }
  0xa2   : > { %v4702_v32 = vpop.permute.xlu0 %593  ;;  %v4704_v33 = vpop.permute.xlu1 %750 }
  0xa3   : > { %v595_v34 = vrot.slane %v4702_v32, 4  ;;  %643 = vrot.lane.b32.xlu1 %v3991_v31, %s4425_s8 }
  0xa5   : > { %v600_v35 = vmul.f32 %v595_v34, %v4678_v16 }
  0xa6   : > { %v4711_v36 = vpop.permute.xlu0 %661  ;;  %v4713_v37 = vpop.permute.xlu1 %818 }
  0xa7   : > { %v663_v38 = vrot.slane %v4711_v36, 4  ;;  %v3988_v39 = vrot.slane %v600_v35, 9  ;;  %v461_v35 = vrot.slane %v4683_v20, 4 }
  0xa9   : > { %609 = vrot.lane.b32.xlu0 %v3988_v39, %s4425_s8  ;;  %v668_v41 = vmul.f32 %v663_v38, %v4678_v16  ;;  %v466_v5 = vmul.f32 %v461_v35, %v4689_v23 }
  0xaa   : > { %v4721_v42 = vpop.permute.xlu0 %719  ;;  %v877_v43 = vpop.permute.xlu1 %876 }
  0xab   : > { %v721_v45 = vrot.slane %v4721_v42, 4  ;;  %v3994_v46 = vrot.slane %v668_v41, 11  ;;  %v878_v53 = vrot.slane %v877_v43, 4 }
  0xad   : > { %677 = vrot.lane.b32.xlu0 %v3994_v46, %s4425_s8  ;;  %v726_v49 = vmul.f32 %v721_v45, %v4726_v44  ;;  %v879_v39 = vsel %vm860_vm13, %v878_v53, %v877_v43 }
  0xae   : > { %v4730_v47 = vpop.permute.xlu0 %784  ;;  %v4732_v48 = vpop.permute.xlu1 %941 }
  0xb1   : > { %731 = vrot.lane.b32.xlu0 %v726_v49, %s4427_s11 }
  0xb2   : > { %v858_v50 = vpop.permute.xlu0 %857  ;;  %v4738_v51 = vpop.permute.xlu1 %999 }
  0xb3   : > { %v859_v52 = vrot.slane %v858_v50, 4  ;;  %v1001_v62 = vrot.slane %v4738_v51, 4 }
  0xb5   : > { %v4741_v56 = vmul.f32 %v859_v52, %v4678_v16  ;;  %v861_v60 = vsel %vm860_vm13, %v859_v52, %v858_v50  ;;  %v4760_v2 = vmul.f32 %v1001_v62, %v4678_v16  ;;  %v412_v52 = vsel %vm411_vm15, %v410_v13, %v4671_v8 }
  0xb6   : > { %v4743_v57 = vpop.permute.xlu0 %907  ;;  %v4746_v59 = vpop.permute.xlu1 %1049  ;;  %v4755_v0 = vmul.f32 %v861_v60, %v4603_v27  ;;  %v596_v60 = vsel %vm564_vm12, %v595_v34, %v4702_v32  ;;  %v4808_v8 = vmul.f32 %v412_v52, %v4603_v27  ;;  %v529_v13 = vrot.slane %v4697_v28, 4 }
  0xb7   : > { %v883_v58 = vmul.f32 %v878_v53, %v4741_v56  ;;  %v430_v53 = vsel %vm411_vm15, %v429_v18, %v4675_v12  ;;  %v599_v18 = vmul.f32 %v596_v60, %v4603_v27  ;;  %v664_v32 = vsel %vm564_vm12, %v663_v38, %v4711_v36 }
  0xb8   : > { %v882_v50 = vmul.f32 %v879_v39, %v4755_v0  ;;  %v433_v12 = vmul.f32 %v430_v53, %v4808_v8  ;;  %v786_v34 = vrot.slane %v4730_v47, 4  ;;  %v534_v19 = vmul.f32 %v529_v13, %v4689_v23 }
  0xb9   : > { %888 = vrot.lane.b32.xlu1 %v883_v58, %s4428_s12  ;;  %v722_v39 = vsel %vm703_vm0, %v721_v45, %v4721_v42  ;;  %vm2700_vm12 = vcmask 408576  }
  0xba   : > { %v4750_v61 = vpop.permute.xlu0 %975  ;;  %v4767_v6 = vpop.permute.xlu1 %1117  ;;  %v3984_v36 = vrot.slane %v534_v19, 11  ;;  %v791_v38 = vmul.f32 %v786_v34, %v4726_v44 }
  0xbb   : > { %v977_v63 = vrot.slane %v4750_v61, 4 }
  0xbd   : > { %v978_v3 = vsel %vm860_vm13, %v977_v63, %v4750_v61 }
  0xbe   : > { %v4769_v7 = vpop.permute.xlu0 %1018  ;;  %v4772_v11 = vmul.f32 %v978_v3, %v4755_v0  ;;  %v1161_v25 = vpop.permute.xlu1 %1160 }
  0xbf   : > { %v1020_v14 = vrot.slane %v4769_v7, 4  ;;  %v1162_v21 = vrot.slane %v1161_v25, 4 }
  0xc1   : > { %v1025_v17 = vmul.f32 %v1020_v14, %v4760_v2  ;;  %v1163_v49 = vsel %vm1144_vm14, %v1162_v21, %v1161_v25  ;;  %v3987_v25 = vrot.slane %v599_v18, 9  ;;  %v1021_v45 = vsel %vm1002_vm1, %v1020_v14, %v4769_v7 }
  0xc2   : > { %v4777_v22 = vpop.permute.xlu0 %1083  ;;  %v752_v7 = vrot.slane %v4704_v33, 4 }
  0xc3   : > { %1030 = vrot.lane.b32.xlu0 %v1025_v17, %s4429_s13  ;;  %v3978_v17 = vrot.slane %v466_v5, 9 }
  0xc6   : > { %v1142_v26 = vpop.permute.xlu0 %1141 }
  0xc7   : > { %v1143_v31 = vrot.slane %v1142_v26, 4  ;;  %641 = vrot.lane.b32.xlu0 %v3990_v24, %s4425_s8  ;;  %v909_v24 = vrot.slane %v4743_v57, 4 }
  0xc9   : > { %v1145_v41 = vsel %vm1144_vm14, %v1143_v31, %v1142_v26  ;;  %v4785_v46 = vmul.f32 %v1143_v31, %v4678_v16  ;;  %v704_v26 = vsel %vm703_vm0, %v702_v40, %v4699_v29  ;;  %v1003_v29 = vsel %vm1002_vm1, %v1001_v62, %v4738_v51 }
  0xca   : > { %v4794_v58 = vmul.f32 %v1145_v41, %v4603_v27  ;;  %v4844_v41 = vmul.f32 %v704_v26, %v4603_v27  ;;  %v495_v40 = vrot.slane %v4673_v9, 4  ;;  %v4860_v52 = vmul.f32 %v1003_v29, %v4603_v27 }
  0xcb   : > { %886 = vrot.lane.b32.xlu0 %v882_v50, %s4428_s12  ;;  %v1167_v43 = vmul.f32 %v1162_v21, %v4785_v46  ;;  %v667_v21 = vmul.f32 %v664_v32, %v4603_v27  ;;  %v914_v50 = vmul.f32 %v909_v24, %v4741_v56  ;;  %v982_v51 = vmul.f32 %v977_v63, %v4741_v56 }
  0xcc   : > { %v1166_v3 = vmul.f32 %v1163_v49, %v4794_v58  ;;  %v4002_v49 = vrot.slane %v791_v38, 10  ;;  %v725_v42 = vmul.f32 %v722_v39, %v4844_v41  ;;  %v1024_v62 = vmul.f32 %v1021_v45, %v4860_v52 }
  0xcd   : > { %1172 = vrot.lane.b32.xlu1 %v1167_v43, %s4430_s14  ;;  %v3993_v31 = vrot.slane %v667_v21, 11  ;;  %v1085_v43 = vrot.slane %v4777_v22, 4  ;;  %v4010_v53 = vrot.slane %v914_v50, 9  ;;  %v500_v60 = vmul.f32 %v495_v40, %v4689_v23 }
  0xce   : > { %v4016_v14 = vrot.slane %v982_v51, 11  ;;  %v496_v5 = vsel %vm411_vm15, %v495_v40, %v4673_v9  ;;  %v757_v63 = vmul.f32 %v752_v7, %v4726_v44  ;;  %v753_v32 = vsel %vm703_vm0, %v752_v7, %v4704_v33 }
  0xcf   : > { %1170 = vrot.lane.b32.xlu0 %v1166_v3, %s4430_s14  ;;  %v1090_v3 = vmul.f32 %v1085_v43, %v4760_v2  ;;  %v3981_v61 = vrot.slane %v500_v60, 10  ;;  %v499_v18 = vmul.f32 %v496_v5, %v4808_v8  ;;  %v756_v21 = vmul.f32 %v753_v32, %v4844_v41 }
  0xd0   : > { %v3999_v9 = vrot.slane %v757_v63, 9  ;;  %v1051_v26 = vrot.slane %v4746_v59, 4  ;;  %v1119_v50 = vrot.slane %v4767_v6, 4  ;;  %v462_v45 = vsel %vm411_vm15, %v461_v35, %v4683_v20 }
  0xd1   : > { %437 = vrot.lane.b32.xlu1 %v433_v12, %s4426_s10  ;;  %v820_v12 = vrot.slane %v4713_v37, 4  ;;  %v4023_v23 = vrot.slane %v1090_v3, 10  ;;  %v465_v60 = vmul.f32 %v462_v45, %v4808_v8  ;;  %v4028_v3 = vld [vmem:[%s4580_s9 + $0x37] ss:$8 sm:$0x3] }
  0xd2   : > { %v1052_v40 = vsel %vm1002_vm1, %v1051_v26, %v4746_v59  ;;  %v4031_v45 = vld [vmem:[%s4580_s9 + $0x70] ss:$8 sm:$0x3] }
  0xd3   : > { %475 = vrot.lane.b32.xlu0 %v3978_v17, %s4426_s10  ;;  %v943_v17 = vrot.slane %v4732_v48, 4  ;;  %v825_v19 = vmul.f32 %v820_v12, %v4726_v44  ;;  %v1055_v51 = vmul.f32 %v1052_v40, %v4860_v52  ;;  %v3977_v7 = vrot.slane %v465_v60, 9 }
  0xd5   : > { %607 = vrot.lane.b32.xlu1 %v3987_v25, %s4425_s8  ;;  %v3980_v25 = vrot.slane %v499_v18, 10  ;;  %v4005_v38 = vrot.slane %v825_v19, 11  ;;  %v948_v33 = vmul.f32 %v943_v17, %v4741_v56  ;;  %v944_v39 = vsel %vm860_vm13, %v943_v17, %v4732_v48 }
  0xd6   : > { %v947_v29 = vmul.f32 %v944_v39, %v4755_v0  ;;  %v1124_v48 = vmul.f32 %v1119_v50, %v4760_v2  ;;  %v4019_v20 = vrot.slane %v1055_v51, 9 }
  0xd7   : > { %543 = vrot.lane.b32.xlu0 %v3984_v36, %s4426_s10  ;;  %v821_v36 = vsel %vm703_vm0, %v820_v12, %v4713_v37  ;;  %v1056_v37 = vmul.f32 %v1051_v26, %v4760_v2  ;;  %v530_v2 = vsel %vm411_vm15, %v529_v13, %v4697_v28  ;;  %v1190_v13 = vrot.slane %v4028_v3, %v4573_v10 }
  0xd8   : > { %v824_v44 = vmul.f32 %v821_v36, %v4844_v41  ;;  %v4026_v59 = vrot.slane %v1124_v48, 11  ;;  %v4015_v12 = vrot.slane %v4772_v11, 11  ;;  %vm2715_vm15 = vcmask 637952  }
  0xd9   : > { %675 = vrot.lane.b32.xlu1 %v3993_v31, %s4425_s8  ;;  %v3998_v31 = vrot.slane %v756_v21, 9  ;;  %s4440_s8 = smov 95  }
  0xda   : > { %v4004_v56 = vrot.slane %v824_v44, 11 }
  0xdb   : > { %800 = vrot.lane.b32.xlu0 %v4002_v49, %s4427_s11  ;;  %v4013_v49 = vrot.slane %v948_v33, 10 }
  0xdd   : > { %729 = vrot.lane.b32.xlu1 %v725_v42, %s4427_s11  ;;  %v4020_v42 = vrot.slane %v1056_v37, 9 }
  0xdf   : > { %923 = vrot.lane.b32.xlu0 %v4010_v53, %s4428_s12  ;;  %v4012_v53 = vrot.slane %v947_v29, 10 }
  0xe1   : > { %1028 = vrot.lane.b32.xlu1 %v1024_v62, %s4429_s13  ;;  %v1120_v62 = vsel %vm1002_vm1, %v1119_v50, %v4767_v6  ;;  %v533_v6 = vmul.f32 %v530_v2, %v4808_v8  ;;  %v910_v8 = vsel %vm860_vm13, %v909_v24, %v4743_v57  ;;  %vm443_vm13 = vcmask 1043456  }
  0xe2   : > { %v1123_v35 = vmul.f32 %v1120_v62, %v4860_v52  ;;  %v1224_v62 = vrot.slane %v4031_v45, %v4573_v10 }
  0xe3   : > { %991 = vrot.lane.b32.xlu0 %v4016_v14, %s4428_s12  ;;  %v787_v14 = vsel %vm703_vm0, %v786_v34, %v4730_v47  ;;  %v3983_v28 = vrot.slane %v533_v6, 11  ;;  %v913_v34 = vmul.f32 %v910_v8, %v4755_v0  ;;  %vm2824_vm0 = vcmask 416768  }
  0xe4   : > { %v4025_v5 = vrot.slane %v1123_v35, 11 }
  0xe5   : > { %509 = vrot.lane.b32.xlu1 %v3981_v61, %s4426_s10  ;;  %v790_v61 = vmul.f32 %v787_v14, %v4844_v41  ;;  %v4009_v63 = vrot.slane %v913_v34, 9  ;;  %v1086_v41 = vsel %vm1002_vm1, %v1085_v43, %v4777_v22  ;;  %vm579_vm1 = vcmask 1031168  }
  0xe6   : > { %v1089_v57 = vmul.f32 %v1086_v41, %v4860_v52 }
  0xe7   : > { %1099 = vrot.lane.b32.xlu0 %v4023_v23, %s4429_s13  ;;  %v4001_v47 = vrot.slane %v790_v61, 10 }
  0xe8   : > { %v4022_v24 = vrot.slane %v1089_v57, 10 }
  0xe9   : > { %766 = vrot.lane.b32.xlu1 %v3999_v9, %s4427_s11 }
  0xeb   : > { %507 = vrot.lane.b32.xlu0 %v3980_v25, %s4426_s10 }
  0xed   : > { %834 = vrot.lane.b32.xlu1 %v4005_v38, %s4427_s11 }
  0xef   : > { %764 = vrot.lane.b32.xlu0 %v3998_v31, %s4427_s11 }
  0xf1   : > { %957 = vrot.lane.b32.xlu1 %v4013_v49, %s4428_s12 }
  0xf3   : > { %832 = vrot.lane.b32.xlu0 %v4004_v56, %s4427_s11 }
  0xf5   : > { %1065 = vrot.lane.b32.xlu1 %v4020_v42, %s4429_s13 }
  0xf7   : > { %955 = vrot.lane.b32.xlu0 %v4012_v53, %s4428_s12 }
  0xf9   : > { %1133 = vrot.lane.b32.xlu1 %v4026_v59, %s4429_s13 }
  0xfb   : > { %1063 = vrot.lane.b32.xlu0 %v4019_v20, %s4429_s13 }
  0xfd   : > { %473 = vrot.lane.b32.xlu1 %v3977_v7, %s4426_s10 }
  0xff   : > { %1131 = vrot.lane.b32.xlu0 %v4025_v5, %s4429_s13 }
 0x101   : > { %541 = vrot.lane.b32.xlu1 %v3983_v28, %s4426_s10  ;;  %s4441_s10 = smov 34  }
 0x103   : > { %1191 = vrot.lane.b32.xlu0 %v1190_v13, %s4424_s7 }
 0x105   : > { %798 = vrot.lane.b32.xlu1 %v4001_v47, %s4427_s11  ;;  %s4442_s11 = smov 94  }
 0x109   : > { %921 = vrot.lane.b32.xlu1 %v4009_v63, %s4428_s12 }
 0x10d   : > { %989 = vrot.lane.b32.xlu1 %v4015_v12, %s4428_s12  ;;  %v4991_v49 = vpop.permute.xlu1 %574  ;;  %s4443_s12 = smov 35  }
 0x10e   : > { %v4951_v0 = vpop.permute.xlu0 %572 }
 0x111   : > { %1097 = vrot.lane.b32.xlu1 %v4022_v24, %s4429_s13  ;;  %v4995_v40 = vpop.permute.xlu1 %439  ;;  %s4444_s13 = smov 93  }
 0x115   : > { %v5000_v51 = vpop.permute.xlu1 %643 }
 0x11b   : > { %v4953_v23 = vpop.permute.xlu0 %609 }
 0x11f   : > { %v4955_v18 = vpop.permute.xlu0 %677 }
 0x123   : > { %v4957_v32 = vpop.permute.xlu0 %731 }
 0x12b   : > { %v5004_v59 = vpop.permute.xlu1 %888 }
 0x135   : > { %v4959_v22 = vpop.permute.xlu0 %1030 }
 0x139   : > { %v4961_v43 = vpop.permute.xlu0 %641 }
 0x13d   : > { %v4963_v11 = vpop.permute.xlu0 %886 }
 0x13f   : > { %v5007_v60 = vpop.permute.xlu1 %1172 }
 0x141   : > { %v4965_v52 = vpop.permute.xlu0 %1170 }
 0x143   : > { %v5009_v2 = vpop.permute.xlu1 %437 }
 0x145   : > { %v4967_v17 = vpop.permute.xlu0 %475 }
 0x147   : > { %v5011_v20 = vpop.permute.xlu1 %607 }
 0x149   : > { %v4969_v9 = vpop.permute.xlu0 %543 }
 0x14b   : > { %v5013_v35 = vpop.permute.xlu1 %675 }
 0x14d   : > { %v4971_v19 = vpop.permute.xlu0 %800 }
 0x14f   : > { %v5015_v7 = vpop.permute.xlu1 %729 }
 0x151   : > { %v4973_v25 = vpop.permute.xlu0 %923 }
 0x153   : > { %v5017_v6 = vpop.permute.xlu1 %1028 }
 0x155   : > { %v4975_v21 = vpop.permute.xlu0 %991 }
 0x157   : > { %v5019_v14 = vpop.permute.xlu1 %509 }
 0x159   : > { %v4977_v36 = vpop.permute.xlu0 %1099 }
 0x15b   : > { %v5021_v3 = vpop.permute.xlu1 %766 }
 0x15d   : > { %v4979_v38 = vpop.permute.xlu0 %507 }
 0x15f   : > { %v5023_v5 = vpop.permute.xlu1 %834 }
 0x161   : > { %v4981_v33 = vpop.permute.xlu0 %764 }
 0x163   : > { %v5025_v28 = vpop.permute.xlu1 %957 }
 0x165   : > { %v4983_v26 = vpop.permute.xlu0 %832 }
 0x167   : > { %v5027_v13 = vpop.permute.xlu1 %1065 }
 0x169   : > { %v4985_v31 = vpop.permute.xlu0 %955 }
 0x16b   : > { %v5029_v61 = vpop.permute.xlu1 %1133 }
 0x16c   : > { %6402 = vst [vmem:[#allocation7_spill] sm:$0xff] %v5029_v61 }
 0x16d   : > { %v4987_v44 = vpop.permute.xlu0 %1063 }
 0x16f   : > { %v5031_v8 = vpop.permute.xlu1 %473 }
 0x171   : > { %v4989_v39 = vpop.permute.xlu0 %1131 }
 0x173   : > { %v5033_v47 = vpop.permute.xlu1 %541 }
 0x175   : > { %v1192_v37 = vpop.permute.xlu0 %1191 }
 0x176   : > { %v1193_v50 = vrot.slane %v1192_v37, 4 }
 0x177   : > { %v5035_v34 = vpop.permute.xlu1 %798 }
 0x178   : > { %v1194_v56 = vsel %vm1144_vm14, %v1193_v50, %v1192_v37  ;;  %v1198_v29 = vmul.f32 %v1193_v50, %v4785_v46 }
 0x179   : > { %v1197_v42 = vmul.f32 %v1194_v56, %v4794_v58 }
 0x17a   : > { %v4030_v48 = vrot.slane %v1198_v29, 9 }
 0x17b   : > { %v4029_v53 = vrot.slane %v1197_v42, 9  ;;  %v5037_v63 = vpop.permute.xlu1 %921 }
 0x17c   : > { %1207 = vrot.lane.b32.xlu0 %v4030_v48, %s4430_s14  ;;  %v4034_v48 = vld [vmem:[%s4580_s9 + $0xa1] ss:$8 sm:$0x3] }
 0x17d   : > { %1205 = vrot.lane.b32.xlu1 %v4029_v53, %s4430_s14  ;;  %v1258_v53 = vrot.slane %v4034_v48, %v4573_v10  ;;  %v1292_v48 = vrot.slane %v4037_v4, %v4573_v10 }
 0x17f   : > { %v5039_v41 = vpop.permute.xlu1 %989 }
 0x181   : > { %1225 = vrot.lane.b32.xlu1 %v1224_v62, %s4424_s7 }
 0x183   : > { %v5041_v12 = vpop.permute.xlu1 %1097 }
 0x1ee   : > { %v5053_v62 = vpop.permute.xlu0 %1207 }
 0x1ef   : > { %v5043_v57 = vpop.permute.xlu1 %1205  ;;  %6404 = vst [vmem:[#allocation9_spill] sm:$0xff] %v5053_v62 }
 0x1f0   : > { %6403 = vst [vmem:[#allocation8_spill] sm:$0xff] %v5043_v57 }
 0x1f3   : > { %v1226_v24 = vpop.permute.xlu1 %1225 }
 0x1f4   : > { %v1227_v37 = vrot.slane %v1226_v24, 4 }
 0x1f6   : > { %v1228_v50 = vsel %vm1144_vm14, %v1227_v37, %v1226_v24  ;;  %v1232_v56 = vmul.f32 %v1227_v37, %v4785_v46 }
 0x1f7   : > { %v1231_v29 = vmul.f32 %v1228_v50, %v4794_v58 }
 0x1f8   : > { %v4033_v42 = vrot.slane %v1232_v56, 10 }
 0x1f9   : > { %v4032_v45 = vrot.slane %v1231_v29, 10 }
 0x1fa   : > { %1241 = vrot.lane.b32.xlu1 %v4033_v42, %s4430_s14 }
 0x1fb   : > { %1239 = vrot.lane.b32.xlu0 %v4032_v45, %s4430_s14 }
 0x1ff   : > { %1259 = vrot.lane.b32.xlu0 %v1258_v53, %s4424_s7  ;;  %s4439_s7 = smov 33  }
 0x26c   : > { %v5065_v53 = vpop.permute.xlu1 %1241 }
 0x26d   : > { %v5055_v1 = vpop.permute.xlu0 %1239  ;;  %6406 = vst [vmem:[#allocation11_spill] sm:$0xff] %v5065_v53 }
 0x26e   : > { %6405 = vst [vmem:[#allocation10_spill] sm:$0xff] %v5055_v1  ;;  %v4041_v1 = vld [vmem:[%s4580_s9 + $0x71] ss:$8 sm:$0x3] }
 0x271   : > { %v1260_v24 = vpop.permute.xlu0 %1259 }
 0x272   : > { %v1261_v37 = vrot.slane %v1260_v24, 4 }
 0x274   : > { %v1262_v50 = vsel %vm1144_vm14, %v1261_v37, %v1260_v24  ;;  %v1266_v56 = vmul.f32 %v1261_v37, %v4785_v46  ;;  %vm445_vm14 = vcmask 1039360  }
 0x275   : > { %v1265_v29 = vmul.f32 %v1262_v50, %v4794_v58 }
 0x276   : > { %v4036_v42 = vrot.slane %v1266_v56, 11  ;;  %v4038_v56 = vld [vmem:[%s4580_s9 + $0x40] ss:$8 sm:$0x3] }
 0x277   : > { %v4035_v45 = vrot.slane %v1265_v29, 11  ;;  %v1324_v4 = vrot.slane %v4038_v56, %v4573_v10  ;;  %v1358_v56 = vrot.slane %v4041_v1, %v4573_v10 }
 0x278   : > { %1275 = vrot.lane.b32.xlu0 %v4036_v42, %s4430_s14 }
 0x279   : > { %1273 = vrot.lane.b32.xlu1 %v4035_v45, %s4430_s14  ;;  %s4445_s14 = smov 36  }
 0x27d   : > { %1293 = vrot.lane.b32.xlu1 %v1292_v48, %s4431_s21 }
 0x2ea   : > { %v5077_v42 = vpop.permute.xlu0 %1275 }
 0x2eb   : > { %v5067_v24 = vpop.permute.xlu1 %1273  ;;  %6408 = vst [vmem:[#allocation13_spill] sm:$0xff] %v5077_v42  ;;  %v4044_v42 = vld [vmem:[%s4580_s9 + $0xa2] ss:$8 sm:$0x3] }
 0x2ec   : > { %6407 = vst [vmem:[#allocation12_spill] sm:$0xff] %v5067_v24  ;;  %v1392_v1 = vrot.slane %v4044_v42, %v4573_v10 }
 0x2ef   : > { %v1294_v46 = vpop.permute.xlu1 %1293 }
 0x2f0   : > { %v1295_v58 = vrot.slane %v1294_v46, 4 }
 0x2f2   : > { %v1297_v37 = vsel %vm1296_vm2, %v1295_v58, %v1294_v46  ;;  %v1301_v50 = vmul.f32 %v1295_v58, %v4678_v16 }
 0x2f3   : > { %v1300_v29 = vmul.f32 %v1297_v37, %v4603_v27 }
 0x2f4   : > { %1306 = vrot.lane.b32.xlu1 %v1301_v50, %s4432_s22 }
 0x2f5   : > { %1304 = vrot.lane.b32.xlu0 %v1300_v29, %s4432_s22 }
 0x2f9   : > { %1325 = vrot.lane.b32.xlu0 %v1324_v4, %s4431_s21 }
 0x366   : > { %v5089_v4 = vpop.permute.xlu1 %1306 }
 0x367   : > { %v5079_v45 = vpop.permute.xlu0 %1304  ;;  %6410 = vst [vmem:[#allocation15_spill] sm:$0xff] %v5089_v4 }
 0x368   : > { %6409 = vst [vmem:[#allocation14_spill] sm:$0xff] %v5079_v45 }
 0x36b   : > { %v1326_v48 = vpop.permute.xlu0 %1325 }
 0x36c   : > { %v1327_v46 = vrot.slane %v1326_v48, 4 }
 0x36e   : > { %v1328_v58 = vsel %vm1296_vm2, %v1327_v46, %v1326_v48  ;;  %v1332_v24 = vmul.f32 %v1327_v46, %v4678_v16 }
 0x36f   : > { %v1331_v37 = vmul.f32 %v1328_v58, %v4603_v27 }
 0x370   : > { %v4040_v50 = vrot.slane %v1332_v24, 9 }
 0x371   : > { %v4039_v29 = vrot.slane %v1331_v37, 9 }
 0x372   : > { %1341 = vrot.lane.b32.xlu0 %v4040_v50, %s4432_s22 }
 0x373   : > { %1339 = vrot.lane.b32.xlu1 %v4039_v29, %s4432_s22 }
 0x377   : > { %1359 = vrot.lane.b32.xlu1 %v1358_v56, %s4431_s21 }
 0x3e4   : > { %v5101_v56 = vpop.permute.xlu0 %1341 }
 0x3e5   : > { %v5091_v45 = vpop.permute.xlu1 %1339  ;;  %6412 = vst [vmem:[#allocation17_spill] sm:$0xff] %v5101_v56 }
 0x3e6   : > { %6411 = vst [vmem:[#allocation16_spill] sm:$0xff] %v5091_v45 }
 0x3e9   : > { %v1360_v48 = vpop.permute.xlu1 %1359 }
 0x3ea   : > { %v1361_v46 = vrot.slane %v1360_v48, 4 }
 0x3ec   : > { %v1362_v58 = vsel %vm1296_vm2, %v1361_v46, %v1360_v48  ;;  %v1366_v24 = vmul.f32 %v1361_v46, %v4678_v16 }
 0x3ed   : > { %v1365_v37 = vmul.f32 %v1362_v58, %v4603_v27 }
 0x3ee   : > { %v4043_v50 = vrot.slane %v1366_v24, 10 }
 0x3ef   : > { %v4042_v29 = vrot.slane %v1365_v37, 10  ;;  %v4047_v37 = vld [vmem:[%s4580_s9 + $0x10] ss:$8 sm:$0x3] }
 0x3f0   : > { %1375 = vrot.lane.b32.xlu1 %v4043_v50, %s4432_s22  ;;  %v1435_v42 = vrot.slane %v4047_v37, %v4573_v10 }
 0x3f1   : > { %1373 = vrot.lane.b32.xlu0 %v4042_v29, %s4432_s22 }
 0x3f5   : > { %1393 = vrot.lane.b32.xlu0 %v1392_v1, %s4431_s21  ;;  %s4446_s21 = smov 92  }
 0x462   : > { %v5115_v29 = vpop.permute.xlu1 %1375 }
 0x463   : > { %v5103_v45 = vpop.permute.xlu0 %1373  ;;  %6414 = vst [vmem:[#allocation19_spill] sm:$0xff] %v5115_v29  ;;  %v4048_v29 = vld [vmem:[%s4580_s9 + $0x41] ss:$8 sm:$0x3] }
 0x464   : > { %6413 = vst [vmem:[#allocation18_spill] sm:$0xff] %v5103_v45 }
 0x467   : > { %v1394_v48 = vpop.permute.xlu0 %1393 }
 0x468   : > { %v1395_v46 = vrot.slane %v1394_v48, 4 }
 0x46a   : > { %v1396_v4 = vsel %vm1296_vm2, %v1395_v46, %v1394_v48  ;;  %v1400_v58 = vmul.f32 %v1395_v46, %v4678_v16  ;;  %vm2966_vm2 = vcmask 424960  }
 0x46b   : > { %v1399_v24 = vmul.f32 %v1396_v4, %v4603_v27 }
 0x46c   : > { %v4046_v50 = vrot.slane %v1400_v58, 11 }
 0x46d   : > { %v4045_v53 = vrot.slane %v1399_v24, 11 }
 0x46e   : > { %1409 = vrot.lane.b32.xlu0 %v4046_v50, %s4432_s22 }
 0x46f   : > { %1407 = vrot.lane.b32.xlu1 %v4045_v53, %s4432_s22  ;;  %s4447_s22 = smov 48  }
 0x472   : > { %1436 = vrot.lane.b32.xlu0 %v1435_v42, %s4433_s24 }
 0x473   : > { %1417 = vrot.lane.b32.xlu1 %v4612_v30, %s4433_s24 }
 0x4e0   : > { %v5117_v1 = vpop.permute.xlu0 %1409 }
 0x4e1   : > { %6415 = vst [vmem:[#allocation20_spill] sm:$0xff] %v5117_v1  ;;  %v5119_v4 = vpop.permute.xlu1 %1407 }
 0x4e2   : > { %6416 = vst [vmem:[#allocation21_spill] sm:$0xff] %v5119_v4  ;;  %v1466_v4 = vrot.slane %v4048_v29, %v4573_v10 }
 0x4e4   : > { %v1437_v48 = vpop.permute.xlu0 %1436 }
 0x4e5   : > { %v1418_v46 = vpop.permute.xlu1 %1417  ;;  %v1438_v58 = vrot.slane %v1437_v48, 4 }
 0x4e6   : > { %v1419_v24 = vrot.slane %v1418_v46, 4 }
 0x4e7   : > { %v1439_v42 = vsel %vm1420_vm3, %v1438_v58, %v1437_v48 }
 0x4e8   : > { %v1421_v53 = vsel %vm1420_vm3, %v1419_v24, %v1418_v46  ;;  %v1425_v37 = vmul.f32 %v1419_v24, %v4678_v16 }
 0x4e9   : > { %v1424_v50 = vmul.f32 %v1421_v53, %v4603_v27 }
 0x4ea   : > { %v1443_v45 = vmul.f32 %v1438_v58, %v1425_v37 }
 0x4eb   : > { %v1442_v56 = vmul.f32 %v1439_v42, %v1424_v50  ;;  %v4051_v42 = vld [vmem:[%s4580_s9 + $0x72] ss:$8 sm:$0x3] }
 0x4ec   : > { %1448 = vrot.lane.b32.xlu0 %v1443_v45, %s4434_s26  ;;  %v1500_v45 = vrot.slane %v4051_v42, %v4573_v10 }
 0x4ed   : > { %1446 = vrot.lane.b32.xlu1 %v1442_v56, %s4434_s26 }
 0x4f1   : > { %1467 = vrot.lane.b32.xlu1 %v1466_v4, %s4433_s24 }
 0x55e   : > { %v5138_v56 = vpop.permute.xlu0 %1448 }
 0x55f   : > { %v5130_v46 = vpop.permute.xlu1 %1446  ;;  %6418 = vst [vmem:[#allocation23_spill] sm:$0xff] %v5138_v56  ;;  %v4057_v56 = vld [vmem:[%s4580_s9 + $0x11] ss:$8 sm:$0x3] }
 0x560   : > { %6417 = vst [vmem:[#allocation22_spill] sm:$0xff] %v5130_v46  ;;  %v4054_v46 = vld [vmem:[%s4580_s9 + $0xa3] ss:$8 sm:$0x3] }
 0x563   : > { %v1468_v24 = vpop.permute.xlu1 %1467 }
 0x564   : > { %v1469_v1 = vrot.slane %v1468_v24, 4 }
 0x566   : > { %v1470_v53 = vsel %vm1420_vm3, %v1469_v1, %v1468_v24  ;;  %v1474_v48 = vmul.f32 %v1469_v1, %v1425_v37 }
 0x567   : > { %v1473_v57 = vmul.f32 %v1470_v53, %v1424_v50 }
 0x568   : > { %v4050_v58 = vrot.slane %v1474_v48, 9 }
 0x569   : > { %v4049_v62 = vrot.slane %v1473_v57, 9 }
 0x56a   : > { %1483 = vrot.lane.b32.xlu1 %v4050_v58, %s4434_s26 }
 0x56b   : > { %1481 = vrot.lane.b32.xlu0 %v4049_v62, %s4434_s26  ;;  %v1534_v62 = vrot.slane %v4054_v46, %v4573_v10 }
 0x56f   : > { %1501 = vrot.lane.b32.xlu0 %v1500_v45, %s4433_s24 }
 0x5dc   : > { %v5148_v42 = vpop.permute.xlu1 %1483 }
 0x5dd   : > { %v5140_v29 = vpop.permute.xlu0 %1481  ;;  %6420 = vst [vmem:[#allocation25_spill] sm:$0xff] %v5148_v42 }
 0x5de   : > { %6419 = vst [vmem:[#allocation24_spill] sm:$0xff] %v5140_v29 }
 0x5e1   : > { %v1502_v4 = vpop.permute.xlu0 %1501 }
 0x5e2   : > { %v1503_v24 = vrot.slane %v1502_v4, 4 }
 0x5e4   : > { %v1504_v1 = vsel %vm1420_vm3, %v1503_v24, %v1502_v4  ;;  %v1508_v53 = vmul.f32 %v1503_v24, %v1425_v37 }
 0x5e5   : > { %v1507_v48 = vmul.f32 %v1504_v1, %v1424_v50 }
 0x5e6   : > { %v4053_v57 = vrot.slane %v1508_v53, 10 }
 0x5e7   : > { %v4052_v58 = vrot.slane %v1507_v48, 10 }
 0x5e8   : > { %1517 = vrot.lane.b32.xlu0 %v4053_v57, %s4434_s26  ;;  %v1577_v57 = vrot.slane %v4057_v56, %v4573_v10 }
 0x5e9   : > { %1515 = vrot.lane.b32.xlu1 %v4052_v58, %s4434_s26 }
 0x5ed   : > { %1535 = vrot.lane.b32.xlu1 %v1534_v62, %s4433_s24  ;;  %s4448_s24 = smov 80  }
 0x65a   : > { %v5160_v46 = vpop.permute.xlu0 %1517 }
 0x65b   : > { %v5150_v45 = vpop.permute.xlu1 %1515  ;;  %6422 = vst [vmem:[#allocation27_spill] sm:$0xff] %v5160_v46 }
 0x65c   : > { %6421 = vst [vmem:[#allocation26_spill] sm:$0xff] %v5150_v45 }
 0x65f   : > { %v1536_v29 = vpop.permute.xlu1 %1535 }
 0x660   : > { %v1537_v4 = vrot.slane %v1536_v29, 4 }
 0x662   : > { %v1538_v24 = vsel %vm1420_vm3, %v1537_v4, %v1536_v29  ;;  %v1542_v1 = vmul.f32 %v1537_v4, %v1425_v37  ;;  %vm736_vm3 = vcmask 1022976  }
 0x663   : > { %v1541_v53 = vmul.f32 %v1538_v24, %v1424_v50 }
 0x664   : > { %v4056_v48 = vrot.slane %v1542_v1, 11 }
 0x665   : > { %v4055_v61 = vrot.slane %v1541_v53, 11 }
 0x666   : > { %1551 = vrot.lane.b32.xlu1 %v4056_v48, %s4434_s26  ;;  %v4058_v48 = vld [vmem:[%s4580_s9 + $0x42] ss:$8 sm:$0x3] }
 0x667   : > { %1549 = vrot.lane.b32.xlu0 %v4055_v61, %s4434_s26  ;;  %s4449_s26 = smov 49  }
 0x66a   : > { %1578 = vrot.lane.b32.xlu1 %v1577_v57, %s4435_s29 }
 0x66b   : > { %1559 = vrot.lane.b32.xlu0 %v4648_v54, %s4435_s29 }
 0x6d8   : > { %v5162_v37 = vpop.permute.xlu1 %1551 }
 0x6d9   : > { %6423 = vst [vmem:[#allocation28_spill] sm:$0xff] %v5162_v37  ;;  %v5164_v50 = vpop.permute.xlu0 %1549 }
 0x6da   : > { %6424 = vst [vmem:[#allocation29_spill] sm:$0xff] %v5164_v50  ;;  %v1608_v50 = vrot.slane %v4058_v48, %v4573_v10 }
 0x6dc   : > { %v1579_v29 = vpop.permute.xlu1 %1578 }
 0x6dd   : > { %v1560_v58 = vpop.permute.xlu0 %1559  ;;  %v1580_v62 = vrot.slane %v1579_v29, 4 }
 0x6de   : > { %v1561_v56 = vrot.slane %v1560_v58, 4 }
 0x6df   : > { %v1581_v1 = vsel %vm1562_vm4, %v1580_v62, %v1579_v29 }
 0x6e0   : > { %v1563_v61 = vsel %vm1562_vm4, %v1561_v56, %v1560_v58  ;;  %v1567_v4 = vmul.f32 %v1561_v56, %v4678_v16 }
 0x6e1   : > { %v1566_v24 = vmul.f32 %v1563_v61, %v4603_v27 }
 0x6e2   : > { %v1585_v53 = vmul.f32 %v1580_v62, %v1567_v4 }
 0x6e3   : > { %v1584_v57 = vmul.f32 %v1581_v1, %v1566_v24  ;;  %v4061_v1 = vld [vmem:[%s4580_s9 + $0x73] ss:$8 sm:$0x3] }
 0x6e4   : > { %1590 = vrot.lane.b32.xlu1 %v1585_v53, %s4436_s30  ;;  %v1642_v53 = vrot.slane %v4061_v1, %v4573_v10 }
 0x6e5   : > { %1588 = vrot.lane.b32.xlu0 %v1584_v57, %s4436_s30 }
 0x6e9   : > { %1609 = vrot.lane.b32.xlu0 %v1608_v50, %s4435_s29 }
 0x756   : > { %v5183_v50 = vpop.permute.xlu1 %1590 }
 0x757   : > { %v5175_v58 = vpop.permute.xlu0 %1588  ;;  %6426 = vst [vmem:[#allocation31_spill] sm:$0xff] %v5183_v50  ;;  %v4067_v50 = vld [vmem:[%s4580_s9 + $0x12] ss:$8 sm:$0x3] }
 0x758   : > { %6425 = vst [vmem:[#allocation30_spill] sm:$0xff] %v5175_v58  ;;  %v4064_v58 = vld [vmem:[%s4580_s9 + $0xa4] ss:$8 sm:$0x3] }
 0x75b   : > { %v1610_v56 = vpop.permute.xlu0 %1609 }
 0x75c   : > { %v1611_v37 = vrot.slane %v1610_v56, 4 }
 0x75e   : > { %v1612_v27 = vsel %vm1562_vm4, %v1611_v37, %v1610_v56  ;;  %v1616_v29 = vmul.f32 %v1611_v37, %v1567_v4 }
 0x75f   : > { %v1615_v61 = vmul.f32 %v1612_v27, %v1566_v24 }
 0x760   : > { %v4060_v62 = vrot.slane %v1616_v29, 9 }
 0x761   : > { %v4059_v45 = vrot.slane %v1615_v61, 9 }
 0x762   : > { %1625 = vrot.lane.b32.xlu0 %v4060_v62, %s4436_s30 }
 0x763   : > { %1623 = vrot.lane.b32.xlu1 %v4059_v45, %s4436_s30  ;;  %v1676_v45 = vrot.slane %v4064_v58, %v4573_v10 }
 0x767   : > { %1643 = vrot.lane.b32.xlu1 %v1642_v53, %s4435_s29 }
 0x7d4   : > { %v5193_v1 = vpop.permute.xlu0 %1625 }
 0x7d5   : > { %v5185_v48 = vpop.permute.xlu1 %1623  ;;  %6428 = vst [vmem:[#allocation33_spill] sm:$0xff] %v5193_v1 }
 0x7d6   : > { %6427 = vst [vmem:[#allocation32_spill] sm:$0xff] %v5185_v48 }
 0x7d9   : > { %v1644_v57 = vpop.permute.xlu1 %1643 }
 0x7da   : > { %v1645_v56 = vrot.slane %v1644_v57, 4 }
 0x7dc   : > { %v1646_v37 = vsel %vm1562_vm4, %v1645_v56, %v1644_v57  ;;  %v1650_v27 = vmul.f32 %v1645_v56, %v1567_v4 }
 0x7dd   : > { %v1649_v29 = vmul.f32 %v1646_v37, %v1566_v24 }
 0x7de   : > { %v4063_v61 = vrot.slane %v1650_v27, 10 }
 0x7df   : > { %v4062_v62 = vrot.slane %v1649_v29, 10 }
 0x7e0   : > { %1659 = vrot.lane.b32.xlu1 %v4063_v61, %s4436_s30  ;;  %v1719_v61 = vrot.slane %v4067_v50, %v4573_v10 }
 0x7e1   : > { %1657 = vrot.lane.b32.xlu0 %v4062_v62, %s4436_s30 }
 0x7e5   : > { %1677 = vrot.lane.b32.xlu0 %v1676_v45, %s4435_s29  ;;  %s4450_s29 = smov 79  }
 0x852   : > { %v5205_v58 = vpop.permute.xlu1 %1659 }
 0x853   : > { %v5195_v53 = vpop.permute.xlu0 %1657  ;;  %6430 = vst [vmem:[#allocation35_spill] sm:$0xff] %v5205_v58 }
 0x854   : > { %6429 = vst [vmem:[#allocation34_spill] sm:$0xff] %v5195_v53 }
 0x857   : > { %v1678_v48 = vpop.permute.xlu0 %1677 }
 0x858   : > { %v1679_v57 = vrot.slane %v1678_v48, 4 }
 0x85a   : > { %v1680_v56 = vsel %vm1562_vm4, %v1679_v57, %v1678_v48  ;;  %v1684_v37 = vmul.f32 %v1679_v57, %v1567_v4  ;;  %vm3108_vm4 = vcmask 523264  }
 0x85b   : > { %v1683_v27 = vmul.f32 %v1680_v56, %v1566_v24  ;;  %v5213_v56 = vld [vmem:[#allocation2] sm:$0xff] }
 0x85c   : > { %v4066_v29 = vrot.slane %v1684_v37, 11 }
 0x85d   : > { %v4065_v46 = vrot.slane %v1683_v27, 11 }
 0x85e   : > { %1693 = vrot.lane.b32.xlu0 %v4066_v29, %s4436_s30 }
 0x85f   : > { %1691 = vrot.lane.b32.xlu1 %v4065_v46, %s4436_s30  ;;  %s4451_s30 = smov 50  }
 0x862   : > { %1720 = vrot.lane.b32.xlu0 %v1719_v61, %s4437_s5  ;;  %v4068_v61 = vld [vmem:[%s4580_s9 + $0x43] ss:$8 sm:$0x3] }
 0x863   : > { %1701 = vrot.lane.b32.xlu1 %v4650_v55, %s4437_s5 }
 0x8d0   : > { %v5207_v4 = vpop.permute.xlu0 %1693 }
 0x8d1   : > { %6431 = vst [vmem:[#allocation36_spill] sm:$0xff] %v5207_v4  ;;  %v5209_v24 = vpop.permute.xlu1 %1691 }
 0x8d2   : > { %6432 = vst [vmem:[#allocation37_spill] sm:$0xff] %v5209_v24  ;;  %v1750_v24 = vrot.slane %v4068_v61, %v4573_v10 }
 0x8d4   : > { %v1721_v48 = vpop.permute.xlu0 %1720 }
 0x8d5   : > { %v1702_v62 = vpop.permute.xlu1 %1701  ;;  %v1722_v45 = vrot.slane %v1721_v48, 4 }
 0x8d6   : > { %v1703_v50 = vrot.slane %v1702_v62, 4 }
 0x8d7   : > { %v1723_v27 = vsel %vm1704_vm5, %v1722_v45, %v1721_v48 }
 0x8d8   : > { %v1705_v46 = vsel %vm1704_vm5, %v1703_v50, %v1702_v62  ;;  %v1709_v57 = vmul.f32 %v1703_v50, %v4678_v16 }
 0x8d9   : > { %v1708_v37 = vmul.f32 %v5213_v56, %v1705_v46 }
 0x8da   : > { %v1727_v29 = vmul.f32 %v1722_v45, %v1709_v57 }
 0x8db   : > { %v1726_v4 = vmul.f32 %v1723_v27, %v1708_v37  ;;  %v4071_v27 = vld [vmem:[%s4580_s9 + $0x74] ss:$8 sm:$0x3] }
 0x8dc   : > { %1732 = vrot.lane.b32.xlu0 %v1727_v29, %s4438_s6 }
 0x8dd   : > { %1730 = vrot.lane.b32.xlu1 %v1726_v4, %s4438_s6  ;;  %v1784_v4 = vrot.slane %v4071_v27, %v4573_v10 }
 0x8e1   : > { %1751 = vrot.lane.b32.xlu1 %v1750_v24, %s4437_s5 }
 0x94e   : > { %v5230_v24 = vpop.permute.xlu0 %1732 }
 0x94f   : > { %v5222_v16 = vpop.permute.xlu1 %1730  ;;  %6434 = vst [vmem:[#allocation39_spill] sm:$0xff] %v5230_v24  ;;  %v4077_v24 = vld [vmem:[%s4580_s9 + $0x13] ss:$8 sm:$0x3] }
 0x950   : > { %6433 = vst [vmem:[#allocation38_spill] sm:$0xff] %v5222_v16  ;;  %v4074_v16 = vld [vmem:[%s4580_s9 + $0xa5] ss:$8 sm:$0x3] }
 0x953   : > { %v1752_v62 = vpop.permute.xlu1 %1751 }
 0x954   : > { %v1753_v50 = vrot.slane %v1752_v62, 4 }
 0x956   : > { %v1754_v46 = vsel %vm1704_vm5, %v1753_v50, %v1752_v62  ;;  %v1758_v48 = vmul.f32 %v1753_v50, %v1709_v57 }
 0x957   : > { %v1757_v53 = vmul.f32 %v1754_v46, %v1708_v37 }
 0x958   : > { %v4070_v45 = vrot.slane %v1758_v48, 9 }
 0x959   : > { %v4069_v58 = vrot.slane %v1757_v53, 9 }
 0x95a   : > { %1767 = vrot.lane.b32.xlu1 %v4070_v45, %s4438_s6 }
 0x95b   : > { %1765 = vrot.lane.b32.xlu0 %v4069_v58, %s4438_s6  ;;  %v1818_v58 = vrot.slane %v4074_v16, %v4573_v10 }
 0x95f   : > { %1785 = vrot.lane.b32.xlu0 %v1784_v4, %s4437_s5 }
 0x9cc   : > { %v5240_v27 = vpop.permute.xlu1 %1767 }
 0x9cd   : > { %v5232_v29 = vpop.permute.xlu0 %1765  ;;  %6436 = vst [vmem:[#allocation41_spill] sm:$0xff] %v5240_v27 }
 0x9ce   : > { %6435 = vst [vmem:[#allocation40_spill] sm:$0xff] %v5232_v29 }
 0x9d1   : > { %v1786_v61 = vpop.permute.xlu0 %1785 }
 0x9d2   : > { %v1787_v62 = vrot.slane %v1786_v61, 4 }
 0x9d4   : > { %v1788_v50 = vsel %vm1704_vm5, %v1787_v62, %v1786_v61  ;;  %v1792_v46 = vmul.f32 %v1787_v62, %v1709_v57 }
 0x9d5   : > { %v1791_v48 = vmul.f32 %v1788_v50, %v1708_v37 }
 0x9d6   : > { %v4073_v53 = vrot.slane %v1792_v46, 10 }
 0x9d7   : > { %v4072_v45 = vrot.slane %v1791_v48, 10 }
 0x9d8   : > { %1801 = vrot.lane.b32.xlu0 %v4073_v53, %s4438_s6  ;;  %v1861_v53 = vrot.slane %v4077_v24, %v4573_v10 }
 0x9d9   : > { %1799 = vrot.lane.b32.xlu1 %v4072_v45, %s4438_s6 }
 0x9dd   : > { %1819 = vrot.lane.b32.xlu1 %v1818_v58, %s4437_s5  ;;  %s4452_s5 = smov 78  }
 0xa4a   : > { %v5252_v16 = vpop.permute.xlu0 %1801 }
 0xa4b   : > { %v5242_v4 = vpop.permute.xlu1 %1799  ;;  %6438 = vst [vmem:[#allocation43_spill] sm:$0xff] %v5252_v16 }
 0xa4c   : > { %6437 = vst [vmem:[#allocation42_spill] sm:$0xff] %v5242_v4 }
 0xa4f   : > { %v1820_v29 = vpop.permute.xlu1 %1819 }
 0xa50   : > { %v1821_v61 = vrot.slane %v1820_v29, 4 }
 0xa52   : > { %v1822_v62 = vsel %vm1704_vm5, %v1821_v61, %v1820_v29  ;;  %v1826_v50 = vmul.f32 %v1821_v61, %v1709_v57  ;;  %v5259_v61 = vld [vmem:[#allocation2 + $0x8] sm:$0xf]  ;;  %vm893_vm5 = vcmask 1014784  }
 0xa53   : > { %v1825_v46 = vmul.f32 %v1822_v62, %v1708_v37 }
 0xa54   : > { %v4076_v48 = vrot.slane %v1826_v50, 11 }
 0xa55   : > { %v4075_v1 = vrot.slane %v1825_v46, 11 }
 0xa56   : > { %1835 = vrot.lane.b32.xlu1 %v4076_v48, %s4438_s6 }
 0xa57   : > { %1833 = vrot.lane.b32.xlu0 %v4075_v1, %s4438_s6  ;;  %s4453_s6 = smov 51  }
 0xa5a   : > { %1862 = vrot.lane.b32.xlu1 %v1861_v53, %s4439_s7  ;;  %v4078_v53 = vld [vmem:[%s4580_s9 + $0x44] ss:$8 sm:$0x3] }
 0xa5b   : > { %1843 = vrot.lane.b32.xlu0 %v4584_v15, %s4439_s7 }
 0xac8   : > { %v5254_v57 = vpop.permute.xlu1 %1835 }
 0xac9   : > { %6439 = vst [vmem:[#allocation44_spill] sm:$0xff] %v5254_v57  ;;  %v5256_v37 = vpop.permute.xlu0 %1833 }
 0xaca   : > { %6440 = vst [vmem:[#allocation45_spill] sm:$0xff] %v5256_v37  ;;  %v1892_v37 = vrot.slane %v4078_v53, %v4573_v10 }
 0xacc   : > { %v1863_v29 = vpop.permute.xlu1 %1862 }
 0xacd   : > { %v1844_v45 = vpop.permute.xlu0 %1843  ;;  %v1864_v58 = vrot.slane %v1863_v29, 4 }
 0xace   : > { %v1845_v24 = vrot.slane %v1844_v45, 4 }
 0xacf   : > { %v1865_v46 = vsel %vm1846_vm6, %v1864_v58, %v1863_v29 }
 0xad0   : > { %v1847_v1 = vsel %vm1846_vm6, %v1845_v24, %v1844_v45  ;;  %v1851_v62 = vmul.f32 %v5259_v61, %v1845_v24 }
 0xad1   : > { %v1850_v50 = vmul.f32 %v5213_v56, %v1847_v1 }
 0xad2   : > { %v1869_v48 = vmul.f32 %v1864_v58, %v1851_v62 }
 0xad3   : > { %v1868_v57 = vmul.f32 %v1865_v46, %v1850_v50  ;;  %v4081_v46 = vld [vmem:[%s4580_s9 + $0x75] ss:$8 sm:$0x3] }
 0xad4   : > { %1874 = vrot.lane.b32.xlu1 %v1869_v48, %s4440_s8 }
 0xad5   : > { %1872 = vrot.lane.b32.xlu0 %v1868_v57, %s4440_s8  ;;  %v1926_v57 = vrot.slane %v4081_v46, %v4573_v10 }
 0xad9   : > { %1893 = vrot.lane.b32.xlu0 %v1892_v37, %s4439_s7 }
 0xb46   : > { %v5277_v37 = vpop.permute.xlu1 %1874 }
 0xb47   : > { %v5269_v45 = vpop.permute.xlu0 %1872  ;;  %6442 = vst [vmem:[#allocation47_spill] sm:$0xff] %v5277_v37  ;;  %v4087_v37 = vld [vmem:[%s4580_s9 + $0x14] ss:$8 sm:$0x3] }
 0xb48   : > { %6441 = vst [vmem:[#allocation46_spill] sm:$0xff] %v5269_v45  ;;  %v4084_v45 = vld [vmem:[%s4580_s9 + $0xa6] ss:$8 sm:$0x3] }
 0xb4b   : > { %v1894_v24 = vpop.permute.xlu0 %1893 }
 0xb4c   : > { %v1895_v4 = vrot.slane %v1894_v24, 4 }
 0xb4e   : > { %v1896_v1 = vsel %vm1846_vm6, %v1895_v4, %v1894_v24  ;;  %v1900_v29 = vmul.f32 %v1895_v4, %v1851_v62 }
 0xb4f   : > { %v1899_v16 = vmul.f32 %v1896_v1, %v1850_v50 }
 0xb50   : > { %v4080_v58 = vrot.slane %v1900_v29, 9 }
 0xb51   : > { %v4079_v27 = vrot.slane %v1899_v16, 9 }
 0xb52   : > { %1909 = vrot.lane.b32.xlu0 %v4080_v58, %s4440_s8 }
 0xb53   : > { %1907 = vrot.lane.b32.xlu1 %v4079_v27, %s4440_s8  ;;  %v1960_v27 = vrot.slane %v4084_v45, %v4573_v10  ;;  %v1994_v45 = vrot.slane %v4087_v37, %v4573_v10 }
 0xb57   : > { %1927 = vrot.lane.b32.xlu1 %v1926_v57, %s4439_s7 }
 0xbc4   : > { %v5287_v46 = vpop.permute.xlu0 %1909 }
 0xbc5   : > { %v5279_v48 = vpop.permute.xlu1 %1907  ;;  %6444 = vst [vmem:[#allocation49_spill] sm:$0xff] %v5287_v46 }
 0xbc6   : > { %6443 = vst [vmem:[#allocation48_spill] sm:$0xff] %v5279_v48 }
 0xbc9   : > { %v1928_v53 = vpop.permute.xlu1 %1927 }
 0xbca   : > { %v1929_v24 = vrot.slane %v1928_v53, 4 }
 0xbcc   : > { %v1930_v4 = vsel %vm1846_vm6, %v1929_v24, %v1928_v53  ;;  %v1934_v1 = vmul.f32 %v1929_v24, %v1851_v62 }
 0xbcd   : > { %v1933_v29 = vmul.f32 %v1930_v4, %v1850_v50 }
 0xbce   : > { %v4083_v16 = vrot.slane %v1934_v1, 10 }
 0xbcf   : > { %v4082_v58 = vrot.slane %v1933_v29, 10 }
 0xbd0   : > { %1943 = vrot.lane.b32.xlu1 %v4083_v16, %s4440_s8 }
 0xbd1   : > { %1941 = vrot.lane.b32.xlu0 %v4082_v58, %s4440_s8 }
 0xbd5   : > { %1961 = vrot.lane.b32.xlu0 %v1960_v27, %s4439_s7  ;;  %s4454_s7 = smov 52  }
 0xc42   : > { %v5297_v58 = vpop.permute.xlu1 %1943 }
 0xc43   : > { %v5289_v57 = vpop.permute.xlu0 %1941  ;;  %6446 = vst [vmem:[#allocation51_spill] sm:$0xff] %v5297_v58 }
 0xc44   : > { %6445 = vst [vmem:[#allocation50_spill] sm:$0xff] %v5289_v57 }
 0xc47   : > { %v1962_v48 = vpop.permute.xlu0 %1961 }
 0xc48   : > { %v1963_v53 = vrot.slane %v1962_v48, 4 }
 0xc4a   : > { %v1964_v24 = vsel %vm1846_vm6, %v1963_v53, %v1962_v48  ;;  %v1968_v4 = vmul.f32 %v1963_v53, %v1851_v62  ;;  %vm3249_vm6 = vcmask 531456  }
 0xc4b   : > { %v1967_v1 = vmul.f32 %v1964_v24, %v1850_v50  ;;  %v4088_v24 = vld [vmem:[%s4580_s9 + $0x45] ss:$8 sm:$0x3] }
 0xc4c   : > { %v4086_v29 = vrot.slane %v1968_v4, 11  ;;  %v2026_v37 = vrot.slane %v4088_v24, %v4573_v10 }
 0xc4d   : > { %v4085_v16 = vrot.slane %v1967_v1, 11 }
 0xc4e   : > { %1977 = vrot.lane.b32.xlu0 %v4086_v29, %s4440_s8 }
 0xc4f   : > { %1975 = vrot.lane.b32.xlu1 %v4085_v16, %s4440_s8  ;;  %s4455_s8 = smov 64  }
 0xc53   : > { %1995 = vrot.lane.b32.xlu1 %v1994_v45, %s4441_s10 }
 0xcc0   : > { %v5309_v1 = vpop.permute.xlu0 %1977 }
 0xcc1   : > { %v5299_v27 = vpop.permute.xlu1 %1975  ;;  %6448 = vst [vmem:[#allocation53_spill] sm:$0xff] %v5309_v1  ;;  %v4094_v1 = vld [vmem:[%s4580_s9 + $0xa7] ss:$8 sm:$0x3] }
 0xcc2   : > { %6447 = vst [vmem:[#allocation52_spill] sm:$0xff] %v5299_v27  ;;  %v4091_v27 = vld [vmem:[%s4580_s9 + $0x76] ss:$8 sm:$0x3] }
 0xcc3   : > { %v2060_v24 = vrot.slane %v4091_v27, %v4573_v10  ;;  %v2094_v27 = vrot.slane %v4094_v1, %v4573_v10 }
 0xcc5   : > { %v1996_v62 = vpop.permute.xlu1 %1995 }
 0xcc6   : > { %v1997_v50 = vrot.slane %v1996_v62, 4 }
 0xcc8   : > { %v1999_v48 = vsel %vm1998_vm7, %v1997_v50, %v1996_v62  ;;  %v2003_v53 = vmul.f32 %v5259_v61, %v1997_v50 }
 0xcc9   : > { %v2002_v4 = vmul.f32 %v5213_v56, %v1999_v48 }
 0xcca   : > { %2008 = vrot.lane.b32.xlu1 %v2003_v53, %s4442_s11 }
 0xccb   : > { %2006 = vrot.lane.b32.xlu0 %v2002_v4, %s4442_s11 }
 0xccf   : > { %2027 = vrot.lane.b32.xlu0 %v2026_v37, %s4441_s10 }
 0xd3c   : > { %v5321_v37 = vpop.permute.xlu1 %2008 }
 0xd3d   : > { %v5311_v29 = vpop.permute.xlu0 %2006  ;;  %6450 = vst [vmem:[#allocation55_spill] sm:$0xff] %v5321_v37 }
 0xd3e   : > { %6449 = vst [vmem:[#allocation54_spill] sm:$0xff] %v5311_v29 }
 0xd41   : > { %v2028_v16 = vpop.permute.xlu0 %2027 }
 0xd42   : > { %v2029_v45 = vrot.slane %v2028_v16, 4 }
 0xd44   : > { %v2030_v62 = vsel %vm1998_vm7, %v2029_v45, %v2028_v16  ;;  %v2034_v50 = vmul.f32 %v5259_v61, %v2029_v45 }
 0xd45   : > { %v2033_v48 = vmul.f32 %v5213_v56, %v2030_v62 }
 0xd46   : > { %v4090_v53 = vrot.slane %v2034_v50, 9 }
 0xd47   : > { %v4089_v4 = vrot.slane %v2033_v48, 9 }
 0xd48   : > { %2043 = vrot.lane.b32.xlu0 %v4090_v53, %s4442_s11 }
 0xd49   : > { %2041 = vrot.lane.b32.xlu1 %v4089_v4, %s4442_s11 }
 0xd4d   : > { %2061 = vrot.lane.b32.xlu1 %v2060_v24, %s4441_s10 }
 0xdba   : > { %v5333_v24 = vpop.permute.xlu0 %2043 }
 0xdbb   : > { %v5323_v29 = vpop.permute.xlu1 %2041  ;;  %6452 = vst [vmem:[#allocation57_spill] sm:$0xff] %v5333_v24 }
 0xdbc   : > { %6451 = vst [vmem:[#allocation56_spill] sm:$0xff] %v5323_v29 }
 0xdbf   : > { %v2062_v16 = vpop.permute.xlu1 %2061 }
 0xdc0   : > { %v2063_v45 = vrot.slane %v2062_v16, 4 }
 0xdc2   : > { %v2064_v62 = vsel %vm1998_vm7, %v2063_v45, %v2062_v16  ;;  %v2068_v50 = vmul.f32 %v5259_v61, %v2063_v45 }
 0xdc3   : > { %v2067_v48 = vmul.f32 %v5213_v56, %v2064_v62 }
 0xdc4   : > { %v4093_v53 = vrot.slane %v2068_v50, 10 }
 0xdc5   : > { %v4092_v4 = vrot.slane %v2067_v48, 10  ;;  %v4097_v48 = vld [vmem:[%s4580_s9 + $0x15] ss:$8 sm:$0x3] }
 0xdc6   : > { %2077 = vrot.lane.b32.xlu1 %v4093_v53, %s4442_s11  ;;  %v2137_v1 = vrot.slane %v4097_v48, %v4573_v10 }
 0xdc7   : > { %2075 = vrot.lane.b32.xlu0 %v4092_v4, %s4442_s11 }
 0xdcb   : > { %2095 = vrot.lane.b32.xlu0 %v2094_v27, %s4441_s10  ;;  %s4456_s10 = smov 65  }
 0xe38   : > { %v5347_v4 = vpop.permute.xlu1 %2077 }
 0xe39   : > { %v5335_v29 = vpop.permute.xlu0 %2075  ;;  %6454 = vst [vmem:[#allocation59_spill] sm:$0xff] %v5347_v4  ;;  %v4098_v4 = vld [vmem:[%s4580_s9 + $0x46] ss:$8 sm:$0x3] }
 0xe3a   : > { %6453 = vst [vmem:[#allocation58_spill] sm:$0xff] %v5335_v29 }
 0xe3d   : > { %v2096_v16 = vpop.permute.xlu0 %2095 }
 0xe3e   : > { %v2097_v45 = vrot.slane %v2096_v16, 4 }
 0xe40   : > { %v2098_v37 = vsel %vm1998_vm7, %v2097_v45, %v2096_v16  ;;  %v2102_v62 = vmul.f32 %v5259_v61, %v2097_v45  ;;  %vm1035_vm7 = vcmask 916480  }
 0xe41   : > { %v2101_v50 = vmul.f32 %v5213_v56, %v2098_v37 }
 0xe42   : > { %v4096_v53 = vrot.slane %v2102_v62, 11 }
 0xe43   : > { %v4095_v57 = vrot.slane %v2101_v50, 11 }
 0xe44   : > { %2111 = vrot.lane.b32.xlu0 %v4096_v53, %s4442_s11 }
 0xe45   : > { %2109 = vrot.lane.b32.xlu1 %v4095_v57, %s4442_s11  ;;  %s4457_s11 = smov 66  }
 0xe48   : > { %2138 = vrot.lane.b32.xlu0 %v2137_v1, %s4443_s12 }
 0xe49   : > { %2119 = vrot.lane.b32.xlu1 %v4612_v30, %s4443_s12 }
 0xeb6   : > { %v5349_v27 = vpop.permute.xlu0 %2111 }
 0xeb7   : > { %6455 = vst [vmem:[#allocation60_spill] sm:$0xff] %v5349_v27  ;;  %v5351_v37 = vpop.permute.xlu1 %2109 }
 0xeb8   : > { %6456 = vst [vmem:[#allocation61_spill] sm:$0xff] %v5351_v37  ;;  %v2168_v37 = vrot.slane %v4098_v4, %v4573_v10 }
 0xeba   : > { %v2139_v16 = vpop.permute.xlu0 %2138 }
 0xebb   : > { %v2120_v45 = vpop.permute.xlu1 %2119  ;;  %v2140_v62 = vrot.slane %v2139_v16, 4 }
 0xebc   : > { %v2121_v50 = vrot.slane %v2120_v45, 4 }
 0xebd   : > { %v2141_v1 = vsel %vm2122_vm8, %v2140_v62, %v2139_v16 }
 0xebe   : > { %v2123_v57 = vsel %vm2122_vm8, %v2121_v50, %v2120_v45  ;;  %v2127_v48 = vmul.f32 %v5259_v61, %v2121_v50 }
 0xebf   : > { %v2126_v53 = vmul.f32 %v5213_v56, %v2123_v57 }
 0xec0   : > { %v2145_v29 = vmul.f32 %v2140_v62, %v2127_v48 }
 0xec1   : > { %v2144_v24 = vmul.f32 %v2141_v1, %v2126_v53  ;;  %v4101_v1 = vld [vmem:[%s4580_s9 + $0x77] ss:$8 sm:$0x3] }
 0xec2   : > { %2150 = vrot.lane.b32.xlu0 %v2145_v29, %s4444_s13  ;;  %v2202_v29 = vrot.slane %v4101_v1, %v4573_v10 }
 0xec3   : > { %2148 = vrot.lane.b32.xlu1 %v2144_v24, %s4444_s13 }
 0xec7   : > { %2169 = vrot.lane.b32.xlu1 %v2168_v37, %s4443_s12 }
 0xf34   : > { %v5370_v24 = vpop.permute.xlu0 %2150 }
 0xf35   : > { %v5362_v45 = vpop.permute.xlu1 %2148  ;;  %6458 = vst [vmem:[#allocation63_spill] sm:$0xff] %v5370_v24  ;;  %v4107_v24 = vld [vmem:[%s4580_s9 + $0x16] ss:$8 sm:$0x3] }
 0xf36   : > { %6457 = vst [vmem:[#allocation62_spill] sm:$0xff] %v5362_v45  ;;  %v4104_v45 = vld [vmem:[%s4580_s9 + $0xb0] ss:$8 sm:$0x3] }
 0xf39   : > { %v2170_v50 = vpop.permute.xlu1 %2169 }
 0xf3a   : > { %v2171_v27 = vrot.slane %v2170_v50, 4 }
 0xf3c   : > { %v2172_v57 = vsel %vm2122_vm8, %v2171_v27, %v2170_v50  ;;  %v2176_v16 = vmul.f32 %v2171_v27, %v2127_v48 }
 0xf3d   : > { %v2175_v58 = vmul.f32 %v2172_v57, %v2126_v53 }
 0xf3e   : > { %v4100_v62 = vrot.slane %v2176_v16, 9 }
 0xf3f   : > { %v4099_v46 = vrot.slane %v2175_v58, 9 }
 0xf40   : > { %2185 = vrot.lane.b32.xlu1 %v4100_v62, %s4444_s13 }
 0xf41   : > { %2183 = vrot.lane.b32.xlu0 %v4099_v46, %s4444_s13  ;;  %v2236_v46 = vrot.slane %v4104_v45, %v4573_v10 }
 0xf45   : > { %2203 = vrot.lane.b32.xlu0 %v2202_v29, %s4443_s12 }
 0xfb2   : > { %v5380_v1 = vpop.permute.xlu1 %2185 }
 0xfb3   : > { %v5372_v4 = vpop.permute.xlu0 %2183  ;;  %6460 = vst [vmem:[#allocation65_spill] sm:$0xff] %v5380_v1 }
 0xfb4   : > { %6459 = vst [vmem:[#allocation64_spill] sm:$0xff] %v5372_v4 }
 0xfb7   : > { %v2204_v37 = vpop.permute.xlu0 %2203 }
 0xfb8   : > { %v2205_v50 = vrot.slane %v2204_v37, 4 }
 0xfba   : > { %v2206_v27 = vsel %vm2122_vm8, %v2205_v50, %v2204_v37  ;;  %v2210_v57 = vmul.f32 %v2205_v50, %v2127_v48 }
 0xfbb   : > { %v2209_v16 = vmul.f32 %v2206_v27, %v2126_v53 }
 0xfbc   : > { %v4103_v58 = vrot.slane %v2210_v57, 10 }
 0xfbd   : > { %v4102_v62 = vrot.slane %v2209_v16, 10 }
 0xfbe   : > { %2219 = vrot.lane.b32.xlu0 %v4103_v58, %s4444_s13  ;;  %v2279_v58 = vrot.slane %v4107_v24, %v4573_v10 }
 0xfbf   : > { %2217 = vrot.lane.b32.xlu1 %v4102_v62, %s4444_s13 }
 0xfc3   : > { %2237 = vrot.lane.b32.xlu1 %v2236_v46, %s4443_s12  ;;  %s4458_s12 = smov 67  }
0x1030   : > { %v5392_v45 = vpop.permute.xlu0 %2219 }
0x1031   : > { %v5382_v29 = vpop.permute.xlu1 %2217  ;;  %6462 = vst [vmem:[#allocation67_spill] sm:$0xff] %v5392_v45 }
0x1032   : > { %6461 = vst [vmem:[#allocation66_spill] sm:$0xff] %v5382_v29 }
0x1035   : > { %v2238_v4 = vpop.permute.xlu1 %2237 }
0x1036   : > { %v2239_v37 = vrot.slane %v2238_v4, 4 }
0x1038   : > { %v2240_v50 = vsel %vm2122_vm8, %v2239_v37, %v2238_v4  ;;  %v2244_v27 = vmul.f32 %v2239_v37, %v2127_v48  ;;  %vm1177_vm8 = vcmask 908288  }
0x1039   : > { %v2243_v57 = vmul.f32 %v2240_v50, %v2126_v53 }
0x103a   : > { %v4106_v16 = vrot.slane %v2244_v27, 11 }
0x103b   : > { %v4105_v42 = vrot.slane %v2243_v57, 11 }
0x103c   : > { %2253 = vrot.lane.b32.xlu1 %v4106_v16, %s4444_s13  ;;  %v4108_v16 = vld [vmem:[%s4580_s9 + $0x47] ss:$8 sm:$0x3] }
0x103d   : > { %2251 = vrot.lane.b32.xlu0 %v4105_v42, %s4444_s13  ;;  %s4459_s13 = smov 68  }
0x1040   : > { %2280 = vrot.lane.b32.xlu1 %v2279_v58, %s4445_s14 }
0x1041   : > { %2261 = vrot.lane.b32.xlu0 %v4648_v54, %s4445_s14 }
0x10ae   : > { %v5394_v48 = vpop.permute.xlu1 %2253 }
0x10af   : > { %6463 = vst [vmem:[#allocation68_spill] sm:$0xff] %v5394_v48  ;;  %v5396_v53 = vpop.permute.xlu0 %2251 }
0x10b0   : > { %6464 = vst [vmem:[#allocation69_spill] sm:$0xff] %v5396_v53  ;;  %v2310_v53 = vrot.slane %v4108_v16, %v4573_v10 }
0x10b2   : > { %v2281_v4 = vpop.permute.xlu1 %2280 }
0x10b3   : > { %v2262_v62 = vpop.permute.xlu0 %2261  ;;  %v2282_v46 = vrot.slane %v2281_v4, 4 }
0x10b4   : > { %v2263_v24 = vrot.slane %v2262_v62, 4 }
0x10b5   : > { %v2283_v27 = vsel %vm2264_vm9, %v2282_v46, %v2281_v4 }
0x10b6   : > { %v2265_v42 = vsel %vm2264_vm9, %v2263_v24, %v2262_v62  ;;  %v2269_v37 = vmul.f32 %v5259_v61, %v2263_v24 }
0x10b7   : > { %v2268_v50 = vmul.f32 %v5213_v56, %v2265_v42 }
0x10b8   : > { %v2287_v57 = vmul.f32 %v2282_v46, %v2269_v37 }
0x10b9   : > { %v2286_v58 = vmul.f32 %v2283_v27, %v2268_v50  ;;  %v4111_v27 = vld [vmem:[%s4580_s9 + $0x80] ss:$8 sm:$0x3] }
0x10ba   : > { %2292 = vrot.lane.b32.xlu1 %v2287_v57, %s4446_s21  ;;  %v2344_v57 = vrot.slane %v4111_v27, %v4573_v10 }
0x10bb   : > { %2290 = vrot.lane.b32.xlu0 %v2286_v58, %s4446_s21 }
0x10bf   : > { %2311 = vrot.lane.b32.xlu0 %v2310_v53, %s4445_s14 }
0x112c   : > { %v5415_v53 = vpop.permute.xlu1 %2292 }
0x112d   : > { %v5407_v62 = vpop.permute.xlu0 %2290  ;;  %6466 = vst [vmem:[#allocation71_spill] sm:$0xff] %v5415_v53  ;;  %v4117_v53 = vld [vmem:[%s4580_s9 + $0x17] ss:$8 sm:$0x3] }
0x112e   : > { %6465 = vst [vmem:[#allocation70_spill] sm:$0xff] %v5407_v62  ;;  %v4114_v62 = vld [vmem:[%s4580_s9 + $0xb1] ss:$8 sm:$0x3] }
0x1131   : > { %v2312_v24 = vpop.permute.xlu0 %2311 }
0x1132   : > { %v2313_v48 = vrot.slane %v2312_v24, 4 }
0x1134   : > { %v2314_v42 = vsel %vm2264_vm9, %v2313_v48, %v2312_v24  ;;  %v2318_v4 = vmul.f32 %v2313_v48, %v2269_v37 }
0x1135   : > { %v2317_v29 = vmul.f32 %v2314_v42, %v2268_v50 }
0x1136   : > { %v4110_v46 = vrot.slane %v2318_v4, 9 }
0x1137   : > { %v4109_v45 = vrot.slane %v2317_v29, 9 }
0x1138   : > { %2327 = vrot.lane.b32.xlu0 %v4110_v46, %s4446_s21 }
0x1139   : > { %2325 = vrot.lane.b32.xlu1 %v4109_v45, %s4446_s21  ;;  %v2378_v45 = vrot.slane %v4114_v62, %v4573_v10 }
0x113d   : > { %2345 = vrot.lane.b32.xlu1 %v2344_v57, %s4445_s14 }
0x11aa   : > { %v5425_v27 = vpop.permute.xlu0 %2327 }
0x11ab   : > { %v5417_v16 = vpop.permute.xlu1 %2325  ;;  %6468 = vst [vmem:[#allocation73_spill] sm:$0xff] %v5425_v27 }
0x11ac   : > { %6467 = vst [vmem:[#allocation72_spill] sm:$0xff] %v5417_v16 }
0x11af   : > { %v2346_v58 = vpop.permute.xlu1 %2345 }
0x11b0   : > { %v2347_v24 = vrot.slane %v2346_v58, 4 }
0x11b2   : > { %v2348_v48 = vsel %vm2264_vm9, %v2347_v24, %v2346_v58  ;;  %v2352_v42 = vmul.f32 %v2347_v24, %v2269_v37 }
0x11b3   : > { %v2351_v4 = vmul.f32 %v2348_v48, %v2268_v50 }
0x11b4   : > { %v4113_v29 = vrot.slane %v2352_v42, 10 }
0x11b5   : > { %v4112_v46 = vrot.slane %v2351_v4, 10 }
0x11b6   : > { %2361 = vrot.lane.b32.xlu1 %v4113_v29, %s4446_s21  ;;  %v2421_v29 = vrot.slane %v4117_v53, %v4573_v10 }
0x11b7   : > { %2359 = vrot.lane.b32.xlu0 %v4112_v46, %s4446_s21 }
0x11bb   : > { %2379 = vrot.lane.b32.xlu0 %v2378_v45, %s4445_s14  ;;  %s4461_s14 = smov 76  }
0x1228   : > { %v5437_v62 = vpop.permute.xlu1 %2361 }
0x1229   : > { %v5427_v57 = vpop.permute.xlu0 %2359  ;;  %6470 = vst [vmem:[#allocation75_spill] sm:$0xff] %v5437_v62 }
0x122a   : > { %6469 = vst [vmem:[#allocation74_spill] sm:$0xff] %v5427_v57 }
0x122d   : > { %v2380_v16 = vpop.permute.xlu0 %2379 }
0x122e   : > { %v2381_v58 = vrot.slane %v2380_v16, 4 }
0x1230   : > { %v2382_v24 = vsel %vm2264_vm9, %v2381_v58, %v2380_v16  ;;  %v2386_v48 = vmul.f32 %v2381_v58, %v2269_v37  ;;  %vm3401_vm9 = vcmask 539648  }
0x1231   : > { %v2385_v42 = vmul.f32 %v2382_v24, %v2268_v50 }
0x1232   : > { %v4116_v4 = vrot.slane %v2386_v48, 11 }
0x1233   : > { %v4115_v1 = vrot.slane %v2385_v42, 11 }
0x1234   : > { %2395 = vrot.lane.b32.xlu0 %v4116_v4, %s4446_s21  ;;  %v4118_v4 = vld [vmem:[%s4580_s9 + $0x50] ss:$8 sm:$0x3] }
0x1235   : > { %2393 = vrot.lane.b32.xlu1 %v4115_v1, %s4446_s21  ;;  %s4462_s21 = smov 63  }
0x1238   : > { %2422 = vrot.lane.b32.xlu0 %v2421_v29, %s4447_s22 }
0x1239   : > { %2403 = vrot.lane.b32.xlu1 %v4650_v55, %s4447_s22 }
0x12a6   : > { %v5439_v37 = vpop.permute.xlu0 %2395 }
0x12a7   : > { %6471 = vst [vmem:[#allocation76_spill] sm:$0xff] %v5439_v37  ;;  %v5441_v50 = vpop.permute.xlu1 %2393 }
0x12a8   : > { %6472 = vst [vmem:[#allocation77_spill] sm:$0xff] %v5441_v50  ;;  %v2452_v50 = vrot.slane %v4118_v4, %v4573_v10 }
0x12aa   : > { %v2423_v16 = vpop.permute.xlu0 %2422 }
0x12ab   : > { %v2404_v46 = vpop.permute.xlu1 %2403  ;;  %v2424_v45 = vrot.slane %v2423_v16, 4 }
0x12ac   : > { %v2405_v53 = vrot.slane %v2404_v46, 4 }
0x12ad   : > { %v2425_v48 = vsel %vm2406_vm10, %v2424_v45, %v2423_v16 }
0x12ae   : > { %v2407_v1 = vsel %vm2406_vm10, %v2405_v53, %v2404_v46  ;;  %v2411_v58 = vmul.f32 %v5259_v61, %v2405_v53 }
0x12af   : > { %v2410_v24 = vmul.f32 %v5213_v56, %v2407_v1 }
0x12b0   : > { %v2429_v42 = vmul.f32 %v2424_v45, %v2411_v58 }
0x12b1   : > { %v2428_v29 = vmul.f32 %v2425_v48, %v2410_v24  ;;  %v4121_v48 = vld [vmem:[%s4580_s9 + $0x81] ss:$8 sm:$0x3] }
0x12b2   : > { %2434 = vrot.lane.b32.xlu0 %v2429_v42, %s4448_s24  ;;  %v2486_v42 = vrot.slane %v4121_v48, %v4573_v10 }
0x12b3   : > { %2432 = vrot.lane.b32.xlu1 %v2428_v29, %s4448_s24 }
0x12b7   : > { %2453 = vrot.lane.b32.xlu1 %v2452_v50, %s4447_s22 }
0x1324   : > { %v5460_v50 = vpop.permute.xlu0 %2434 }
0x1325   : > { %v5452_v46 = vpop.permute.xlu1 %2432  ;;  %6474 = vst [vmem:[#allocation79_spill] sm:$0xff] %v5460_v50  ;;  %v4127_v50 = vld [vmem:[%s4580_s9 + $0x20] ss:$8 sm:$0x3] }
0x1326   : > { %6473 = vst [vmem:[#allocation78_spill] sm:$0xff] %v5452_v46  ;;  %v4124_v46 = vld [vmem:[%s4580_s9 + $0xb2] ss:$8 sm:$0x3] }
0x1329   : > { %v2454_v53 = vpop.permute.xlu1 %2453 }
0x132a   : > { %v2455_v37 = vrot.slane %v2454_v53, 4 }
0x132c   : > { %v2456_v1 = vsel %vm2406_vm10, %v2455_v37, %v2454_v53  ;;  %v2460_v16 = vmul.f32 %v2455_v37, %v2411_v58 }
0x132d   : > { %v2459_v57 = vmul.f32 %v2456_v1, %v2410_v24 }
0x132e   : > { %v4120_v45 = vrot.slane %v2460_v16, 9 }
0x132f   : > { %v4119_v62 = vrot.slane %v2459_v57, 9 }
0x1330   : > { %2469 = vrot.lane.b32.xlu1 %v4120_v45, %s4448_s24 }
0x1331   : > { %2467 = vrot.lane.b32.xlu0 %v4119_v62, %s4448_s24  ;;  %v2520_v62 = vrot.slane %v4124_v46, %v4573_v10 }
0x1335   : > { %2487 = vrot.lane.b32.xlu0 %v2486_v42, %s4447_s22 }
0x13a2   : > { %v5470_v48 = vpop.permute.xlu1 %2469 }
0x13a3   : > { %v5462_v4 = vpop.permute.xlu0 %2467 }
0x13a4   : > { %6475 = vst [vmem:[#allocation80_spill] sm:$0xff] %v5462_v4 }
0x13a7   : > { %v2488_v29 = vpop.permute.xlu0 %2487 }
0x13a8   : > { %v2489_v53 = vrot.slane %v2488_v29, 4 }
0x13aa   : > { %v2490_v37 = vsel %vm2406_vm10, %v2489_v53, %v2488_v29  ;;  %v2494_v1 = vmul.f32 %v2489_v53, %v2411_v58 }
0x13ab   : > { %v2493_v16 = vmul.f32 %v2490_v37, %v2410_v24 }
0x13ac   : > { %v4123_v57 = vrot.slane %v2494_v1, 10 }
0x13ad   : > { %v4122_v45 = vrot.slane %v2493_v16, 10 }
0x13ae   : > { %2503 = vrot.lane.b32.xlu0 %v4123_v57, %s4448_s24  ;;  %v2563_v57 = vrot.slane %v4127_v50, %v4573_v10 }
0x13af   : > { %2501 = vrot.lane.b32.xlu1 %v4122_v45, %s4448_s24 }
0x13b3   : > { %2521 = vrot.lane.b32.xlu1 %v2520_v62, %s4447_s22  ;;  %s4463_s22 = smov 62  }
0x1420   : > { %v5482_v46 = vpop.permute.xlu0 %2503 }
0x1421   : > { %v5472_v42 = vpop.permute.xlu1 %2501  ;;  %6477 = vst [vmem:[#allocation82_spill] sm:$0xff] %v5482_v46 }
0x1422   : > { %6476 = vst [vmem:[#allocation81_spill] sm:$0xff] %v5472_v42 }
0x1425   : > { %v2522_v4 = vpop.permute.xlu1 %2521 }
0x1426   : > { %v2523_v29 = vrot.slane %v2522_v4, 4 }
0x1428   : > { %v2524_v53 = vsel %vm2406_vm10, %v2523_v29, %v2522_v4  ;;  %v2528_v37 = vmul.f32 %v2523_v29, %v2411_v58  ;;  %vm1311_vm10 = vcmask 900096  }
0x1429   : > { %v2527_v1 = vmul.f32 %v2524_v53, %v2410_v24 }
0x142a   : > { %v4126_v16 = vrot.slane %v2528_v37, 11 }
0x142b   : > { %v4125_v27 = vrot.slane %v2527_v1, 11 }
0x142c   : > { %2537 = vrot.lane.b32.xlu1 %v4126_v16, %s4448_s24  ;;  %v4128_v16 = vld [vmem:[%s4580_s9 + $0x51] ss:$8 sm:$0x3] }
0x142d   : > { %2535 = vrot.lane.b32.xlu0 %v4125_v27, %s4448_s24  ;;  %s4464_s24 = smov 61  }
0x1430   : > { %2564 = vrot.lane.b32.xlu1 %v2563_v57, %s4449_s26 }
0x1431   : > { %2545 = vrot.lane.b32.xlu0 %v4584_v15, %s4449_s26 }
0x149e   : > { %v5484_v58 = vpop.permute.xlu1 %2537 }
0x149f   : > { %6478 = vst [vmem:[#allocation83_spill] sm:$0xff] %v5484_v58  ;;  %v5486_v24 = vpop.permute.xlu0 %2535 }
0x14a0   : > { %6479 = vst [vmem:[#allocation84_spill] sm:$0xff] %v5486_v24  ;;  %v2594_v24 = vrot.slane %v4128_v16, %v4573_v10 }
0x14a2   : > { %v2565_v4 = vpop.permute.xlu1 %2564 }
0x14a3   : > { %v2546_v45 = vpop.permute.xlu0 %2545  ;;  %v2566_v62 = vrot.slane %v2565_v4, 4 }
0x14a4   : > { %v2547_v50 = vrot.slane %v2546_v45, 4 }
0x14a5   : > { %v2567_v37 = vsel %vm2548_vm11, %v2566_v62, %v2565_v4 }
0x14a6   : > { %v2549_v27 = vsel %vm2548_vm11, %v2547_v50, %v2546_v45  ;;  %v2553_v29 = vmul.f32 %v5259_v61, %v2547_v50 }
0x14a7   : > { %v2552_v53 = vmul.f32 %v5213_v56, %v2549_v27 }
0x14a8   : > { %v2571_v1 = vmul.f32 %v2566_v62, %v2553_v29 }
0x14a9   : > { %v2570_v57 = vmul.f32 %v2567_v37, %v2552_v53  ;;  %v4131_v37 = vld [vmem:[%s4580_s9 + $0x82] ss:$8 sm:$0x3] }
0x14aa   : > { %2576 = vrot.lane.b32.xlu1 %v2571_v1, %s4450_s29  ;;  %v2628_v1 = vrot.slane %v4131_v37, %v4573_v10 }
0x14ab   : > { %2574 = vrot.lane.b32.xlu0 %v2570_v57, %s4450_s29 }
0x14af   : > { %2595 = vrot.lane.b32.xlu0 %v2594_v24, %s4449_s26 }
0x151c   : > { %v5505_v24 = vpop.permute.xlu1 %2576 }
0x151d   : > { %v5497_v45 = vpop.permute.xlu0 %2574  ;;  %6481 = vst [vmem:[#allocation86_spill] sm:$0xff] %v5505_v24  ;;  %v4137_v24 = vld [vmem:[%s4580_s9 + $0x21] ss:$8 sm:$0x3] }
0x151e   : > { %6480 = vst [vmem:[#allocation85_spill] sm:$0xff] %v5497_v45  ;;  %v4134_v45 = vld [vmem:[%s4580_s9 + $0xb3] ss:$8 sm:$0x3] }
0x1521   : > { %v2596_v50 = vpop.permute.xlu0 %2595 }
0x1522   : > { %v2597_v58 = vrot.slane %v2596_v50, 4 }
0x1524   : > { %v2598_v27 = vsel %vm2548_vm11, %v2597_v58, %v2596_v50  ;;  %v2602_v4 = vmul.f32 %v2597_v58, %v2553_v29 }
0x1525   : > { %v2601_v42 = vmul.f32 %v2598_v27, %v2552_v53 }
0x1526   : > { %v4130_v62 = vrot.slane %v2602_v4, 9 }
0x1527   : > { %v4129_v46 = vrot.slane %v2601_v42, 9 }
0x1528   : > { %2611 = vrot.lane.b32.xlu0 %v4130_v62, %s4450_s29 }
0x1529   : > { %2609 = vrot.lane.b32.xlu1 %v4129_v46, %s4450_s29  ;;  %v2662_v46 = vrot.slane %v4134_v45, %v4573_v10  ;;  %v2696_v45 = vrot.slane %v4137_v24, %v4573_v10 }
0x152d   : > { %2629 = vrot.lane.b32.xlu1 %v2628_v1, %s4449_s26 }
0x159a   : > { %v5515_v37 = vpop.permute.xlu0 %2611 }
0x159b   : > { %v5507_v16 = vpop.permute.xlu1 %2609 }
0x159c   : > { %6482 = vst [vmem:[#allocation87_spill] sm:$0xff] %v5507_v16 }
0x159f   : > { %v2630_v57 = vpop.permute.xlu1 %2629 }
0x15a0   : > { %v2631_v50 = vrot.slane %v2630_v57, 4 }
0x15a2   : > { %v2632_v58 = vsel %vm2548_vm11, %v2631_v50, %v2630_v57  ;;  %v2636_v27 = vmul.f32 %v2631_v50, %v2553_v29 }
0x15a3   : > { %v2635_v4 = vmul.f32 %v2632_v58, %v2552_v53 }
0x15a4   : > { %v4133_v42 = vrot.slane %v2636_v27, 10 }
0x15a5   : > { %v4132_v62 = vrot.slane %v2635_v4, 10 }
0x15a6   : > { %2645 = vrot.lane.b32.xlu1 %v4133_v42, %s4450_s29 }
0x15a7   : > { %2643 = vrot.lane.b32.xlu0 %v4132_v62, %s4450_s29 }
0x15ab   : > { %2663 = vrot.lane.b32.xlu0 %v2662_v46, %s4449_s26  ;;  %s4465_s26 = smov 60  }
0x1618   : > { %v5525_v62 = vpop.permute.xlu1 %2645 }
0x1619   : > { %v5517_v1 = vpop.permute.xlu0 %2643  ;;  %6484 = vst [vmem:[#allocation89_spill] sm:$0xff] %v5525_v62 }
0x161a   : > { %6483 = vst [vmem:[#allocation88_spill] sm:$0xff] %v5517_v1 }
0x161d   : > { %v2664_v16 = vpop.permute.xlu0 %2663 }
0x161e   : > { %v2665_v57 = vrot.slane %v2664_v16, 4 }
0x1620   : > { %v2666_v50 = vsel %vm2548_vm11, %v2665_v57, %v2664_v16  ;;  %v2670_v58 = vmul.f32 %v2665_v57, %v2553_v29  ;;  %vm3525_vm11 = vcmask 547840  }
0x1621   : > { %v2669_v27 = vmul.f32 %v2666_v50, %v2552_v53  ;;  %v4138_v50 = vld [vmem:[%s4580_s9 + $0x52] ss:$8 sm:$0x3] }
0x1622   : > { %v4136_v4 = vrot.slane %v2670_v58, 11  ;;  %v2728_v24 = vrot.slane %v4138_v50, %v4573_v10  ;;  %v4141_v50 = vld [vmem:[%s4580_s9 + $0x83] ss:$8 sm:$0x3] }
0x1623   : > { %v4135_v42 = vrot.slane %v2669_v27, 11 }
0x1624   : > { %2679 = vrot.lane.b32.xlu0 %v4136_v4, %s4450_s29 }
0x1625   : > { %2677 = vrot.lane.b32.xlu1 %v4135_v42, %s4450_s29  ;;  %s270_s29 = sand.u32 1, %s4399_s16  }
0x1629   : > { %2697 = vrot.lane.b32.xlu1 %v2696_v45, %s4451_s30 }
0x1696   : > { %v5537_v27 = vpop.permute.xlu0 %2679 }
0x1697   : > { %v5527_v46 = vpop.permute.xlu1 %2677  ;;  %6486 = vst [vmem:[#allocation91_spill] sm:$0xff] %v5537_v27  ;;  %v441_v27 = vrot.slane %v5009_v2, 4 }
0x1698   : > { %6485 = vst [vmem:[#allocation90_spill] sm:$0xff] %v5527_v46 }
0x169b   : > { %v2698_v29 = vpop.permute.xlu1 %2697 }
0x169c   : > { %v2699_v53 = vrot.slane %v2698_v29, 4 }
0x169e   : > { %v2701_v16 = vsel %vm2700_vm12, %v2699_v53, %v2698_v29  ;;  %v2705_v57 = vmul.f32 %v5259_v61, %v2699_v53 }
0x169f   : > { %v2704_v58 = vmul.f32 %v5213_v56, %v2701_v16 }
0x16a0   : > { %2710 = vrot.lane.b32.xlu1 %v2705_v57, %s4452_s5  ;;  %v4144_v57 = vld [vmem:[%s4580_s9 + $0xb4] ss:$8 sm:$0x3] }
0x16a1   : > { %2708 = vrot.lane.b32.xlu0 %v2704_v58, %s4452_s5 }
0x16a5   : > { %2729 = vrot.lane.b32.xlu0 %v2728_v24, %s4451_s30  ;;  %v2796_v24 = vrot.slane %v4144_v57, %v4573_v10  ;;  %v4158_v57 = vld [vmem:[%s4580_s9 + $0x54] ss:$8 sm:$0x3] }
0x1713   : > { %v5539_v4 = vpop.permute.xlu0 %2708 }
0x1714   : > { %6487 = vst [vmem:[#allocation92_spill] sm:$0xff] %v5539_v4  ;;  %v2762_v4 = vrot.slane %v4141_v50, %v4573_v10 }
0x1717   : > { %v2730_v42 = vpop.permute.xlu0 %2729 }
0x1718   : > { %v2731_v45 = vrot.slane %v2730_v42, 4 }
0x171a   : > { %v2732_v29 = vsel %vm2700_vm12, %v2731_v45, %v2730_v42  ;;  %v2736_v53 = vmul.f32 %v5259_v61, %v2731_v45  ;;  %v4147_v42 = vld [vmem:[%s4580_s9 + $0x22] ss:$8 sm:$0x3]  ;;  %v4151_v61 = vld [vmem:[%s4580_s9 + $0x84] ss:$8 sm:$0x3] }
0x171b   : > { %v2735_v16 = vmul.f32 %v5213_v56, %v2732_v29  ;;  %v2839_v56 = vrot.slane %v4147_v42, %v4573_v10  ;;  %v4148_v45 = vld [vmem:[%s4580_s9 + $0x53] ss:$8 sm:$0x3]  ;;  %v2904_v29 = vrot.slane %v4151_v61, %v4573_v10  ;;  %v4161_v42 = vld [vmem:[%s4580_s9 + $0x85] ss:$8 sm:$0x3] }
0x171c   : > { %v4140_v58 = vrot.slane %v2736_v53, 9  ;;  %v4154_v53 = vld [vmem:[%s4580_s9 + $0xb5] ss:$8 sm:$0x3]  ;;  %v3046_v61 = vrot.slane %v4161_v42, %v4573_v10 }
0x171d   : > { %v4139_v46 = vrot.slane %v2735_v16, 9  ;;  %v2938_v16 = vrot.slane %v4154_v53, %v4573_v10  ;;  %v4168_v53 = vld [vmem:[%s4580_s9 + $0x55] ss:$8 sm:$0x3] }
0x171e   : > { %2745 = vrot.lane.b32.xlu0 %v4140_v58, %s4452_s5  ;;  %v3012_v58 = vrot.slane %v4158_v57, %v4573_v10  ;;  %v3153_v57 = vrot.slane %v4168_v53, %v4573_v10  ;;  %v4188_v53 = vld [vmem:[%s4580_s9 + $0x57] ss:$8 sm:$0x3] }
0x171f   : > { %2743 = vrot.lane.b32.xlu1 %v4139_v46, %s4452_s5  ;;  %v2870_v46 = vrot.slane %v4148_v45, %v4573_v10  ;;  %v4167_v45 = vld [vmem:[%s4580_s9 + $0x24] ss:$8 sm:$0x3] }
0x1722   : > { %2797 = vrot.lane.b32.xlu0 %v2796_v24, %s4451_s30  ;;  %v4164_v24 = vld [vmem:[%s4580_s9 + $0xb6] ss:$8 sm:$0x3] }
0x1723   : > { %2763 = vrot.lane.b32.xlu1 %v2762_v4, %s4451_s30  ;;  %v4157_v4 = vld [vmem:[%s4580_s9 + $0x23] ss:$8 sm:$0x3]  ;;  %s3961_s30 = sshll.u32 %s270_s29, 1 }
0x1724   : > { %v2981_v50 = vrot.slane %v4157_v4, %v4573_v10  ;;  %v4174_v4 = vld [vmem:[%s4580_s9 + $0xb7] ss:$8 sm:$0x3] }
0x1726   : > { %2840 = vrot.lane.b32.xlu0 %v2839_v56, %s4453_s6  ;;  %v3080_v56 = vrot.slane %v4164_v24, %v4573_v10  ;;  %v4177_v24 = vld [vmem:[%s4580_s9 + $0x25] ss:$8 sm:$0x3] }
0x1727   : > { %2821 = vrot.lane.b32.xlu1 %v4612_v30, %s4453_s6 }
0x172a   : > { %2905 = vrot.lane.b32.xlu0 %v2904_v29, %s4453_s6  ;;  %v3123_v29 = vrot.slane %v4167_v45, %v4573_v10  ;;  %v4181_v45 = vld [vmem:[%s4580_s9 + $0x87] ss:$8 sm:$0x3] }
0x172b   : > { %2871 = vrot.lane.b32.xlu1 %v2870_v46, %s4453_s6  ;;  %v4171_v46 = vld [vmem:[%s4580_s9 + $0x86] ss:$8 sm:$0x3] }
0x172e   : > { %2963 = vrot.lane.b32.xlu0 %v4648_v54, %s4454_s7 }
0x172f   : > { %2939 = vrot.lane.b32.xlu1 %v2938_v16, %s4453_s6  ;;  %v3187_v16 = vrot.slane %v4171_v46, %v4573_v10  ;;  %v3329_v46 = vrot.slane %v4181_v45, %v4573_v10  ;;  %v4198_v45 = vld [vmem:[%s4580_s9 + $0x60] ss:$8 sm:$0x3]  ;;  %s272_s6 = scalar_lea.vmem [#allocation3], %s3961_s30 }
0x1732   : > { %3013 = vrot.lane.b32.xlu0 %v3012_v58, %s4454_s7  ;;  %v3221_v58 = vrot.slane %v4174_v4, %v4573_v10  ;;  %v4194_v4 = vld [vmem:[%s4580_s9 + $0xc1] ss:$8 sm:$0x3] }
0x1733   : > { %2982 = vrot.lane.b32.xlu1 %v2981_v50, %s4454_s7  ;;  %v4178_v50 = vld [vmem:[%s4580_s9 + $0x56] ss:$8 sm:$0x3] }
0x1734   : > { %v3295_v42 = vrot.slane %v4178_v50, %v4573_v10  ;;  %v3497_v50 = vrot.slane %v4194_v4, %v4573_v10 }
0x1736   : > { %3081 = vrot.lane.b32.xlu0 %v3080_v56, %s4454_s7  ;;  %v3264_v56 = vrot.slane %v4177_v24, %v4573_v10 }
0x1737   : > { %3047 = vrot.lane.b32.xlu1 %v3046_v61, %s4454_s7  ;;  %v4184_v61 = vld [vmem:[%s4580_s9 + $0xc0] ss:$8 sm:$0x3]  ;;  %s3844_s7 = sshll.u32 %s272_s6, 4  ;;  %s6303_s7 = int_to_ptr.vmem [resolvable:$true] %s3844_s7 }
0x173a   : > { %3124 = vrot.lane.b32.xlu0 %v3123_v29, %s4455_s8  ;;  %v3363_v29 = vrot.slane %v4184_v61, %v4573_v10  ;;  %v4201_v61 = vld [vmem:[%s4580_s9 + $0x91] ss:$8 sm:$0x3] }
0x173b   : > { %3105 = vrot.lane.b32.xlu1 %v4650_v55, %s4455_s8 }
0x173e   : > { %3188 = vrot.lane.b32.xlu0 %v3187_v16, %s4455_s8  ;;  %v4187_v16 = vld [vmem:[%s4580_s9 + $0x26] ss:$8 sm:$0x3] }
0x173f   : > { %3154 = vrot.lane.b32.xlu1 %v3153_v57, %s4455_s8  ;;  %v3397_v57 = vrot.slane %v4187_v16, %v4573_v10 }
0x1742   : > { %3246 = vrot.lane.b32.xlu0 %v4584_v15, %s4456_s10  ;;  %v3429_v15 = vrot.slane %v4188_v53, %v4573_v10  ;;  %v4204_v53 = vld [vmem:[%s4580_s9 + $0xc2] ss:$8 sm:$0x3] }
0x1743   : > { %3222 = vrot.lane.b32.xlu1 %v3221_v58, %s4455_s8  ;;  %v4191_v58 = vld [vmem:[%s4580_s9 + $0x90] ss:$8 sm:$0x3]  ;;  %v3639_v16 = vrot.slane %v4204_v53, %v4573_v10 }
0x1744   : > { %v3463_v24 = vrot.slane %v4191_v58, %v4573_v10  ;;  %v4214_v58 = vld [vmem:[%s4580_s9 + $0xc3] ss:$8 sm:$0x3] }
0x1746   : > { %3296 = vrot.lane.b32.xlu0 %v3295_v42, %s4456_s10  ;;  %v4197_v42 = vld [vmem:[%s4580_s9 + $0x27] ss:$8 sm:$0x3] }
0x1747   : > { %3265 = vrot.lane.b32.xlu1 %v3264_v56, %s4456_s10  ;;  %v3540_v56 = vrot.slane %v4197_v42, %v4573_v10 }
0x174a   : > { %3364 = vrot.lane.b32.xlu0 %v3363_v29, %s4456_s10  ;;  %v3605_v29 = vrot.slane %v4201_v61, %v4573_v10  ;;  %v5621_v61 = vld [vmem:[#allocation2] sm:$0xff] }
0x174b   : > { %3330 = vrot.lane.b32.xlu1 %v3329_v46, %s4456_s10  ;;  %v3571_v46 = vrot.slane %v4198_v45, %v4573_v10  ;;  %v328_v45 = vmul.f32 %v5621_v61, %v4650_v55  ;;  %v442_v55 = vrot.slane %v4995_v40, 4  ;;  %v511_v40 = vrot.slane %v4979_v38, 4 }
0x174e   : > { %3430 = vrot.lane.b32.xlu0 %v3429_v15, %s4457_s11  ;;  %v4208_v15 = vld [vmem:[%s4580_s9 + $0x61] ss:$8 sm:$0x3] }
0x174f   : > { %3398 = vrot.lane.b32.xlu1 %v3397_v57, %s4457_s11  ;;  %v4207_v57 = vld [vmem:[%s4580_s9 + $0x30] ss:$8 sm:$0x3]  ;;  %v3713_v4 = vrot.slane %v4208_v15, %v4573_v10 }
0x1752   : > { %3498 = vrot.lane.b32.xlu0 %v3497_v50, %s4457_s11  ;;  %v4211_v50 = vld [vmem:[%s4580_s9 + $0x92] ss:$8 sm:$0x3] }
0x1753   : > { %3464 = vrot.lane.b32.xlu1 %v3463_v24, %s4457_s11  ;;  %v3781_v24 = vrot.slane %v4214_v58, %v4573_v10  ;;  %v3747_v42 = vrot.slane %v4211_v50, %v4573_v10 }
0x1756   : > { %3541 = vrot.lane.b32.xlu0 %v3540_v56, %s4458_s12  ;;  %v3968_v56 = vld [vmem:[%s4580_s9 + $0x31] ss:$8 sm:$0x3] }
0x1757   : > { %3522 = vrot.lane.b32.xlu1 %v4612_v30, %s4458_s12  ;;  %v3682_v30 = vrot.slane %v4207_v57, %v4573_v10  ;;  %v3972_v57 = vld [vmem:[%s4580_s9 + $0x93] ss:$8 sm:$0x3] }
0x175a   : > { %3606 = vrot.lane.b32.xlu0 %v3605_v29, %s4458_s12  ;;  %v329_v29 = vld [vmem:[%s4580_s9] ss:$8 sm:$0x3] }
0x175b   : > { %3572 = vrot.lane.b32.xlu1 %v3571_v46, %s4458_s12  ;;  %v3970_v46 = vld [vmem:[%s4580_s9 + $0x62] ss:$8 sm:$0x3]  ;;  %v337_v53 = vrot.slane %v329_v29, %v4573_v10  ;;  %v477_v29 = vrot.slane %v5031_v8, 4  ;;  %s4460_s9 = smov 77  }
0x175e   : > { %3664 = vrot.lane.b32.xlu0 %v4648_v54, %s4459_s13  ;;  %v350_v54 = vrot.slane %v3968_v56, %v4573_v10 }
0x175f   : > { %3640 = vrot.lane.b32.xlu1 %v3639_v16, %s4458_s12  ;;  %v367_v16 = vrot.slane %v3970_v46, %v4573_v10  ;;  %v5636_v46 = vpop.permute.xlu1 %2710  ;;  %s3828_s12 = scalar_lea.sflag [#allocation4], %s270_s29 }
0x1760   : > { %v352_v15 = vmul.f32 %v350_v54, %v328_v45  ;;  %v444_v54 = vsel %vm443_vm13, %v441_v27, %v442_v55 }
0x1761   : > { %v369_v50 = vmul.f32 %v367_v16, %v328_v45 }
0x1762   : > { %3714 = vrot.lane.b32.xlu0 %v3713_v4, %s4459_s13  ;;  %v384_v4 = vrot.slane %v3972_v57, %v4573_v10  ;;  %v3969_v58 = vrot.slane %v352_v15, 9  ;;  %v478_v10 = vrot.slane %v4967_v17, 4 }
0x1763   : > { %3683 = vrot.lane.b32.xlu1 %v3682_v30, %s4459_s13  ;;  %v339_v30 = vmul.f32 %v337_v53, %v328_v45 }
0x1764   : > { %v386_v56 = vmul.f32 %v384_v4, %v328_v45  ;;  %v479_v16 = vsel %vm443_vm13, %v477_v29, %v478_v10  ;;  %v446_v45 = vsel %vm445_vm14, %v5009_v2, %v444_v54  ;;  %v576_v54 = vrot.slane %v4951_v0, 4 }
0x1765   : > { %v480_v27 = vsel %vm445_vm14, %v5031_v8, %v479_v16  ;;  %v577_v8 = vrot.slane %v4991_v49, 4 }
0x1766   : > { %3782 = vrot.lane.b32.xlu0 %v3781_v24, %s4459_s13  ;;  %v357_v24 = vadd.f32 %v3969_v58, %v339_v30  ;;  %v3973_v62 = vrot.slane %v386_v56, 11  ;;  %v512_v30 = vrot.slane %v5019_v14, 4 }
0x1767   : > { %3748 = vrot.lane.b32.xlu1 %v3747_v42, %s4459_s13  ;;  %v3971_v42 = vrot.slane %v369_v50, 10  ;;  %v545_v50 = vrot.slane %v5033_v47, 4  ;;  %s4337_s13 = scalar_lea.vmem %s6303_s7, 32 }
0x1768   : > { %p4338_p12 = scmp.ne.s32.totalorder %s6303_s7, %s4337_s13 }
0x1769   : > { %v374_v1 = vadd.f32 %v3971_v42, %v357_v24  ;;  %v546_v24 = vrot.slane %v4969_v9, 4 }
0x176a   : > { %p4339_p13 = pnand %p4338_p12, %p4533_p4 }
0x176b   : > { %v391_v53 = vadd.f32 %v3973_v62, %v374_v1  ;;  %v513_v1 = vsel %vm443_vm13, %v511_v40, %v512_v30 }
0x176c   : > { %v514_v10 = vsel %vm445_vm14, %v4979_v38, %v513_v1  ;;  %p4340_p0 = pneg %p4339_p13 }
0x176d   : > { %v448_v17 = vadd.f32 %v446_v45, %v391_v53  ;;  %v547_v53 = vsel %vm443_vm13, %v545_v50, %v546_v24  ;;  %v5658_v45 = vld [vmem:[#allocation2 + $0x8] sm:$0xf] }
0x176e   : > { %v548_v38 = vsel %vm445_vm14, %v5033_v47, %v547_v53  ;;  %vm3667_vm14 = vcmask 556032  }
0x176f   : > { %v482_v42 = vadd.f32 %v480_v27, %v448_v17  ;;  %v578_v17 = vsel %vm443_vm13, %v576_v54, %v577_v8  ;;  %v612_v54 = vrot.slane %v4953_v23, 4 }
0x1770   : > { %v580_v8 = vsel %vm579_vm1, %v4951_v0, %v578_v17 }
0x1790   : > { %v2746_v15 = vpop.permute.xlu0 %2745 }
0x1791   : > { %v2748_v57 = vrot.slane %v2746_v15, 4  ;;  %v2744_v4 = vpop.permute.xlu1 %2743 }
0x1792   : > { %v2747_v58 = vrot.slane %v2744_v4, 4 }
0x1794   : > { %v2749_v62 = vsel %vm443_vm13, %v2747_v58, %v2748_v57  ;;  %v2798_v2 = vpop.permute.xlu0 %2797 }
0x1795   : > { %v5650_v56 = vsel %vm2715_vm15, %v2744_v4, %v2749_v62  ;;  %v2799_v14 = vrot.slane %v2798_v2, 4  ;;  %v2764_v55 = vpop.permute.xlu1 %2763  ;;  %v516_v4 = vadd.f32 %v514_v10, %v482_v42 }
0x1796   : > { %v2765_v29 = vrot.slane %v2764_v55, 4 }
0x1797   : > { %v2800_v16 = vsel %vm2700_vm12, %v2799_v14, %v2798_v2  ;;  %v2804_v9 = vmul.f32 %v5658_v45, %v2799_v14  ;;  %v611_v14 = vrot.slane %v5011_v20, 4 }
0x1798   : > { %v2766_v40 = vsel %vm2700_vm12, %v2765_v29, %v2764_v55  ;;  %v2770_v15 = vmul.f32 %v5658_v45, %v2765_v29  ;;  %v2841_v57 = vpop.permute.xlu0 %2840  ;;  %v2803_v50 = vmul.f32 %v5621_v61, %v2800_v16  ;;  %v550_v55 = vadd.f32 %v548_v38, %v516_v4 }
0x1799   : > { %v2769_v49 = vmul.f32 %v5621_v61, %v2766_v40  ;;  %v2822_v30 = vpop.permute.xlu1 %2821  ;;  %v4146_v62 = vrot.slane %v2804_v9, 11  ;;  %v2842_v2 = vrot.slane %v2841_v57, 4  ;;  %vm1453_vm12 = vcmask 891904  }
0x179a   : > { %v4143_v27 = vrot.slane %v2770_v15, 10  ;;  %v2823_v58 = vrot.slane %v2822_v30, 4  ;;  %v4145_v53 = vrot.slane %v2803_v50, 11  ;;  %v582_v38 = vadd.f32 %v580_v8, %v550_v55 }
0x179b   : > { %v4142_v1 = vrot.slane %v2769_v49, 10  ;;  %v2843_v9 = vsel %vm2824_vm0, %v2842_v2, %v2841_v57  ;;  %v645_v49 = vrot.slane %v4961_v43, 4  ;;  %v679_v50 = vrot.slane %v5013_v35, 4 }
0x179c   : > { %v2825_v24 = vsel %vm2824_vm0, %v2823_v58, %v2822_v30  ;;  %v2829_v42 = vmul.f32 %v5658_v45, %v2823_v58  ;;  %2779 = vrot.lane.b32.xlu0 %v4143_v27, %s4452_s5  ;;  %v2906_v47 = vpop.permute.xlu0 %2905  ;;  %v613_v30 = vsel %vm443_vm13, %v611_v14, %v612_v54  ;;  %v646_v27 = vrot.slane %v5000_v51, 4 }
0x179d   : > { %2777 = vrot.lane.b32.xlu1 %v4142_v1, %s4452_s5  ;;  %v2872_v29 = vpop.permute.xlu1 %2871  ;;  %v2828_v16 = vmul.f32 %v5621_v61, %v2825_v24  ;;  %v2907_v40 = vrot.slane %v2906_v47, 4  ;;  %v614_v57 = vsel %vm579_vm1, %v5011_v20, %v613_v30  ;;  %v680_v51 = vrot.slane %v4955_v18, 4 }
0x179e   : > { %v2873_v10 = vrot.slane %v2872_v29, 4  ;;  %v2847_v4 = vmul.f32 %v2842_v2, %v2829_v42  ;;  %v647_v2 = vsel %vm443_vm13, %v645_v49, %v646_v27  ;;  %v616_v24 = vadd.f32 %v614_v57, %v582_v38 }
0x179f   : > { %v2846_v17 = vmul.f32 %v2843_v9, %v2828_v16  ;;  %v2908_v1 = vsel %vm2824_vm0, %v2907_v40, %v2906_v47  ;;  %v2912_v55 = vmul.f32 %v2907_v40, %v2829_v42  ;;  %v733_v20 = vrot.slane %v5015_v7, 4 }
0x17a0   : > { %v2874_v15 = vsel %vm2824_vm0, %v2873_v10, %v2872_v29  ;;  %2813 = vrot.lane.b32.xlu0 %v4146_v62, %s4452_s5  ;;  %v2878_v23 = vmul.f32 %v2873_v10, %v2829_v42  ;;  %v2964_v14 = vpop.permute.xlu0 %2963  ;;  %v2911_v10 = vmul.f32 %v2908_v1, %v2828_v16  ;;  %v648_v47 = vsel %vm579_vm1, %v4961_v43, %v647_v2 }
0x17a1   : > { %2811 = vrot.lane.b32.xlu1 %v4145_v53, %s4452_s5  ;;  %v2940_v0 = vpop.permute.xlu1 %2939  ;;  %v2877_v58 = vmul.f32 %v2874_v15, %v2828_v16  ;;  %v681_v53 = vsel %vm443_vm13, %v679_v50, %v680_v51  ;;  %v2965_v15 = vrot.slane %v2964_v14, 4  ;;  %v650_v18 = vadd.f32 %v648_v47, %v616_v24  ;;  %s4225_s5 = sshll.u32 %s4407_s18, 5  ;;  %s4467_s18 = smov [#allocation3]  }
0x17a2   : > { %v2941_v62 = vrot.slane %v2940_v0, 4  ;;  %v4150_v29 = vrot.slane %v2878_v23, 9  ;;  %v4153_v40 = vrot.slane %v2912_v55, 10  ;;  %v682_v30 = vsel %vm579_vm1, %v5013_v35, %v681_v53  ;;  %s6301_s11 = scalar_lea.hbm %s6352_s4, %s4225_s5 }
0x17a3   : > { %v4149_v8 = vrot.slane %v2877_v58, 9  ;;  %v4152_v38 = vrot.slane %v2911_v10, 10  ;;  %v2967_v27 = vsel %vm2966_vm2, %v2965_v15, %v2964_v14  ;;  %v2971_v58 = vmul.f32 %v5658_v45, %v2965_v15 }
0x17a4   : > { %2852 = vrot.lane.b32.xlu0 %v2847_v4, %s4460_s9  ;;  %v2942_v9 = vsel %vm2824_vm0, %v2941_v62, %v2940_v0  ;;  %v734_v4 = vrot.slane %v4957_v32, 4  ;;  %v2946_v49 = vmul.f32 %v2941_v62, %v2829_v42  ;;  %v3014_v0 = vpop.permute.xlu0 %3013  ;;  %v768_v57 = vrot.slane %v4981_v33, 4 }
0x17a5   : > { %2850 = vrot.lane.b32.xlu1 %v2846_v17, %s4460_s9  ;;  %v2983_v54 = vpop.permute.xlu1 %2982  ;;  %v2945_v23 = vmul.f32 %v2942_v9, %v2828_v16  ;;  %v3015_v32 = vrot.slane %v3014_v0, 4  ;;  %v684_v50 = vadd.f32 %v682_v30, %v650_v18  ;;  %v769_v16 = vrot.slane %v5021_v3, 4 }
0x17a6   : > { %v735_v43 = vsel %vm443_vm13, %v733_v20, %v734_v4  ;;  %v2984_v17 = vrot.slane %v2983_v54, 4  ;;  %v4156_v35 = vrot.slane %v2946_v49, 11  ;;  %v2970_v2 = vmul.f32 %v5621_v61, %v2967_v27 }
0x17a7   : > { %v737_v1 = vsel %vm736_vm3, %v5015_v7, %v735_v43  ;;  %v4155_v62 = vrot.slane %v2945_v23, 11  ;;  %v3016_v24 = vsel %vm2966_vm2, %v3015_v32, %v3014_v0  ;;  %v802_v10 = vrot.slane %v5035_v34, 4 }
0x17a8   : > { %2887 = vrot.lane.b32.xlu0 %v4150_v29, %s4460_s9  ;;  %v2985_v14 = vsel %vm2966_vm2, %v2984_v17, %v2983_v54  ;;  %v2989_v51 = vmul.f32 %v2984_v17, %v2971_v58  ;;  %v770_v29 = vsel %vm443_vm13, %v768_v57, %v769_v16  ;;  %v739_v20 = vadd.f32 %v737_v1, %v684_v50 }
0x17a9   : > { %2885 = vrot.lane.b32.xlu1 %v4149_v8, %s4460_s9  ;;  %v3048_v42 = vpop.permute.xlu1 %3047  ;;  %v3082_v8 = vpop.permute.xlu0 %3081  ;;  %v3020_v7 = vmul.f32 %v3015_v32, %v2971_v58  ;;  %v803_v3 = vrot.slane %v4971_v19, 4  ;;  %v3019_v47 = vmul.f32 %v3016_v24, %v2970_v2  ;;  %v2988_v53 = vmul.f32 %v2985_v14, %v2970_v2 }
0x17aa   : > { %v3049_v55 = vrot.slane %v3048_v42, 4  ;;  %v771_v54 = vsel %vm736_vm3, %v4981_v33, %v770_v29  ;;  %v836_v9 = vrot.slane %v4983_v26, 4  ;;  %v3083_v15 = vrot.slane %v3082_v8, 4 }
0x17ab   : > { %v773_v18 = vadd.f32 %v771_v54, %v739_v20  ;;  %v837_v19 = vrot.slane %v5023_v5, 4  ;;  %v4160_v30 = vrot.slane %v3020_v7, 9  ;;  %v890_v33 = vrot.slane %v4963_v11, 4 }
0x17ac   : > { %2921 = vrot.lane.b32.xlu0 %v4153_v40, %s4460_s9  ;;  %v3050_v4 = vsel %vm2966_vm2, %v3049_v55, %v3048_v42  ;;  %v804_v40 = vsel %vm443_vm13, %v802_v10, %v803_v3  ;;  %v3054_v43 = vmul.f32 %v3049_v55, %v2971_v58  ;;  %v3084_v17 = vsel %vm2966_vm2, %v3083_v15, %v3082_v8 }
0x17ad   : > { %2919 = vrot.lane.b32.xlu1 %v4152_v38, %s4460_s9  ;;  %v3106_v49 = vpop.permute.xlu1 %3105  ;;  %v4159_v38 = vrot.slane %v3019_v47, 9  ;;  %v3053_v23 = vmul.f32 %v3050_v4, %v2970_v2  ;;  %v3125_v0 = vpop.permute.xlu0 %3124  ;;  %v838_v27 = vsel %vm443_vm13, %v836_v9, %v837_v19  ;;  %v805_v32 = vsel %vm736_vm3, %v5035_v34, %v804_v40 }
0x17ae   : > { %v3107_v57 = vrot.slane %v3106_v49, 4  ;;  %v891_v50 = vrot.slane %v5004_v59, 4  ;;  %v807_v5 = vadd.f32 %v805_v32, %v773_v18  ;;  %v3088_v42 = vmul.f32 %v3083_v15, %v2971_v58 }
0x17af   : > { %v839_v16 = vsel %vm736_vm3, %v4983_v26, %v838_v27  ;;  %v3087_v34 = vmul.f32 %v3084_v17, %v2970_v2  ;;  %v3126_v59 = vrot.slane %v3125_v0, 4  ;;  %v925_v58 = vrot.slane %v5037_v63, 4 }
0x17b0   : > { %2955 = vrot.lane.b32.xlu0 %v4156_v35, %s4460_s9  ;;  %v4163_v35 = vrot.slane %v3054_v43, 10  ;;  %v892_v1 = vsel %vm443_vm13, %v890_v33, %v891_v50  ;;  %v3109_v14 = vsel %vm3108_vm4, %v3107_v57, %v3106_v49  ;;  %v841_v29 = vadd.f32 %v839_v16, %v807_v5 }
0x17b1   : > { %2953 = vrot.lane.b32.xlu1 %v4155_v62, %s4460_s9  ;;  %v4162_v62 = vrot.slane %v3053_v23, 10  ;;  %v3155_v24 = vpop.permute.xlu1 %3154  ;;  %v3189_v20 = vpop.permute.xlu0 %3188  ;;  %v4166_v10 = vrot.slane %v3088_v42, 11  ;;  %v894_v26 = vsel %vm893_vm5, %v4963_v11, %v892_v1  ;;  %v926_v2 = vrot.slane %v4973_v25, 4  ;;  %s4341_s9 = sshll.u32 %s4467_s18, 4  ;;  %s4342_s9 = int_to_ptr.vmem [resolvable:$false] %s4341_s9 }
0x17b2   : > { %v3156_v55 = vrot.slane %v3155_v24, 4  ;;  %v4165_v8 = vrot.slane %v3087_v34, 11  ;;  %v3112_v7 = vmul.f32 %v5621_v61, %v3109_v14  ;;  %v3127_v3 = vsel %vm3108_vm4, %v3126_v59, %v3125_v0  ;;  %p4344_p1 = scmp.lt.s32.totalorder %s6303_s7, %s4342_s9 }
0x17b3   : > { %v3190_v54 = vrot.slane %v3189_v20, 4  ;;  %v959_v9 = vrot.slane %v4985_v31, 4  ;;  %v896_v15 = vadd.f32 %v894_v26, %v841_v29  ;;  %v927_v4 = vsel %vm443_vm13, %v925_v58, %v926_v2 }
0x17b4   : > { %2994 = vrot.lane.b32.xlu0 %v2989_v51, %s4461_s14  ;;  %v3113_v51 = vmul.f32 %v5658_v45, %v3107_v57  ;;  %v960_v25 = vrot.slane %v5025_v28, 4  ;;  %v3130_v40 = vmul.f32 %v3127_v3, %v3112_v7  ;;  %v928_v19 = vsel %vm893_vm5, %v5037_v63, %v927_v4 }
0x17b5   : > { %2992 = vrot.lane.b32.xlu1 %v2988_v53, %s4461_s14  ;;  %v3157_v53 = vsel %vm3108_vm4, %v3156_v55, %v3155_v24  ;;  %v3223_v18 = vpop.permute.xlu1 %3222  ;;  %v3191_v43 = vsel %vm3108_vm4, %v3190_v54, %v3189_v20  ;;  %v930_v23 = vadd.f32 %v928_v19, %v896_v15  ;;  %v3247_v0 = vpop.permute.xlu0 %3246  ;;  %v994_v28 = vrot.slane %v4975_v21, 4 }
0x17b6   : > { %v3131_v47 = vmul.f32 %v3126_v59, %v3113_v51  ;;  %v3161_v11 = vmul.f32 %v3156_v55, %v3113_v51  ;;  %v3160_v49 = vmul.f32 %v3157_v53, %v3112_v7  ;;  %v3224_v33 = vrot.slane %v3223_v18, 4 }
0x17b7   : > { %v3195_v32 = vmul.f32 %v3190_v54, %v3113_v51  ;;  %v1032_v17 = vrot.slane %v5017_v6, 4  ;;  %v3194_v57 = vmul.f32 %v3191_v43, %v3112_v7  ;;  %v3248_v1 = vrot.slane %v3247_v0, 4 }
0x17b8   : > { %3029 = vrot.lane.b32.xlu0 %v4160_v30, %s4461_s14  ;;  %v993_v30 = vrot.slane %v5039_v41, 4  ;;  %v4170_v27 = vrot.slane %v3161_v11, 9  ;;  %v4169_v63 = vrot.slane %v3160_v49, 9  ;;  %v1033_v16 = vrot.slane %v4959_v22, 4 }
0x17b9   : > { %3027 = vrot.lane.b32.xlu1 %v4159_v38, %s4461_s14  ;;  %v961_v38 = vsel %vm443_vm13, %v959_v9, %v960_v25  ;;  %v3266_v50 = vpop.permute.xlu1 %3265  ;;  %v4173_v34 = vrot.slane %v3195_v32, 10  ;;  %v4172_v14 = vrot.slane %v3194_v57, 10  ;;  %v3297_v55 = vpop.permute.xlu0 %3296  ;;  %v3250_v29 = vsel %vm3249_vm6, %v3248_v1, %v3247_v0  ;;  %v6488_v0 = vld [vmem:[#allocation7_spill] sm:$0xff] }
0x17ba   : > { %v962_v5 = vsel %vm893_vm5, %v4985_v31, %v961_v38  ;;  %v995_v42 = vsel %vm443_vm13, %v993_v30, %v994_v28  ;;  %v1034_v24 = vsel %vm443_vm13, %v1032_v17, %v1033_v16  ;;  %v3254_v58 = vmul.f32 %v5658_v45, %v3248_v1  ;;  %v6490_v17 = vld [vmem:[#allocation8_spill] sm:$0xff] }
0x17bb   : > { %v964_v21 = vadd.f32 %v962_v5, %v930_v23  ;;  %v996_v31 = vsel %vm893_vm5, %v5039_v41, %v995_v42  ;;  %v3298_v22 = vrot.slane %v3297_v55, 4  ;;  %v3267_v20 = vrot.slane %v3266_v50, 4 }
0x17bc   : > { %3063 = vrot.lane.b32.xlu0 %v4163_v35, %s4461_s14  ;;  %v3225_v35 = vsel %vm3108_vm4, %v3224_v33, %v3223_v18  ;;  %v1036_v41 = vsel %vm1035_vm7, %v5017_v6, %v1034_v24  ;;  %v3253_v3 = vmul.f32 %v5621_v61, %v3250_v29  ;;  %v1101_v18 = vrot.slane %v5041_v12, 4 }
0x17bd   : > { %3061 = vrot.lane.b32.xlu1 %v4162_v62, %s4461_s14  ;;  %v3229_v62 = vmul.f32 %v3224_v33, %v3113_v51  ;;  %v3228_v59 = vmul.f32 %v3225_v35, %v3112_v7  ;;  %v998_v26 = vadd.f32 %v996_v31, %v964_v21  ;;  %v3331_v51 = vpop.permute.xlu1 %3330  ;;  %v3268_v53 = vsel %vm3249_vm6, %v3267_v20, %v3266_v50  ;;  %v3365_v11 = vpop.permute.xlu0 %3364  ;;  %v6492_v31 = vld [vmem:[#allocation10_spill] sm:$0xff] }
0x17be   : > { %v3272_v54 = vmul.f32 %v3267_v20, %v3254_v58  ;;  %v3332_v9 = vrot.slane %v3331_v51, 4  ;;  %v3303_v6 = vmul.f32 %v3298_v22, %v3254_v58  ;;  %v1175_v49 = vrot.slane %v5007_v60, 4 }
0x17bf   : > { %v4176_v2 = vrot.slane %v3229_v62, 11  ;;  %v4175_v7 = vrot.slane %v3228_v59, 11  ;;  %v1038_v4 = vadd.f32 %v1036_v41, %v998_v26  ;;  %v3366_v30 = vrot.slane %v3365_v11, 4  ;;  %v6491_v62 = vld [vmem:[#allocation11_spill] sm:$0xff] }
0x17c0   : > { %3097 = vrot.lane.b32.xlu0 %v4166_v10, %s4461_s14  ;;  %v1067_v10 = vrot.slane %v4987_v44, 4  ;;  %v3333_v43 = vsel %vm3249_vm6, %v3332_v9, %v3331_v51  ;;  %v1174_v33 = vrot.slane %v4965_v52, 4  ;;  %v1135_v38 = vrot.slane %v4989_v39, 4 }
0x17c1   : > { %3095 = vrot.lane.b32.xlu1 %v4165_v8, %s4461_s14  ;;  %v1068_v8 = vrot.slane %v5027_v13, 4  ;;  %v1102_v13 = vrot.slane %v4977_v36, 4  ;;  %v1136_v60 = vrot.slane %v6488_v0, 4  ;;  %v4180_v28 = vrot.slane %v3303_v6, 9  ;;  %v3431_v35 = vpop.permute.xlu0 %3430  ;;  %s4343_s14 = scalar_lea.vmem %s4342_s9, 64 }
0x17c2   : > { %v3336_v50 = vmul.f32 %v3333_v43, %v3253_v3  ;;  %v3367_v42 = vsel %vm3249_vm6, %v3366_v30, %v3365_v11  ;;  %v1176_v1 = vsel %vm443_vm13, %v1174_v33, %v1175_v49  ;;  %v1244_v24 = vrot.slane %v6491_v62, 4  ;;  %v6496_v49 = vld [vmem:[#allocation14_spill] sm:$0xff]  ;;  %p4345_p2 = scmp.lt.s32.totalorder %s4343_s14, %s4337_s13 }
0x17c3   : > { %v1069_v15 = vsel %vm443_vm13, %v1067_v10, %v1068_v8  ;;  %v1103_v36 = vsel %vm443_vm13, %v1101_v18, %v1102_v13  ;;  %v1137_v16 = vsel %vm443_vm13, %v1135_v38, %v1136_v60  ;;  %v3371_v59 = vmul.f32 %v3366_v30, %v3254_v58 }
0x17c4   : > { %3136 = vrot.lane.b32.xlu0 %v3131_v47, %s4455_s8  ;;  %v3299_v47 = vsel %vm3249_vm6, %v3298_v22, %v3297_v55  ;;  %v1070_v19 = vsel %vm1035_vm7, %v4987_v44, %v1069_v15  ;;  %v6489_v44 = vld [vmem:[#allocation9_spill] sm:$0xff]  ;;  %v1104_v5 = vsel %vm1035_vm7, %v5041_v12, %v1103_v36  ;;  %v3370_v29 = vmul.f32 %v3367_v42, %v3253_v3  ;;  %p4346_p3 = por %p4345_p2, %p4344_p1 }
0x17c5   : > { %3134 = vrot.lane.b32.xlu1 %v3130_v40, %s4455_s8  ;;  %v3302_v25 = vmul.f32 %v3299_v47, %v3253_v3  ;;  %v3271_v40 = vmul.f32 %v3268_v53, %v3253_v3  ;;  %v1072_v23 = vadd.f32 %v1070_v19, %v1038_v4  ;;  %v1210_v32 = vrot.slane %v6489_v44, 4  ;;  %v6494_v47 = vld [vmem:[#allocation12_spill] sm:$0xff]  ;;  %v3499_v6 = vpop.permute.xlu0 %3498 }
0x17c6   : > { %v4182_v22 = vrot.slane %v3336_v50, 10  ;;  %v3432_v20 = vrot.slane %v3431_v35, 4  ;;  %v1138_v10 = vsel %vm1035_vm7, %v4989_v39, %v1137_v16  ;;  %v4186_v8 = vrot.slane %v3371_v59, 11  ;;  %v6500_v59 = vld [vmem:[#allocation18_spill] sm:$0xff]  ;;  %p4347_p5 = pnand %p4346_p3, %p4340_p0 }
0x17c7   : > { %v4179_v57 = vrot.slane %v3302_v25, 9  ;;  %v1106_v21 = vadd.f32 %v1104_v5, %v1072_v23  ;;  %v1277_v39 = vrot.slane %v6494_v47, 4  ;;  %v4185_v53 = vrot.slane %v3370_v29, 11  ;;  %v6495_v25 = vld [vmem:[#allocation15_spill] sm:$0xff] }
0x17c8   : > { %3170 = vrot.lane.b32.xlu0 %v4170_v27, %s4455_s8  ;;  %v3337_v27 = vmul.f32 %v3332_v9, %v3254_v58  ;;  %v1308_v19 = vrot.slane %v6496_v49, 4  ;;  %v3500_v60 = vrot.slane %v3499_v6, 4  ;;  %vm1595_vm0 = vcmask 883712  }
0x17c9   : > { %3168 = vrot.lane.b32.xlu1 %v4169_v63, %s4455_s8  ;;  %v1209_v63 = vrot.slane %v6490_v17, 4  ;;  %v1140_v51 = vadd.f32 %v1138_v10, %v1106_v21  ;;  %vm1737_vm1 = vcmask 785408   ;;  %vm1879_vm2 = vcmask 777216  }
0x17ca   : > { %v4183_v12 = vrot.slane %v3337_v27, 10  ;;  %v3501_v21 = vsel %vm3401_vm9, %v3500_v60, %v3499_v6  ;;  %vm2013_vm3 = vcmask 769024   ;;  %vm2155_vm5 = vcmask 760832  }
0x17cb   : > { %v1211_v55 = vsel %vm443_vm13, %v1209_v63, %v1210_v32  ;;  %vm2297_vm6 = vcmask 752640   ;;  %vm2439_vm7 = vcmask 654336  }
0x17cc   : > { %3204 = vrot.lane.b32.xlu0 %v4173_v34, %s4455_s8  ;;  %v3399_v34 = vpop.permute.xlu1 %3398  ;;  %v1212_v58 = vsel %vm1177_vm8, %v6490_v17, %v1211_v55  ;;  %v6497_v17 = vld [vmem:[#allocation17_spill] sm:$0xff]  ;;  %v6501_v55 = vld [vmem:[#allocation20_spill] sm:$0xff] }
0x17cd   : > { %3202 = vrot.lane.b32.xlu1 %v4172_v14, %s4455_s8  ;;  %v1243_v14 = vrot.slane %v6492_v31, 4  ;;  %v3400_v26 = vrot.slane %v3399_v34, 4  ;;  %v1344_v63 = vrot.slane %v6497_v17, 4  ;;  %v1412_v29 = vrot.slane %v6501_v55, 4 }
0x17cf   : > { %v1245_v41 = vsel %vm443_vm13, %v1243_v14, %v1244_v24  ;;  %v3402_v15 = vsel %vm3401_vm9, %v3400_v26, %v3399_v34  ;;  %v3406_v4 = vmul.f32 %v5658_v45, %v3400_v26 }
0x17d0   : > { %3238 = vrot.lane.b32.xlu0 %v4176_v2, %s4455_s8  ;;  %v1178_v2 = vsel %vm1177_vm8, %v4965_v52, %v1176_v1  ;;  %v3465_v9 = vpop.permute.xlu1 %3464  ;;  %v3437_v52 = vmul.f32 %v5658_v45, %v3432_v20  ;;  %v1246_v13 = vsel %vm1177_vm8, %v6492_v31, %v1245_v41  ;;  %v3405_v33 = vmul.f32 %v5621_v61, %v3402_v15  ;;  %v3542_v1 = vpop.permute.xlu0 %3541  ;;  %v6499_v31 = vld [vmem:[#allocation19_spill] sm:$0xff] }
0x17d1   : > { %3236 = vrot.lane.b32.xlu1 %v4175_v7, %s4455_s8  ;;  %v6493_v7 = vld [vmem:[#allocation13_spill] sm:$0xff]  ;;  %v3466_v18 = vrot.slane %v3465_v9, 4  ;;  %v1180_v11 = vadd.f32 %v1178_v2, %v1140_v51  ;;  %v1378_v14 = vrot.slane %v6499_v31, 4  ;;  %v3504_v51 = vmul.f32 %v5621_v61, %v3501_v21  ;;  %v6503_v15 = vld [vmem:[#allocation23_spill] sm:$0xff] }
0x17d2   : > { %v1278_v3 = vrot.slane %v6493_v7, 4  ;;  %v4190_v23 = vrot.slane %v3437_v52, 9  ;;  %v3543_v7 = vrot.slane %v3542_v1, 4  ;;  %v6504_v52 = vld [vmem:[#allocation22_spill] sm:$0xff] }
0x17d3   : > { %v1214_v30 = vadd.f32 %v1212_v58, %v1180_v11  ;;  %v3467_v36 = vsel %vm3401_vm9, %v3466_v18, %v3465_v9  ;;  %v3471_v0 = vmul.f32 %v5658_v45, %v3466_v18  ;;  %v1450_v18 = vrot.slane %v6504_v52, 4 }
0x17d4   : > { %3277 = vrot.lane.b32.xlu0 %v3272_v54, %s4462_s21  ;;  %v3433_v54 = vsel %vm3401_vm9, %v3432_v20, %v3431_v35  ;;  %v1279_v43 = vsel %vm443_vm13, %v1277_v39, %v1278_v3  ;;  %v3523_v27 = vpop.permute.xlu1 %3522  ;;  %v3470_v42 = vmul.f32 %v5621_v61, %v3467_v36  ;;  %v3505_v35 = vmul.f32 %v5658_v45, %v3500_v60 }
0x17d5   : > { %3275 = vrot.lane.b32.xlu1 %v3271_v40, %s4462_s21  ;;  %v1309_v40 = vrot.slane %v6495_v25, 4  ;;  %v3436_v38 = vmul.f32 %v5621_v61, %v3433_v54  ;;  %v1280_v44 = vsel %vm1177_vm8, %v6494_v47, %v1279_v43  ;;  %v4193_v16 = vrot.slane %v3471_v0, 10  ;;  %v3607_v47 = vpop.permute.xlu0 %3606  ;;  %v6505_v43 = vld [vmem:[#allocation25_spill] sm:$0xff]  ;;  %v6507_v0 = vld [vmem:[#allocation27_spill] sm:$0xff] }
0x17d6   : > { %v3524_v34 = vrot.slane %v3523_v27, 4  ;;  %v4192_v26 = vrot.slane %v3470_v42, 10  ;;  %v4196_v2 = vrot.slane %v3505_v35, 11  ;;  %v4195_v11 = vrot.slane %v3504_v51, 11  ;;  %v6510_v42 = vld [vmem:[#allocation29_spill] sm:$0xff] }
0x17d7   : > { %v1310_v32 = vsel %vm443_vm13, %v1308_v19, %v1309_v40  ;;  %v4189_v5 = vrot.slane %v3436_v38, 9  ;;  %v6506_v38 = vld [vmem:[#allocation24_spill] sm:$0xff]  ;;  %v1520_v60 = vrot.slane %v6507_v0, 4  ;;  %v1553_v35 = vrot.slane %v6510_v42, 4 }
0x17d8   : > { %3312 = vrot.lane.b32.xlu0 %v4180_v28, %s4462_s21  ;;  %v1248_v28 = vadd.f32 %v1246_v13, %v1214_v30  ;;  %v1312_v24 = vsel %vm1311_vm10, %v6496_v49, %v1310_v32  ;;  %v3573_v58 = vpop.permute.xlu1 %3572  ;;  %v3526_v41 = vsel %vm3525_vm11, %v3524_v34, %v3523_v27  ;;  %v3544_v13 = vsel %vm3525_vm11, %v3543_v7, %v3542_v1 }
0x17d9   : > { %3310 = vrot.lane.b32.xlu1 %v4179_v57, %s4462_s21  ;;  %v6498_v57 = vld [vmem:[#allocation16_spill] sm:$0xff]  ;;  %v3574_v3 = vrot.slane %v3573_v58, 4  ;;  %v3529_v6 = vmul.f32 %v5621_v61, %v3526_v41  ;;  %v3608_v49 = vrot.slane %v3607_v47, 4  ;;  %v6511_v41 = vld [vmem:[#allocation31_spill] sm:$0xff]  ;;  %vm2581_vm8 = vcmask 646144  }
0x17da   : > { %v1343_v50 = vrot.slane %v6498_v57, 4  ;;  %v1282_v62 = vadd.f32 %v1280_v44, %v1248_v28  ;;  %v6508_v28 = vld [vmem:[#allocation26_spill] sm:$0xff]  ;;  %vm2857_vm9 = vcmask 629760  }
0x17db   : > { %v3575_v40 = vsel %vm3525_vm11, %v3574_v3, %v3573_v58  ;;  %v1519_v27 = vrot.slane %v6508_v28, 4  ;;  %v3609_v1 = vsel %vm3525_vm11, %v3608_v49, %v3607_v47 }
0x17dc   : > { %3346 = vrot.lane.b32.xlu0 %v4183_v12, %s4462_s21  ;;  %v1377_v12 = vrot.slane %v6500_v59, 4  ;;  %v1345_v10 = vsel %vm443_vm13, %v1343_v50, %v1344_v63  ;;  %v1314_v39 = vadd.f32 %v1312_v24, %v1282_v62  ;;  %v3641_v36 = vpop.permute.xlu1 %3640  ;;  %v3547_v63 = vmul.f32 %v3544_v13, %v3529_v6  ;;  %v6509_v50 = vld [vmem:[#allocation28_spill] sm:$0xff]  ;;  %v3665_v62 = vpop.permute.xlu0 %3664 }
0x17dd   : > { %3344 = vrot.lane.b32.xlu1 %v4182_v22, %s4462_s21  ;;  %v6502_v22 = vld [vmem:[#allocation21_spill] sm:$0xff]  ;;  %v1521_v31 = vsel %vm443_vm13, %v1519_v27, %v1520_v60  ;;  %v3666_v51 = vrot.slane %v3665_v62, 4 }
0x17de   : > { %v1411_v20 = vrot.slane %v6502_v22, 4  ;;  %v1379_v54 = vsel %vm443_vm13, %v1377_v12, %v1378_v14  ;;  %v1522_v58 = vsel %vm1453_vm12, %v6508_v28, %v1521_v31 }
0x17df   : > { %v1380_v30 = vsel %vm1311_vm10, %v6500_v59, %v1379_v54 }
0x17e0   : > { %3380 = vrot.lane.b32.xlu0 %v4186_v8, %s4462_s21  ;;  %v5859_v8 = vmul.f32 %v5658_v45, %v3524_v34  ;;  %v1413_v9 = vsel %vm443_vm13, %v1411_v20, %v1412_v29  ;;  %v3612_v29 = vmul.f32 %v3609_v1, %v3529_v6 }
0x17e1   : > { %3378 = vrot.lane.b32.xlu1 %v4185_v53, %s4462_s21  ;;  %v1346_v53 = vsel %vm1311_vm10, %v6498_v57, %v1345_v10  ;;  %v1414_v32 = vsel %vm1311_vm10, %v6502_v22, %v1413_v9  ;;  %v3578_v57 = vmul.f32 %v3575_v40, %v3529_v6  ;;  %v3684_v22 = vpop.permute.xlu1 %3683  ;;  %vm3282_vm10 = vcmask 515072  }
0x17e2   : > { %v3548_v25 = vmul.f32 %v3543_v7, %v5859_v8  ;;  %v1348_v19 = vadd.f32 %v1346_v53, %v1314_v39  ;;  %v3579_v44 = vmul.f32 %v3574_v3, %v5859_v8  ;;  %v3613_v59 = vmul.f32 %v3608_v49, %v5859_v8  ;;  %v6512_v3 = vld [vmem:[#allocation30_spill] sm:$0xff]  ;;  %v6513_v49 = vld [vmem:[#allocation33_spill] sm:$0xff] }
0x17e3   : > { %v4199_v55 = vrot.slane %v3578_v57, 9  ;;  %v1593_v7 = vrot.slane %v6511_v41, 4  ;;  %v1592_v47 = vrot.slane %v6512_v3, 4 }
0x17e4   : > { %3411 = vrot.lane.b32.xlu0 %v3406_v4, %s4463_s22  ;;  %v1451_v4 = vrot.slane %v6503_v15, 4  ;;  %v1382_v21 = vadd.f32 %v1380_v30, %v1348_v19  ;;  %v4200_v14 = vrot.slane %v3579_v44, 9  ;;  %v4203_v39 = vrot.slane %v3613_v59, 10  ;;  %v6514_v19 = vld [vmem:[#allocation32_spill] sm:$0xff] }
0x17e5   : > { %3409 = vrot.lane.b32.xlu1 %v3405_v33, %s4463_s22  ;;  %v1486_v33 = vrot.slane %v6505_v43, 4  ;;  %v4202_v15 = vrot.slane %v3612_v29, 10  ;;  %v1627_v30 = vrot.slane %v6514_v19, 4  ;;  %v3749_v43 = vpop.permute.xlu1 %3748 }
0x17e6   : > { %v1452_v17 = vsel %vm443_vm13, %v1450_v18, %v1451_v4  ;;  %v1416_v12 = vadd.f32 %v1414_v32, %v1382_v21  ;;  %v3668_v18 = vsel %vm3667_vm14, %v3666_v51, %v3665_v62 }
0x17e7   : > { %v1454_v24 = vsel %vm1453_vm12, %v6504_v52, %v1452_v17  ;;  %v3715_v52 = vpop.permute.xlu0 %3714  ;;  %v3671_v28 = vmul.f32 %v5621_v61, %v3668_v18  ;;  %v3750_v17 = vrot.slane %v3749_v43, 4 }
0x17e8   : > { %3446 = vrot.lane.b32.xlu0 %v4190_v23, %s4463_s22  ;;  %v1485_v23 = vrot.slane %v6506_v38, 4  ;;  %v3716_v13 = vrot.slane %v3715_v52, 4 }
0x17e9   : > { %3444 = vrot.lane.b32.xlu1 %v4189_v5, %s4463_s22  ;;  %v1554_v5 = vrot.slane %v6509_v50, 4  ;;  %v6517_v50 = vld [vmem:[#allocation36_spill] sm:$0xff]  ;;  %v3751_v29 = vsel %vm3667_vm14, %v3750_v17, %v3749_v43 }
0x17ea   : > { %v1487_v34 = vsel %vm443_vm13, %v1485_v23, %v1486_v33  ;;  %v6515_v33 = vld [vmem:[#allocation35_spill] sm:$0xff]  ;;  %v6516_v23 = vld [vmem:[#allocation34_spill] sm:$0xff]  ;;  %v3717_v27 = vsel %vm3667_vm14, %v3716_v13, %v3715_v52 }
0x17eb   : > { %v1488_v20 = vsel %vm1453_vm12, %v6506_v38, %v1487_v34  ;;  %v1555_v10 = vsel %vm443_vm13, %v1553_v35, %v1554_v5  ;;  %v1662_v38 = vrot.slane %v6515_v33, 4  ;;  %v1696_v5 = vrot.slane %v6517_v50, 4  ;;  %v3783_v1 = vpop.permute.xlu0 %3782  ;;  %v6520_v34 = vld [vmem:[#allocation38_spill] sm:$0xff] }
0x17ec   : > { %3480 = vrot.lane.b32.xlu0 %v4193_v16, %s4463_s22  ;;  %v3642_v16 = vrot.slane %v3641_v36, 4  ;;  %v1556_v9 = vsel %vm1453_vm12, %v6510_v42, %v1555_v10  ;;  %v6518_v42 = vld [vmem:[#allocation37_spill] sm:$0xff]  ;;  %v1734_v62 = vrot.slane %v6520_v34, 4  ;;  %v3720_v31 = vmul.f32 %v3717_v27, %v3671_v28 }
0x17ed   : > { %3478 = vrot.lane.b32.xlu1 %v4192_v26, %s4463_s22  ;;  %v1695_v35 = vrot.slane %v6518_v42, 4  ;;  %v6521_v10 = vld [vmem:[#allocation41_spill] sm:$0xff]  ;;  %vm3700_vm12 = vcmask 490496  }
0x17ee   : > { %v3643_v26 = vsel %vm3525_vm11, %v3642_v16, %v3641_v36  ;;  %v3647_v53 = vmul.f32 %v3642_v16, %v5859_v8  ;;  %v1628_v8 = vrot.slane %v6513_v49, 4  ;;  %v6519_v16 = vld [vmem:[#allocation39_spill] sm:$0xff]  ;;  %vm3558_vm11 = vcmask 498688  }
0x17ef   : > { %v3646_v4 = vmul.f32 %v3643_v26, %v3529_v6  ;;  %v1594_v6 = vsel %vm443_vm13, %v1592_v47, %v1593_v7  ;;  %v1735_v21 = vrot.slane %v6519_v16, 4  ;;  %v1770_v26 = vrot.slane %v6521_v10, 4 }
0x17f0   : > { %3514 = vrot.lane.b32.xlu0 %v4196_v2, %s4463_s22  ;;  %v1456_v2 = vadd.f32 %v1454_v24, %v1416_v12  ;;  %v4206_v36 = vrot.slane %v3647_v53, 11  ;;  %v1629_v57 = vsel %vm443_vm13, %v1627_v30, %v1628_v8  ;;  %v4209_v47 = vrot.slane %v3720_v31, 9  ;;  %v6526_v8 = vld [vmem:[#allocation45_spill] sm:$0xff] }
0x17f1   : > { %3512 = vrot.lane.b32.xlu1 %v4195_v11, %s4463_s22  ;;  %v5910_v11 = vmul.f32 %v5658_v45, %v3666_v51  ;;  %v1661_v45 = vrot.slane %v6516_v23, 4  ;;  %v4205_v60 = vrot.slane %v3646_v4, 11  ;;  %v1630_v12 = vsel %vm1595_vm0, %v6514_v19, %v1629_v57  ;;  %v6522_v51 = vld [vmem:[#allocation40_spill] sm:$0xff] }
0x17f2   : > { %v1490_v54 = vadd.f32 %v1488_v20, %v1456_v2  ;;  %v1697_v20 = vsel %vm443_vm13, %v1695_v35, %v1696_v5  ;;  %v1769_v2 = vrot.slane %v6522_v51, 4  ;;  %v1837_v19 = vrot.slane %v6526_v8, 4 }
0x17f3   : > { %v1663_v61 = vsel %vm443_vm13, %v1661_v45, %v1662_v38  ;;  %v3721_v24 = vmul.f32 %v3716_v13, %v5910_v11  ;;  %v3755_v7 = vmul.f32 %v3750_v17, %v5910_v11  ;;  %v1698_v53 = vsel %vm1595_vm0, %v6518_v42, %v1697_v20  ;;  %v6527_v45 = vld [vmem:[#allocation47_spill] sm:$0xff] }
0x17f4   : > { %3553 = vrot.lane.b32.xlu0 %v3548_v25, %s4464_s24  ;;  %v3685_v25 = vrot.slane %v3684_v22, 4  ;;  %v1524_v40 = vadd.f32 %v1522_v58, %v1490_v54  ;;  %v1736_v58 = vsel %vm443_vm13, %v1734_v62, %v1735_v21  ;;  %v6523_v54 = vld [vmem:[#allocation43_spill] sm:$0xff]  ;;  %v6532_v62 = vld [vmem:[#allocation50_spill] sm:$0xff] }
0x17f5   : > { %3551 = vrot.lane.b32.xlu1 %v3547_v63, %s4464_s24  ;;  %v1596_v63 = vsel %vm1595_vm0, %v6512_v3, %v1594_v6  ;;  %v4210_v41 = vrot.slane %v3721_v24, 9  ;;  %v1738_v13 = vsel %vm1737_vm1, %v6520_v34, %v1736_v58  ;;  %v4213_v43 = vrot.slane %v3755_v7, 10  ;;  %v6531_v21 = vld [vmem:[#allocation51_spill] sm:$0xff]  ;;  %v6536_v7 = vld [vmem:[#allocation54_spill] sm:$0xff] }
0x17f6   : > { %v1558_v0 = vadd.f32 %v1556_v9, %v1524_v40  ;;  %v3686_v44 = vsel %vm3667_vm14, %v3685_v25, %v3684_v22  ;;  %v3690_v32 = vmul.f32 %v3685_v25, %v5910_v11  ;;  %v1664_v22 = vsel %vm1595_vm0, %v6516_v23, %v1663_v61  ;;  %v6525_v40 = vld [vmem:[#allocation44_spill] sm:$0xff]  ;;  %v6535_v58 = vld [vmem:[#allocation55_spill] sm:$0xff] }
0x17f7   : > { %v1804_v9 = vrot.slane %v6523_v54, 4  ;;  %v1771_v25 = vsel %vm443_vm13, %v1769_v2, %v1770_v26  ;;  %v1838_v49 = vrot.slane %v6525_v40, 4  ;;  %v1946_v34 = vrot.slane %v6531_v21, 4  ;;  %v6537_v54 = vld [vmem:[#allocation57_spill] sm:$0xff]  ;;  %v6539_v40 = vld [vmem:[#allocation59_spill] sm:$0xff] }
0x17f8   : > { %3588 = vrot.lane.b32.xlu0 %v4200_v14, %s4464_s24  ;;  %v3689_v14 = vmul.f32 %v3686_v44, %v3671_v28  ;;  %v1598_v59 = vadd.f32 %v1596_v63, %v1558_v0  ;;  %v6528_v0 = vld [vmem:[#allocation46_spill] sm:$0xff]  ;;  %v1772_v44 = vsel %vm1737_vm1, %v6522_v51, %v1771_v25  ;;  %v1945_v24 = vrot.slane %v6532_v62, 4 }
0x17f9   : > { %3586 = vrot.lane.b32.xlu1 %v4199_v55, %s4464_s24  ;;  %v3784_v55 = vrot.slane %v3783_v1, 4 }
0x17fa   : > { %v1632_v3 = vadd.f32 %v1630_v12, %v1598_v59  ;;  %v1947_v2 = vsel %vm443_vm13, %v1945_v24, %v1946_v34 }
0x17fb   : > { %v3785_v52 = vsel %vm3667_vm14, %v3784_v55, %v3783_v1  ;;  %v3789_v30 = vmul.f32 %v3784_v55, %v5910_v11  ;;  %v1839_v11 = vsel %vm443_vm13, %v1837_v19, %v1838_v49  ;;  %v6533_v55 = vld [vmem:[#allocation53_spill] sm:$0xff]  ;;  %v2080_v49 = vrot.slane %v6539_v40, 4 }
0x17fc   : > { %3622 = vrot.lane.b32.xlu0 %v4203_v39, %s4464_s24  ;;  %v3754_v39 = vmul.f32 %v3751_v29, %v3671_v28  ;;  %v1666_v18 = vadd.f32 %v1664_v22, %v1632_v3  ;;  %v3788_v33 = vmul.f32 %v3785_v52, %v3671_v28  ;;  %v6530_v28 = vld [vmem:[#allocation48_spill] sm:$0xff]  ;;  %v1840_v16 = vsel %vm1737_vm1, %v6526_v8, %v1839_v11  ;;  %v6540_v8 = vld [vmem:[#allocation58_spill] sm:$0xff]  ;;  %v6543_v11 = vld [vmem:[#allocation63_spill] sm:$0xff] }
0x17fd   : > { %3620 = vrot.lane.b32.xlu1 %v4202_v15, %s4464_s24  ;;  %v6524_v15 = vld [vmem:[#allocation42_spill] sm:$0xff]  ;;  %v1911_v63 = vrot.slane %v6530_v28, 4  ;;  %v4216_v57 = vrot.slane %v3789_v30, 11  ;;  %v1980_v29 = vrot.slane %v6533_v55, 4  ;;  %v6534_v22 = vld [vmem:[#allocation52_spill] sm:$0xff]  ;;  %v2010_v3 = vrot.slane %v6536_v7, 4 }
0x17fe   : > { %v1803_v4 = vrot.slane %v6524_v15, 4  ;;  %v1700_v6 = vadd.f32 %v1698_v53, %v1666_v18  ;;  %v4212_v38 = vrot.slane %v3754_v39, 10  ;;  %v4215_v42 = vrot.slane %v3788_v33, 11 }
0x17ff   : > { %v1979_v20 = vrot.slane %v6534_v22, 4  ;;  %v2079_v19 = vrot.slane %v6540_v8, 4 }
0x1800   : > { %3656 = vrot.lane.b32.xlu0 %v4206_v36, %s4464_s24  ;;  %v1805_v23 = vsel %vm443_vm13, %v1803_v4, %v1804_v9  ;;  %v1877_v36 = vrot.slane %v6527_v45, 4  ;;  %v1740_v27 = vadd.f32 %v1738_v13, %v1700_v6  ;;  %v2046_v9 = vrot.slane %v6537_v54, 4  ;;  %v6542_v45 = vld [vmem:[#allocation61_spill] sm:$0xff] }
0x1801   : > { %3654 = vrot.lane.b32.xlu1 %v4205_v60, %s4464_s24  ;;  %v1876_v60 = vrot.slane %v6528_v0, 4  ;;  %v1806_v5 = vsel %vm1737_vm1, %v6524_v15, %v1805_v23  ;;  %v1981_v53 = vsel %vm443_vm13, %v1979_v20, %v1980_v29  ;;  %v6538_v15 = vld [vmem:[#allocation56_spill] sm:$0xff]  ;;  %v1948_v13 = vsel %vm1879_vm2, %v6532_v62, %v1947_v2  ;;  %v6548_v29 = vld [vmem:[#allocation66_spill] sm:$0xff] }
0x1802   : > { %v1774_v1 = vadd.f32 %v1772_v44, %v1740_v27  ;;  %v2045_v4 = vrot.slane %v6538_v15, 4  ;;  %v1982_v30 = vsel %vm1879_vm2, %v6534_v22, %v1981_v53  ;;  %v2081_v44 = vsel %vm443_vm13, %v2079_v19, %v2080_v49  ;;  %v6553_v19 = vld [vmem:[#allocation73_spill] sm:$0xff] }
0x1803   : > { %v1878_v61 = vsel %vm443_vm13, %v1876_v60, %v1877_v36  ;;  %v2113_v36 = vrot.slane %v6542_v45, 4  ;;  %v2082_v62 = vsel %vm2013_vm3, %v6540_v8, %v2081_v44  ;;  %v2221_v22 = vrot.slane %v6548_v29, 4 }
0x1804   : > { %3695 = vrot.lane.b32.xlu0 %v3690_v32, %s4465_s26  ;;  %v6529_v32 = vld [vmem:[#allocation49_spill] sm:$0xff]  ;;  %v1808_v31 = vadd.f32 %v1806_v5, %v1774_v1  ;;  %v1880_v12 = vsel %vm1879_vm2, %v6528_v0, %v1878_v61  ;;  %v2047_v33 = vsel %vm443_vm13, %v2045_v4, %v2046_v9 }
0x1805   : > { %3693 = vrot.lane.b32.xlu1 %v3689_v14, %s4465_s26  ;;  %v1912_v17 = vrot.slane %v6529_v32, 4  ;;  %v2153_v32 = vrot.slane %v6543_v11, 4  ;;  %v6545_v1 = vld [vmem:[#allocation65_spill] sm:$0xff] }
0x1806   : > { %v1842_v26 = vadd.f32 %v1840_v16, %v1808_v31  ;;  %v2188_v61 = vrot.slane %v6545_v1, 4  ;;  %v6546_v16 = vld [vmem:[#allocation64_spill] sm:$0xff]  ;;  %v6558_v1 = vld [vmem:[#allocation77_spill] sm:$0xff] }
0x1807   : > { %v1913_v14 = vsel %vm443_vm13, %v1911_v63, %v1912_v17  ;;  %v6544_v17 = vld [vmem:[#allocation62_spill] sm:$0xff]  ;;  %v2048_v63 = vsel %vm2013_vm3, %v6538_v15, %v2047_v33  ;;  %v2187_v21 = vrot.slane %v6546_v16, 4  ;;  %v6551_v15 = vld [vmem:[#allocation71_spill] sm:$0xff] }
0x1808   : > { %3730 = vrot.lane.b32.xlu0 %v4210_v41, %s4465_s26  ;;  %v1914_v51 = vsel %vm1879_vm2, %v6530_v28, %v1913_v14  ;;  %v2011_v41 = vrot.slane %v6535_v58, 4  ;;  %v2152_v28 = vrot.slane %v6544_v17, 4  ;;  %v2295_v4 = vrot.slane %v6551_v15, 4  ;;  %v6562_v15 = vld [vmem:[#allocation82_spill] sm:$0xff] }
0x1809   : > { %3728 = vrot.lane.b32.xlu1 %v4209_v47, %s4465_s26  ;;  %v1882_v47 = vadd.f32 %v1880_v12, %v1842_v26  ;;  %v6547_v12 = vld [vmem:[#allocation67_spill] sm:$0xff] }
0x180a   : > { %v2012_v25 = vsel %vm443_vm13, %v2010_v3, %v2011_v41  ;;  %v2154_v31 = vsel %vm443_vm13, %v2152_v28, %v2153_v32  ;;  %v2222_v55 = vrot.slane %v6547_v12, 4  ;;  %v6549_v41 = vld [vmem:[#allocation68_spill] sm:$0xff]  ;;  %v6550_v3 = vld [vmem:[#allocation69_spill] sm:$0xff] }
0x180b   : > { %v1916_v18 = vadd.f32 %v1914_v51, %v1882_v47  ;;  %v2014_v60 = vsel %vm2013_vm3, %v6536_v7, %v2012_v25  ;;  %v2189_v51 = vsel %vm443_vm13, %v2187_v21, %v2188_v61  ;;  %v2156_v58 = vsel %vm2155_vm5, %v6544_v17, %v2154_v31 }
0x180c   : > { %3764 = vrot.lane.b32.xlu0 %v4213_v43, %s4465_s26  ;;  %v2256_v7 = vrot.slane %v6549_v41, 4  ;;  %v2255_v47 = vrot.slane %v6550_v3, 4  ;;  %v2190_v54 = vsel %vm2155_vm5, %v6546_v16, %v2189_v51  ;;  %v2223_v9 = vsel %vm443_vm13, %v2221_v22, %v2222_v55  ;;  %v6561_v41 = vld [vmem:[#allocation80_spill] sm:$0xff] }
0x180d   : > { %3762 = vrot.lane.b32.xlu1 %v4212_v38, %s4465_s26  ;;  %v1950_v6 = vadd.f32 %v1948_v13, %v1916_v18  ;;  %v6541_v38 = vld [vmem:[#allocation60_spill] sm:$0xff]  ;;  %v6552_v18 = vld [vmem:[#allocation70_spill] sm:$0xff]  ;;  %v2397_v61 = vrot.slane %v6558_v1, 4 }
0x180e   : > { %v5969_v50 = vpop.permute.xlu0 %2779  ;;  %v2114_v23 = vrot.slane %v6541_v38, 4  ;;  %v2294_v13 = vrot.slane %v6552_v18, 4  ;;  %v2257_v8 = vsel %vm443_vm13, %v2255_v47, %v2256_v7  ;;  %v2471_v7 = vrot.slane %v6561_v41, 4 }
0x180f   : > { %v5973_v35 = vpop.permute.xlu1 %2777  ;;  %v1984_v27 = vadd.f32 %v1982_v30, %v1950_v6  ;;  %v2330_v30 = vrot.slane %v6553_v19, 4  ;;  %v6554_v6 = vld [vmem:[#allocation72_spill] sm:$0xff]  ;;  %v2258_v32 = vsel %vm2155_vm5, %v6550_v3, %v2257_v8 }
0x1810   : > { %3798 = vrot.lane.b32.xlu0 %v4216_v57, %s4465_s26  ;;  %v2329_v33 = vrot.slane %v6554_v6, 4 }
0x1811   : > { %3796 = vrot.lane.b32.xlu1 %v4215_v42, %s4465_s26  ;;  %v2016_v5 = vadd.f32 %v2014_v60, %v1984_v27  ;;  %v2115_v42 = vsel %vm443_vm13, %v2113_v36, %v2114_v23  ;;  %v2224_v23 = vsel %vm2155_vm5, %v6548_v29, %v2223_v9  ;;  %v6555_v36 = vld [vmem:[#allocation75_spill] sm:$0xff]  ;;  %v6556_v27 = vld [vmem:[#allocation74_spill] sm:$0xff] }
0x1812   : > { %v5983_v59 = vpop.permute.xlu0 %2813  ;;  %v2116_v14 = vsel %vm2013_vm3, %v6542_v45, %v2115_v42  ;;  %v2296_v45 = vsel %vm443_vm13, %v2294_v13, %v2295_v4  ;;  %v2364_v60 = vrot.slane %v6555_v36, 4  ;;  %v2363_v44 = vrot.slane %v6556_v27, 4 }
0x1813   : > { %v5989_v10 = vpop.permute.xlu1 %2811  ;;  %v2050_v24 = vadd.f32 %v2048_v63, %v2016_v5  ;;  %v2331_v63 = vsel %vm443_vm13, %v2329_v33, %v2330_v30  ;;  %v6557_v5 = vld [vmem:[#allocation76_spill] sm:$0xff]  ;;  %v2298_v16 = vsel %vm2297_vm6, %v6552_v18, %v2296_v45  ;;  %v2506_v4 = vrot.slane %v6562_v15, 4  ;;  %v6563_v18 = vld [vmem:[#allocation81_spill] sm:$0xff]  ;;  %v6564_v30 = vld [vmem:[#allocation83_spill] sm:$0xff] }
0x1814   : > { %v2398_v42 = vrot.slane %v6557_v5, 4  ;;  %v2332_v29 = vsel %vm2297_vm6, %v6554_v6, %v2331_v63  ;;  %v2505_v13 = vrot.slane %v6563_v18, 4  ;;  %v2540_v6 = vrot.slane %v6564_v30, 4  ;;  %v6565_v33 = vld [vmem:[#allocation84_spill] sm:$0xff] }
0x1815   : > { %v2084_v26 = vadd.f32 %v2082_v62, %v2050_v24  ;;  %v2365_v62 = vsel %vm443_vm13, %v2363_v44, %v2364_v60  ;;  %v6559_v24 = vld [vmem:[#allocation79_spill] sm:$0xff] }
0x1816   : > { %v5996_v39 = vpop.permute.xlu0 %2852  ;;  %v2437_v31 = vrot.slane %v6559_v24, 4  ;;  %v2399_v51 = vsel %vm443_vm13, %v2397_v61, %v2398_v42  ;;  %v2366_v3 = vsel %vm2297_vm6, %v6556_v27, %v2365_v62  ;;  %v2507_v60 = vsel %vm443_vm13, %v2505_v13, %v2506_v4  ;;  %v6566_v27 = vld [vmem:[#allocation86_spill] sm:$0xff]  ;;  %v6568_v61 = vld [vmem:[#allocation87_spill] sm:$0xff] }
0x1817   : > { %v6001_v52 = vpop.permute.xlu1 %2850  ;;  %v2118_v53 = vadd.f32 %v2116_v14, %v2084_v26  ;;  %v6560_v14 = vld [vmem:[#allocation78_spill] sm:$0xff]  ;;  %v2400_v9 = vsel %vm2297_vm6, %v6558_v1, %v2399_v51  ;;  %v2579_v44 = vrot.slane %v6566_v27, 4  ;;  %v2614_v1 = vrot.slane %v5515_v37, 4 }
0x1818   : > { %v2436_v12 = vrot.slane %v6560_v14, 4  ;;  %v2508_v62 = vsel %vm2439_vm7, %v6563_v18, %v2507_v60  ;;  %v2713_v13 = vrot.slane %v5636_v46, 4 }
0x1819   : > { %v2158_v40 = vadd.f32 %v2156_v58, %v2118_v53  ;;  %v2472_v58 = vrot.slane %v5470_v48, 4 }
0x181a   : > { %v6010_v43 = vpop.permute.xlu0 %2887  ;;  %v2438_v53 = vsel %vm443_vm13, %v2436_v12, %v2437_v31 }
0x181b   : > { %v6015_v0 = vpop.permute.xlu1 %2885  ;;  %v2192_v38 = vadd.f32 %v2190_v54, %v2158_v40  ;;  %v2473_v8 = vsel %vm443_vm13, %v2471_v7, %v2472_v58  ;;  %v2440_v19 = vsel %vm2439_vm7, %v6560_v14, %v2438_v53  ;;  %v6569_v14 = vld [vmem:[#allocation89_spill] sm:$0xff]  ;;  %v6571_v7 = vld [vmem:[#allocation91_spill] sm:$0xff] }
0x181c   : > { %v2474_v36 = vsel %vm2439_vm7, %v6561_v41, %v2473_v8  ;;  %v2648_v12 = vrot.slane %v6569_v14, 4 }
0x181d   : > { %v2226_v28 = vadd.f32 %v2224_v23, %v2192_v38  ;;  %v2539_v38 = vrot.slane %v6565_v33, 4 }
0x181e   : > { %v6024_v57 = vpop.permute.xlu0 %2921 }
0x181f   : > { %v6029_v34 = vpop.permute.xlu1 %2919  ;;  %v2260_v21 = vadd.f32 %v2258_v32, %v2226_v28  ;;  %v6567_v32 = vld [vmem:[#allocation85_spill] sm:$0xff]  ;;  %v2541_v42 = vsel %vm443_vm13, %v2539_v38, %v2540_v6 }
0x1820   : > { %v2578_v28 = vrot.slane %v6567_v32, 4  ;;  %v2542_v37 = vsel %vm2439_vm7, %v6565_v33, %v2541_v42  ;;  %v2816_v42 = vrot.slane %v5983_v59, 4  ;;  %v2889_v59 = vrot.slane %v6015_v0, 4 }
0x1821   : > { %v2300_v26 = vadd.f32 %v2298_v16, %v2260_v21  ;;  %v2613_v16 = vrot.slane %v6568_v61, 4 }
0x1822   : > { %v6038_v20 = vpop.permute.xlu0 %2955  ;;  %v2580_v31 = vsel %vm443_vm13, %v2578_v28, %v2579_v44  ;;  %v2782_v44 = vrot.slane %v5969_v50, 4  ;;  %v2854_v50 = vrot.slane %v6001_v52, 4 }
0x1823   : > { %v6041_v2 = vpop.permute.xlu1 %2953  ;;  %v2334_v47 = vadd.f32 %v2332_v29, %v2300_v26  ;;  %v6570_v29 = vld [vmem:[#allocation88_spill] sm:$0xff]  ;;  %v2615_v41 = vsel %vm443_vm13, %v2613_v16, %v2614_v1  ;;  %v2815_v1 = vrot.slane %v5989_v10, 4 }
0x1824   : > { %v2647_v26 = vrot.slane %v6570_v29, 4  ;;  %v2616_v30 = vsel %vm2581_vm8, %v6568_v61, %v2615_v41 }
0x1825   : > { %v2368_v48 = vadd.f32 %v2366_v3, %v2334_v47  ;;  %v2682_v3 = vrot.slane %v6571_v7, 4  ;;  %v6572_v47 = vld [vmem:[#allocation90_spill] sm:$0xff]  ;;  %v2924_v7 = vrot.slane %v6024_v57, 4 }
0x1826   : > { %v6052_v25 = vpop.permute.xlu0 %2994  ;;  %v2681_v53 = vrot.slane %v6572_v47, 4  ;;  %v2649_v18 = vsel %vm443_vm13, %v2647_v26, %v2648_v12  ;;  %v2817_v12 = vsel %vm443_vm13, %v2815_v1, %v2816_v42 }
0x1827   : > { %v6054_v49 = vpop.permute.xlu1 %2992  ;;  %v2402_v23 = vadd.f32 %v2400_v9, %v2368_v48  ;;  %v2582_v9 = vsel %vm2581_vm8, %v6567_v32, %v2580_v31  ;;  %v6573_v48 = vld [vmem:[#allocation92_spill] sm:$0xff]  ;;  %v2650_v38 = vsel %vm2581_vm8, %v6570_v29, %v2649_v18  ;;  %v2781_v32 = vrot.slane %v5973_v35, 4 }
0x1828   : > { %v2712_v8 = vrot.slane %v6573_v48, 4  ;;  %v2683_v33 = vsel %vm443_vm13, %v2681_v53, %v2682_v3  ;;  %v2855_v31 = vrot.slane %v5996_v39, 4  ;;  %v2890_v29 = vrot.slane %v6010_v43, 4 }
0x1829   : > { %v2442_v5 = vadd.f32 %v2440_v19, %v2402_v23  ;;  %v2684_v46 = vsel %vm2581_vm8, %v6572_v47, %v2683_v33  ;;  %v2923_v3 = vrot.slane %v6029_v34, 4  ;;  %v2818_v43 = vsel %vm2715_vm15, %v5989_v10, %v2817_v12 }
0x182a   : > { %v6064_v11 = vpop.permute.xlu0 %3029  ;;  %v2714_v60 = vsel %vm443_vm13, %v2712_v8, %v2713_v13  ;;  %v2856_v39 = vsel %vm443_vm13, %v2854_v50, %v2855_v31  ;;  %v2891_v53 = vsel %vm443_vm13, %v2889_v59, %v2890_v29  ;;  %v2996_v10 = vrot.slane %v6054_v49, 4 }
0x182b   : > { %v6068_v17 = vpop.permute.xlu1 %3027  ;;  %v2476_v21 = vadd.f32 %v2474_v36, %v2442_v5  ;;  %v2716_v5 = vsel %vm2715_vm15, %v6573_v48, %v2714_v60  ;;  %v2925_v13 = vsel %vm443_vm13, %v2923_v3, %v2924_v7  ;;  %v2997_v48 = vrot.slane %v6052_v25, 4 }
0x182c   : > { %v2892_v8 = vsel %vm2857_vm9, %v6015_v0, %v2891_v53  ;;  %v3031_v33 = vrot.slane %v6068_v17, 4 }
0x182d   : > { %v2510_v58 = vadd.f32 %v2508_v62, %v2476_v21  ;;  %v2783_v62 = vsel %vm443_vm13, %v2781_v32, %v2782_v44  ;;  %v2998_v60 = vsel %vm443_vm13, %v2996_v10, %v2997_v48 }
0x182e   : > { %v6078_v55 = vpop.permute.xlu0 %3063 }
0x182f   : > { %v6082_v22 = vpop.permute.xlu1 %3061  ;;  %v2544_v4 = vadd.f32 %v2542_v37, %v2510_v58  ;;  %v2784_v58 = vsel %vm2715_vm15, %v5973_v35, %v2783_v62  ;;  %vm2999_vm15 = vcmask 621568   ;;  %v3066_v0 = vrot.slane %v6078_v55, 4 }
0x1830   : > { %v3000_v42 = vsel %vm2999_vm15, %v6054_v49, %v2998_v60 }
0x1831   : > { %v2584_v6 = vadd.f32 %v2582_v9, %v2544_v4  ;;  %v2957_v9 = vrot.slane %v6041_v2, 4  ;;  %v2858_v4 = vsel %vm2857_vm9, %v6001_v52, %v2856_v39 }
0x1832   : > { %v6090_v54 = vpop.permute.xlu0 %3097 }
0x1833   : > { %v6096_v40 = vpop.permute.xlu1 %3095  ;;  %v2618_v36 = vadd.f32 %v2616_v30, %v2584_v6  ;;  %v3032_v6 = vrot.slane %v6064_v11, 4 }
0x1835   : > { %v2652_v28 = vadd.f32 %v2650_v38, %v2618_v36  ;;  %v2926_v38 = vsel %vm2857_vm9, %v6029_v34, %v2925_v13  ;;  %v3033_v32 = vsel %vm443_vm13, %v3031_v33, %v3032_v6  ;;  %v3099_v34 = vrot.slane %v6096_v40, 4 }
0x1836   : > { %v6103_v45 = vpop.permute.xlu0 %3136  ;;  %v3034_v31 = vsel %vm2999_vm15, %v6068_v17, %v3033_v32 }
0x1837   : > { %v6110_v63 = vpop.permute.xlu1 %3134  ;;  %v2686_v16 = vadd.f32 %v2684_v46, %v2652_v28  ;;  %v3065_v46 = vrot.slane %v6082_v22, 4  ;;  %v3100_v28 = vrot.slane %v6090_v54, 4  ;;  %v3139_v62 = vrot.slane %v6103_v45, 4 }
0x1839   : > { %v2718_v14 = vadd.f32 %v2716_v5, %v2686_v16  ;;  %v3067_v16 = vsel %vm443_vm13, %v3065_v46, %v3066_v0  ;;  %v3101_v50 = vsel %vm443_vm13, %v3099_v34, %v3100_v28 }
0x183a   : > { %v6117_v24 = vpop.permute.xlu0 %3170  ;;  %v3068_v29 = vsel %vm2999_vm15, %v6082_v22, %v3067_v16  ;;  %v3102_v39 = vsel %vm2999_vm15, %v6096_v40, %v3101_v50 }
0x183b   : > { %v6122_v51 = vpop.permute.xlu1 %3168  ;;  %v2752_v37 = vadd.f32 %v5650_v56, %v2718_v14  ;;  %v2958_v56 = vrot.slane %v6038_v20, 4  ;;  %v3173_v14 = vrot.slane %v6117_v24, 4 }
0x183c   : > { %v3172_v12 = vrot.slane %v6122_v51, 4 }
0x183d   : > { %v2786_v47 = vadd.f32 %v2784_v58, %v2752_v37  ;;  %v2959_v30 = vsel %vm443_vm13, %v2957_v9, %v2958_v56 }
0x183e   : > { %v6131_v15 = vpop.permute.xlu0 %3204  ;;  %v2960_v11 = vsel %vm2857_vm9, %v6041_v2, %v2959_v30  ;;  %v3138_v2 = vrot.slane %v6110_v63, 4  ;;  %v3174_v24 = vsel %vm443_vm13, %v3172_v12, %v3173_v14 }
0x183f   : > { %v6136_v19 = vpop.permute.xlu1 %3202  ;;  %v2820_v57 = vadd.f32 %v2818_v43, %v2786_v47  ;;  %v3207_v58 = vrot.slane %v6131_v15, 4  ;;  %v3175_v40 = vsel %vm3108_vm4, %v6122_v51, %v3174_v24 }
0x1840   : > { %v3140_v45 = vsel %vm443_vm13, %v3138_v2, %v3139_v62  ;;  %v3206_v17 = vrot.slane %v6136_v19, 4 }
0x1841   : > { %v2860_v20 = vadd.f32 %v2858_v4, %v2820_v57  ;;  %v3141_v47 = vsel %vm3108_vm4, %v6110_v63, %v3140_v45 }
0x1842   : > { %v6143_v23 = vpop.permute.xlu0 %3238  ;;  %v3208_v15 = vsel %vm443_vm13, %v3206_v17, %v3207_v58 }
0x1843   : > { %v6146_v27 = vpop.permute.xlu1 %3236  ;;  %v2894_v25 = vadd.f32 %v2892_v8, %v2860_v20  ;;  %v3241_v3 = vrot.slane %v6143_v23, 4  ;;  %v3209_v63 = vsel %vm3108_vm4, %v6136_v19, %v3208_v15 }
0x1844   : > { %v3240_v43 = vrot.slane %v6146_v27, 4 }
0x1845   : > { %v2928_v44 = vadd.f32 %v2926_v38, %v2894_v25 }
0x1846   : > { %v6156_v61 = vpop.permute.xlu0 %3277  ;;  %v3242_v23 = vsel %vm443_vm13, %v3240_v43, %v3241_v3 }
0x1847   : > { %v6158_v21 = vpop.permute.xlu1 %3275  ;;  %v2962_v55 = vadd.f32 %v2960_v11, %v2928_v44  ;;  %v3280_v9 = vrot.slane %v6156_v61, 4  ;;  %v3243_v6 = vsel %vm3108_vm4, %v6146_v27, %v3242_v23  ;;  %vm3416_vm4 = vcmask 506880  }
0x1848   : > { %v3279_v4 = vrot.slane %v6158_v21, 4 }
0x1849   : > { %v3002_v54 = vadd.f32 %v3000_v42, %v2962_v55 }
0x184a   : > { %v6166_v26 = vpop.permute.xlu0 %3312  ;;  %v3281_v61 = vsel %vm443_vm13, %v3279_v4, %v3280_v9 }
0x184b   : > { %v6171_v41 = vpop.permute.xlu1 %3310  ;;  %v3036_v37 = vadd.f32 %v3034_v31, %v3002_v54  ;;  %v3315_v13 = vrot.slane %v6166_v26, 4  ;;  %v3283_v60 = vsel %vm3282_vm10, %v6158_v21, %v3281_v61 }
0x184c   : > { %v3314_v48 = vrot.slane %v6171_v41, 4 }
0x184d   : > { %v3070_v7 = vadd.f32 %v3068_v29, %v3036_v37 }
0x184e   : > { %v6181_v35 = vpop.permute.xlu0 %3346  ;;  %v3316_v26 = vsel %vm443_vm13, %v3314_v48, %v3315_v13 }
0x184f   : > { %v6185_v18 = vpop.permute.xlu1 %3344  ;;  %v3104_v56 = vadd.f32 %v3102_v39, %v3070_v7  ;;  %v3349_v30 = vrot.slane %v6181_v35, 4  ;;  %v3317_v27 = vsel %vm3282_vm10, %v6171_v41, %v3316_v26 }
0x1850   : > { %v3348_v51 = vrot.slane %v6185_v18, 4 }
0x1851   : > { %v3143_v57 = vadd.f32 %v3141_v47, %v3104_v56 }
0x1852   : > { %v6195_v52 = vpop.permute.xlu0 %3380  ;;  %v3350_v35 = vsel %vm443_vm13, %v3348_v51, %v3349_v30 }
0x1853   : > { %v6199_v36 = vpop.permute.xlu1 %3378  ;;  %v3177_v20 = vadd.f32 %v3175_v40, %v3143_v57  ;;  %v3383_v38 = vrot.slane %v6195_v52, 4  ;;  %v3351_v21 = vsel %vm3282_vm10, %v6185_v18, %v3350_v35 }
0x1854   : > { %v3382_v25 = vrot.slane %v6199_v36, 4 }
0x1855   : > { %v3211_v33 = vadd.f32 %v3209_v63, %v3177_v20 }
0x1856   : > { %v6209_v5 = vpop.permute.xlu0 %3411  ;;  %v3384_v52 = vsel %vm443_vm13, %v3382_v25, %v3383_v38 }
0x1857   : > { %v6213_v1 = vpop.permute.xlu1 %3409  ;;  %v3245_v46 = vadd.f32 %v3243_v6, %v3211_v33  ;;  %v3414_v11 = vrot.slane %v6209_v5, 4  ;;  %v3385_v41 = vsel %vm3282_vm10, %v6199_v36, %v3384_v52 }
0x1858   : > { %v3413_v44 = vrot.slane %v6213_v1, 4 }
0x1859   : > { %v3285_v32 = vadd.f32 %v3283_v60, %v3245_v46 }
0x185a   : > { %v3447_v49 = vpop.permute.xlu0 %3446  ;;  %v3415_v5 = vsel %vm443_vm13, %v3413_v44, %v3414_v11  ;;  %v4466_v11 = vmov 1966171168  }
0x185b   : > { %v6225_v59 = vpop.permute.xlu1 %3444  ;;  %v3449_v28 = vrot.slane %v3447_v49, 4  ;;  %v3319_v16 = vadd.f32 %v3317_v27, %v3285_v32  ;;  %v3417_v49 = vsel %vm3416_vm4, %v6213_v1, %v3415_v5  ;;  %v3808_v44 = vunpack.c.l.s4 %v4466_v11 }
0x185c   : > { %v3448_v34 = vrot.slane %v6225_v59, 4 }
0x185d   : > { %v3353_v31 = vadd.f32 %v3351_v21, %v3319_v16  ;;  %v3809_v5 = vunpack.c.0.s8 %v3808_v44 }
0x185e   : > { %v3481_v22 = vpop.permute.xlu0 %3480  ;;  %v3450_v54 = vsel %vm443_vm13, %v3448_v34, %v3449_v28 }
0x185f   : > { %v3479_v53 = vpop.permute.xlu1 %3478  ;;  %v3483_v62 = vrot.slane %v3481_v22, 4  ;;  %v3387_v29 = vadd.f32 %v3385_v41, %v3353_v31  ;;  %v3451_v17 = vsel %vm3416_vm4, %v6225_v59, %v3450_v54 }
0x1860   : > { %v3482_v2 = vrot.slane %v3479_v53, 4 }
0x1861   : > { %v3419_v39 = vadd.f32 %v3417_v49, %v3387_v29 }
0x1862   : > { %v3515_v10 = vpop.permute.xlu0 %3514  ;;  %v3484_v37 = vsel %vm443_vm13, %v3482_v2, %v3483_v62 }
0x1863   : > { %v3513_v8 = vpop.permute.xlu1 %3512  ;;  %v3517_v50 = vrot.slane %v3515_v10, 4  ;;  %v3485_v43 = vsel %vm3416_vm4, %v3479_v53, %v3484_v37  ;;  %v3453_v1 = vadd.f32 %v3451_v17, %v3419_v39 }
0x1864   : > { %v3516_v14 = vrot.slane %v3513_v8, 4 }
0x1865   : > { %v3487_v4 = vadd.f32 %v3485_v43, %v3453_v1 }
0x1866   : > { %v3554_v19 = vpop.permute.xlu0 %3553  ;;  %v3518_v36 = vsel %vm443_vm13, %v3516_v14, %v3517_v50  ;;  %v6574_v14 = vld [vmem:[#allocation6_spill] sm:$0xff] }
0x1867   : > { %v3552_v0 = vpop.permute.xlu1 %3551  ;;  %v3556_v45 = vrot.slane %v3554_v19, 4  ;;  %v3519_v9 = vsel %vm3416_vm4, %v3513_v8, %v3518_v36 }
0x1868   : > { %v3555_v58 = vrot.slane %v3552_v0, 4  ;;  %v3521_v10 = vadd.f32 %v3519_v9, %v3487_v4 }
0x186a   : > { %v3589_v42 = vpop.permute.xlu0 %3588  ;;  %v3557_v47 = vsel %vm443_vm13, %v3555_v58, %v3556_v45  ;;  %v6575_v45 = vlaneseq }
0x186b   : > { %v3587_v55 = vpop.permute.xlu1 %3586  ;;  %v3591_v7 = vrot.slane %v3589_v42, 4  ;;  %v3559_v13 = vsel %vm3558_vm11, %v3552_v0, %v3557_v47 }
0x186c   : > { %v3590_v24 = vrot.slane %v3587_v55, 4  ;;  %v3561_v30 = vadd.f32 %v3559_v13, %v3521_v10  ;;  %vm3824_vm14 = vcmp.lt.s32.totalorder %v6575_v45, 256 }
0x186e   : > { %v3623_v12 = vpop.permute.xlu0 %3622  ;;  %v3592_v59 = vsel %vm443_vm13, %v3590_v24, %v3591_v7 }
0x186f   : > { %v3621_v18 = vpop.permute.xlu1 %3620  ;;  %v3625_v56 = vrot.slane %v3623_v12, 4  ;;  %v3593_v61 = vsel %vm3558_vm11, %v3587_v55, %v3592_v59  ;;  %v3812_v12 = vsub.s32 %v3809_v5, %v6574_v14 }
0x1870   : > { %v3624_v15 = vrot.slane %v3621_v18, 4  ;;  %v3595_v38 = vadd.f32 %v3593_v61, %v3561_v30 }
0x1872   : > { %v3657_v3 = vpop.permute.xlu0 %3656  ;;  %v3626_v53 = vsel %vm443_vm13, %v3624_v15, %v3625_v56 }
0x1873   : > { %v3655_v22 = vpop.permute.xlu1 %3654  ;;  %v3659_v40 = vrot.slane %v3657_v3, 4  ;;  %v3627_v6 = vsel %vm3558_vm11, %v3621_v18, %v3626_v53 }
0x1874   : > { %v3658_v57 = vrot.slane %v3655_v22, 4  ;;  %v3629_v0 = vadd.f32 %v3627_v6, %v3595_v38 }
0x1876   : > { %v3696_v23 = vpop.permute.xlu0 %3695  ;;  %v3660_v51 = vsel %vm443_vm13, %v3658_v57, %v3659_v40 }
0x1877   : > { %v3694_v48 = vpop.permute.xlu1 %3693  ;;  %v3698_v63 = vrot.slane %v3696_v23, 4  ;;  %v3661_v60 = vsel %vm3558_vm11, %v3655_v22, %v3660_v51 }
0x1878   : > { %v3697_v20 = vrot.slane %v3694_v48, 4  ;;  %v3663_v28 = vadd.f32 %v3661_v60, %v3629_v0 }
0x187a   : > { %v3731_v8 = vpop.permute.xlu0 %3730  ;;  %v3699_v25 = vsel %vm443_vm13, %v3697_v20, %v3698_v63 }
0x187b   : > { %v3733_v33 = vrot.slane %v3731_v8, 4  ;;  %v3729_v26 = vpop.permute.xlu1 %3728  ;;  %v3701_v27 = vsel %vm3700_vm12, %v3694_v48, %v3699_v25 }
0x187c   : > { %v3732_v19 = vrot.slane %v3729_v26, 4  ;;  %v3703_v21 = vadd.f32 %v3701_v27, %v3663_v28 }
0x187e   : > { %v3734_v46 = vsel %vm443_vm13, %v3732_v19, %v3733_v33  ;;  %v3765_v35 = vpop.permute.xlu0 %3764 }
0x187f   : > { %v3767_v32 = vrot.slane %v3765_v35, 4  ;;  %v3763_v52 = vpop.permute.xlu1 %3762  ;;  %v3735_v42 = vsel %vm3700_vm12, %v3729_v26, %v3734_v46 }
0x1880   : > { %v3766_v34 = vrot.slane %v3763_v52, 4  ;;  %v3737_v31 = vadd.f32 %v3735_v42, %v3703_v21 }
0x1882   : > { %v3768_v55 = vsel %vm443_vm13, %v3766_v34, %v3767_v32  ;;  %v3799_v16 = vpop.permute.xlu0 %3798 }
0x1883   : > { %v3769_v62 = vsel %vm3700_vm12, %v3763_v52, %v3768_v55  ;;  %v3801_v2 = vrot.slane %v3799_v16, 4  ;;  %v3797_v41 = vpop.permute.xlu1 %3796 }
0x1884   : > { %v3800_v54 = vrot.slane %v3797_v41, 4  ;;  %v3771_v50 = vadd.f32 %v3769_v62, %v3737_v31 }
0x1886   : > { %v3802_v49 = vsel %vm443_vm13, %v3800_v54, %v3801_v2 }
0x1887   : > { %v3803_v18 = vsel %vm3700_vm12, %v3797_v41, %v3802_v49 }
0x1888   : > { %v3805_v29 = vadd.f32 %v3803_v18, %v3771_v50 }
0x188a   : > { %v3813_v37 = vrot.slane %v3805_v29, %v3812_v12 }
0x188c   : > { %v3820_v58 = vrot.slane %v3813_v37, %v3812_v12 }
0x188e   : > { %3826 = vst.msk [vmem:[%s272_s6] sm:$0x3] %vm3824_vm14, %v3820_v58 }
0x188f   : > { %4350 = shalt.err (!%p4347_p5)
}
0x1890   : > { %s4351_s21 = scalar_lea.hbm %s6301_s11, 32  ;;  %s4355_s26 = scalar_lea.hbm %s6352_s4, 64 }
0x1891   : > { %p4352_p6 = scmp.ne.s32.totalorder %s6301_s11, %s4351_s21  ;;  %p4356_p10 = scmp.lt.u32.totalorder %s6301_s11, %s6352_s4 }
0x1892   : > { %p4357_p11 = scmp.lt.u32.totalorder %s4355_s26, %s4351_s21  ;;  %p4359_p13 = scmp.lt.u32.totalorder %s4351_s21, %s6301_s11 }
0x1893   : > { %p4353_p7 = pnand %p4352_p6, %p4533_p4 }
0x1894   : > { %p4358_p12 = por %p4357_p11, %p4356_p10 }
0x1895   : > { %p4354_p9 = pneg %p4353_p7 }
0x1896   : > { %p4360_p0 = por %p4359_p13, %p4358_p12 }
0x1898   : > { %p4361_p1 = pnand %p4360_p0, %p4354_p9 }
0x189a   : > { %4364 = shalt.err (!%p4361_p1)
}
0x189b   : > { %4228 = dma.vmem_to_hbm [thread:$0]  (%p4533_p4), %s6303_s7, 32, %s6301_s11, %s3828_s12  }
0x189c PF: > { %p4234_p2 = scmp.ge.s32.totalorder %s4415_s20, 2  ;;  %s3856_s5 = sand.u32 1, %s4395_s15  }
0x189d   : > { %s3857_s6 = scalar_lea.sflag [#allocation4], %s3856_s5 }
0x189e   : > { %p4231_p3 = pnand %p4234_p2, %p4540_p8 }
0x18a0   : > { %4390 = dma.done.wait (!%p4231_p3), %s3857_s6, 32  }
0x18a1   : > { %4392 = vsyncadd (!%p4231_p3), %s3857_s6, 4294967264  ;;  %s17_s20 = sadd.s32 1, %s4415_s20   ;;  %s6576_s15 = smov %s4399_s16 }
0x18a2   : > { %p14_p5 = scmp.ge.s32.totalorder %s17_s20, 4   ;;  %s6577_s16 = smov %s4403_s17 }
0x18a3   : > { %s6578_s17 = smov %s4546_s28  ;;  %s6579_s18 = smov %s4411_s19 }
0x18a4   : > { %s6580_s19 = smov %s6582_s23  ;;  %16 = sbr.rel (!%p14_p5) target bundleno = 4 (0x4), region = 176 }
0x18ab   :  { %3862 = vsyncpa [#allocation4], 1 }
0x18ac   :  { %3864 = vsyncpa [#allocation4 + $0x1], 1 }

</bundles_post_ra>
